<compile_context>
chip_gen: v6e
topology: v6e:2x2x1
jax: 0.10.0
libtpu: 0.0.40
codegen_flags: <defaults>
</compile_context>

<pallas_src>
import jax
import jax.numpy as jnp
from jax.experimental import pallas as pl
from jax.experimental.pallas import tpu as pltpu


def _se_conv_kernel(x_se_ref, w1t_ref, b1_ref, x_ref, w2_ref, out_ref):
    # x_se_ref: (1, 56)      f32   SE input vector (row)
    # w1t_ref:  (56, 1344)   bf16  conv2d121 weight, pre-transposed/pre-cast
    # b1_ref:   (1, 1344)    f32   conv2d121 bias (row)
    # x_ref:    (1344, 196)  bf16  main feature map, spatial flattened
    # w2_ref:   (224, 1344)  bf16  conv2d122 weight
    # out_ref:  (224, 196)   f32

    # SE gate: tiny (1,56)@(56,1344) bf16 MXU matmul with f32 accumulation.
    x_se = x_se_ref[...].astype(w1t_ref.dtype)                    # (1, 56)
    s = jnp.dot(x_se, w1t_ref[...],
                preferred_element_type=jnp.float32)               # (1, 1344)
    s = s + b1_ref[...]
    gate = 1.0 / (1.0 + jnp.exp(-s))                              # exact sigmoid (EUP)
    gate_b = gate.astype(w2_ref.dtype)                            # (1, 1344) bf16

    # Fold gate into w2 rows (single bf16 VPU mul), then one bf16 MXU matmul.
    w2s = w2_ref[...] * gate_b                                    # (224, 1344) bf16
    out_ref[...] = jnp.dot(w2s, x_ref[...],
                           preferred_element_type=jnp.float32)    # (224, 196)


@jax.jit
def se_conv(x394, x391, w1t, b1_row, w2r):
    """x394: (1,56,1,1) f32, x391: (1,1344,14,14) bf16 -> (1,224,14,14) f32.

    w1t: (56,1344) bf16 (pre-transposed), b1_row: (1,1344) f32,
    w2r: (224,1344) bf16.  All weight prep happens once at init.
    """
    N, C_se, _, _ = x394.shape
    _, C_mid, H, W = x391.shape
    C_out = w2r.shape[0]
    HW = H * W
    f32 = jnp.float32

    # Free reshapes of activations under jit (contiguous views).
    x_se = x394.reshape(1, C_se).astype(f32)                       # (1, 56)
    x = x391.reshape(C_mid, HW)                                    # (1344, 196) bf16

    cost = pl.CostEstimate(
        flops=2 * C_out * C_mid * HW + 2 * C_mid * C_se,
        transcendentals=C_mid,
        bytes_accessed=(x_se.size * 4 + w1t.size * 2 + b1_row.size * 4
                        + x.size * 2 + w2r.size * 2 + C_out * HW * 4),
    )

    out = pl.pallas_call(
        _se_conv_kernel,
        out_shape=jax.ShapeDtypeStruct((C_out, HW), f32),
        grid_spec=pltpu.PrefetchScalarGridSpec(
            num_scalar_prefetch=0,
            grid=(1,),
            in_specs=[
                pl.BlockSpec((1, C_se), lambda i: (0, 0)),       # x_se  (full)
                pl.BlockSpec((C_se, C_mid), lambda i: (0, 0)),   # w1^T  (full)
                pl.BlockSpec((1, C_mid), lambda i: (0, 0)),      # b1    (full)
                pl.BlockSpec((C_mid, HW), lambda i: (0, 0)),     # x     (full)
                pl.BlockSpec((C_out, C_mid), lambda i: (0, 0)),  # w2    (full)
            ],
            out_specs=pl.BlockSpec((C_out, HW), lambda i: (0, 0)),
        ),
        compiler_params=pltpu.CompilerParams(
            dimension_semantics=("arbitrary",)),
        cost_estimate=cost,
    )(x_se, w1t, b1_row, x, w2r)

    return out.reshape(N, C_out, H, W)


def _reference(x394, x391_b, w1t_b, b1, w2_b):
    # Pure-JAX f32 reference of the PyTorch forward (1x1 convs as matmuls),
    # evaluated on the same bf16-rounded operands the kernel consumes.
    x_se = x394.reshape(-1).astype(jnp.float32)                       # (56,)
    w1 = w1t_b.astype(jnp.float32).T                                  # (1344, 56)
    s = jax.nn.sigmoid(w1 @ x_se + b1.astype(jnp.float32))            # (1344,)
    y = s[None, :, None, None] * x391_b.astype(jnp.float32)           # (1,1344,14,14)
    return jnp.einsum('oc,nchw->nohw', w2_b.astype(jnp.float32), y)


if __name__ == "__main__":
    key = jax.random.PRNGKey(0)
    k1, k2, k3, k4, k5 = jax.random.split(key, 5)

    # Parameters (PyTorch layouts, 1x1 conv weights squeezed to 2-D).
    w1 = jax.random.normal(k1, (1344, 56), dtype=jnp.float32) * 0.05   # conv2d121 w
    b1 = jax.random.normal(k2, (1344,), dtype=jnp.float32) * 0.05      # conv2d121 b
    w2 = jax.random.normal(k3, (224, 1344), dtype=jnp.float32) * 0.02  # conv2d122 w

    # Inputs (shapes from the module's forward).
    x394 = jax.random.normal(k4, (1, 56, 1, 1), dtype=jnp.float32)
    x391 = jax.random.normal(k5, (1, 1344, 14, 14), dtype=jnp.float32)

    # One-time weight prep ("at init"): transpose + bf16 casts off the hot path.
    w1t_b = jnp.transpose(w1).astype(jnp.bfloat16)     # (56, 1344) bf16
    b1_row = b1.reshape(1, -1)                         # (1, 1344)  f32
    w2_b = w2.astype(jnp.bfloat16)                     # (224, 1344) bf16
    x391_b = x391.astype(jnp.bfloat16)                 # activation in bf16

    out = se_conv(x394, x391_b, w1t_b, b1_row, w2_b)
    out = jax.block_until_ready(out)

    # Reference in f32 on the same bf16-rounded operands (tolerance covers the
    # in-kernel bf16 MXU inputs and the bf16 gate-folded weight rounding).
    ref = _reference(x394, x391_b, w1t_b, b1, w2_b)

    assert out.shape == (1, 224, 14, 14), out.shape
    assert out.dtype == jnp.float32, out.dtype
    max_err = float(jnp.max(jnp.abs(out - ref)))
    assert jnp.allclose(out, ref, atol=1e-2, rtol=1e-2), (
        f"mismatch vs reference, max abs err {max_err}")

    print("KERNEL_OK")
</pallas_src>

<mosaic_0001>
module attributes {stable_mosaic.version = 11 : i64} {
  func.func @_se_conv_kernel(%arg0: i32, %arg1: memref<1x56xf32, #tpu.memory_space<vmem>>, %arg2: memref<56x1344xbf16, #tpu.memory_space<vmem>>, %arg3: memref<1x1344xf32, #tpu.memory_space<vmem>>, %arg4: memref<1344x196xbf16, #tpu.memory_space<vmem>>, %arg5: memref<224x1344xbf16, #tpu.memory_space<vmem>>, %arg6: memref<224x196xf32, #tpu.memory_space<vmem>>) attributes {dimension_semantics = [#tpu.dimension_semantics<arbitrary>], iteration_bounds = array<i64: 1>, scalar_prefetch = 0 : i64, scratch_operands = 0 : i64, tpu.core_type = #tpu.core_type<tc>, window_params = [{pipeline_mode = #tpu.pipeline_mode<synchronous>, transform_indices = @transform_0, window_bounds = array<i64: 1, 56>}, {pipeline_mode = #tpu.pipeline_mode<synchronous>, transform_indices = @transform_1, window_bounds = array<i64: 56, 1344>}, {pipeline_mode = #tpu.pipeline_mode<synchronous>, transform_indices = @transform_2, window_bounds = array<i64: 1, 1344>}, {pipeline_mode = #tpu.pipeline_mode<synchronous>, transform_indices = @transform_3, window_bounds = array<i64: 1344, 196>}, {pipeline_mode = #tpu.pipeline_mode<synchronous>, transform_indices = @transform_4, window_bounds = array<i64: 224, 1344>}, {pipeline_mode = #tpu.pipeline_mode<synchronous>, transform_indices = @transform_5, window_bounds = array<i64: 224, 196>}]} {
    %c0 = arith.constant 0 : index
    %c0_0 = arith.constant 0 : index
    %0 = vector.load %arg1[%c0, %c0_0] : memref<1x56xf32, #tpu.memory_space<vmem>>, vector<1x56xf32>
    %1 = arith.truncf %0 : vector<1x56xf32> to vector<1x56xbf16>
    %c0_1 = arith.constant 0 : index
    %c0_2 = arith.constant 0 : index
    %2 = vector.load %arg2[%c0_1, %c0_2] : memref<56x1344xbf16, #tpu.memory_space<vmem>>, vector<56x1344xbf16>
    %cst = arith.constant dense<0.000000e+00> : vector<1x1344xf32>
    %3 = tpu.matmul %1, %2, %cst {dimension_numbers = #tpu.dot_dimension_numbers<[1], [0], [0], [1], [0, 0, 1, 1], [], []>} : vector<1x56xbf16>, vector<56x1344xbf16>, vector<1x1344xf32> -> vector<1x1344xf32>
    %c0_3 = arith.constant 0 : index
    %c0_4 = arith.constant 0 : index
    %4 = vector.load %arg3[%c0_3, %c0_4] : memref<1x1344xf32, #tpu.memory_space<vmem>>, vector<1x1344xf32>
    %5 = arith.addf %3, %4 : vector<1x1344xf32>
    %cst_5 = arith.constant 0.000000e+00 : f32
    %6 = vector.broadcast %cst_5 : f32 to vector<1x1344xf32>
    %7 = arith.subf %6, %5 : vector<1x1344xf32>
    %8 = math.exp %7 : vector<1x1344xf32>
    %cst_6 = arith.constant 1.000000e+00 : f32
    %9 = vector.broadcast %cst_6 : f32 to vector<1x1344xf32>
    %10 = arith.addf %9, %8 : vector<1x1344xf32>
    %cst_7 = arith.constant 1.000000e+00 : f32
    %11 = vector.broadcast %cst_7 : f32 to vector<1x1344xf32>
    %12 = arith.divf %11, %10 : vector<1x1344xf32>
    %13 = arith.truncf %12 : vector<1x1344xf32> to vector<1x1344xbf16>
    %c0_8 = arith.constant 0 : index
    %c0_9 = arith.constant 0 : index
    %14 = vector.load %arg5[%c0_8, %c0_9] : memref<224x1344xbf16, #tpu.memory_space<vmem>>, vector<224x1344xbf16>
    %15 = vector.broadcast %13 : vector<1x1344xbf16> to vector<224x1344xbf16>
    %16 = arith.mulf %14, %15 : vector<224x1344xbf16>
    %c0_10 = arith.constant 0 : index
    %c0_11 = arith.constant 0 : index
    %17 = vector.load %arg4[%c0_10, %c0_11] : memref<1344x196xbf16, #tpu.memory_space<vmem>>, vector<1344x196xbf16>
    %cst_12 = arith.constant dense<0.000000e+00> : vector<224x196xf32>
    %18 = tpu.matmul %16, %17, %cst_12 {dimension_numbers = #tpu.dot_dimension_numbers<[1], [0], [0], [1], [0, 0, 1, 1], [], []>} : vector<224x1344xbf16>, vector<1344x196xbf16>, vector<224x196xf32> -> vector<224x196xf32>
    %c0_13 = arith.constant 0 : index
    %c0_14 = arith.constant 0 : index
    %19 = vector.load %arg6[%c0_13, %c0_14] : memref<224x196xf32, #tpu.memory_space<vmem>>, vector<224x196xf32>
    tpu.vector_store %arg6[%c0_13, %c0_14], %18 {strides = array<i32>} : memref<224x196xf32, #tpu.memory_space<vmem>>, vector<224x196xf32>,
    return
  }
  func.func @transform_0(%arg0: i32) -> (i32, i32) {
    %c0_i32 = arith.constant 0 : i32
    %c0_i32_0 = arith.constant 0 : i32
    %c0_i32_1 = arith.constant 0 : i32
    return %c0_i32, %c0_i32_0 : i32, i32
  }
  func.func @transform_1(%arg0: i32) -> (i32, i32) {
    %c0_i32 = arith.constant 0 : i32
    %c0_i32_0 = arith.constant 0 : i32
    %c0_i32_1 = arith.constant 0 : i32
    return %c0_i32, %c0_i32_0 : i32, i32
  }
  func.func @transform_2(%arg0: i32) -> (i32, i32) {
    %c0_i32 = arith.constant 0 : i32
    %c0_i32_0 = arith.constant 0 : i32
    %c0_i32_1 = arith.constant 0 : i32
    return %c0_i32, %c0_i32_0 : i32, i32
  }
  func.func @transform_3(%arg0: i32) -> (i32, i32) {
    %c0_i32 = arith.constant 0 : i32
    %c0_i32_0 = arith.constant 0 : i32
    %c0_i32_1 = arith.constant 0 : i32
    return %c0_i32, %c0_i32_0 : i32, i32
  }
  func.func @transform_4(%arg0: i32) -> (i32, i32) {
    %c0_i32 = arith.constant 0 : i32
    %c0_i32_0 = arith.constant 0 : i32
    %c0_i32_1 = arith.constant 0 : i32
    return %c0_i32, %c0_i32_0 : i32, i32
  }
  func.func @transform_5(%arg0: i32) -> (i32, i32) {
    %c0_i32 = arith.constant 0 : i32
    %c0_i32_0 = arith.constant 0 : i32
    %c0_i32_1 = arith.constant 0 : i32
    return %c0_i32, %c0_i32_0 : i32, i32
  }
}

</mosaic_0001>

<bundles_post_ra>
// kernel: se_conv.1
= control target key start
LH: loop header
LB: loop body
LE: loop exit
PB: predicated region body
PF: predicated region fallthrough
CT: control target
= control target key end

     0   :  { %vm324_vm0 = vcmask 1043456   ;;  %v6829_v2 = vmov 0   ;;  %vm320_vm1 = vcmask 457728   ;;  %v4820_v48 = vmov 0.0   ;;  %s6823_s1 = inlined_call_operand.vmem [shape: bf16[56,1344], index: 1, kind: input, shape index: {}]   ;;  %s6824_s0 = inlined_call_operand.vmem [shape: f32[1,56], index: 0, kind: input, shape index: {}]   ;;  %s6825_s3 = inlined_call_operand.vmem [shape: bf16[1344,196], index: 3, kind: input, shape index: {}]   ;;  %s6826_s2 = inlined_call_operand.vmem [shape: f32[1,1344], index: 2, kind: input, shape index: {}]   ;;  %s6827_s4 = inlined_call_operand.vmem [shape: bf16[224,1344], index: 4, kind: input, shape index: {}]   ;;  %s6828_s5 = inlined_call_operand.vmem [shape: f32[224,196], index: 5, kind: output, shape index: {}]  }
   0x1   :  { %v59_v0 = vld [vmem:[%s6823_s1 + $0x108] sm:$0xff]  ;;  %v60_v1 = vld [vmem:[%s6823_s1 + $0x110] sm:$0xff]  ;;  %390 = vmatprep.mubr.bf16.mxu0 %v6829_v2  ;;  %431 = vmatprep.mubr.bf16.mxu1 %v6829_v2  ;;  %v4473_v12 = vld [vmem:[%s6823_s1 + $0xb8] ss:$44 sps:$4 sm:$0xff]   ;;  %vm4821_vm2 = vmmov 0   ;;  %vm2905_vm3 = vcmask 523264  }
   0x2   :  { %v4081_v3 = vcombine.high %v59_v0, %v59_v0  ;;  %v4083_v4 = vcombine.high %v60_v1, %v60_v1  ;;  %v4080_v5 = vcombine.low %v59_v0, %v59_v0  ;;  %v4082_v6 = vcombine.low %v60_v1, %v60_v1  ;;  %v4468_v7 = vld [vmem:[%s6823_s1 + $0xb4] ss:$44 sps:$4 sm:$0xff]   ;;  %v4470_v8 = vld [vmem:[%s6823_s1 + $0xbc] ss:$44 sps:$4 sm:$0xff]   ;;  %v4476_v14 = vld [vmem:[%s6823_s1 + $0x64] ss:$44 sps:$4 sm:$0xff]  }
   0x3   :  { %v4472_v11 = vld [vmem:[%s6823_s1 + $0xb0] ss:$44 sps:$4 sm:$0xff]   ;;  %v4478_v15 = vld [vmem:[%s6823_s1 + $0x58] ss:$44 sps:$4 sm:$0xff]   ;;  %v4479_v16 = vld [vmem:[%s6823_s1 + $0x60] ss:$44 sps:$4 sm:$0xff]  }
   0x4   :  { %4091 = vmatprep.subr.msk.bf16.mxu0 %vm324_vm0, %v4081_v3  ;;  %4093 = vmatprep.subr.msk.bf16.mxu1 %vm324_vm0, %v4083_v4  ;;  %v326_v9 = vsel %vm324_vm0, %v4080_v5, 0  ;;  %v332_v10 = vsel %vm324_vm0, %v4082_v6, 0  ;;  %v4474_v13 = vld [vmem:[%s6823_s1 + $0x5c] ss:$44 sps:$4 sm:$0xff]   ;;  %v4480_v17 = vld [vmem:[%s6823_s1 + $0x4] ss:$44 sps:$4 sm:$0xff]  }
   0x5   :  { %367 = vmatpush1.bf16.msra.mxu0 %v326_v9  ;;  %408 = vmatpush1.bf16.msra.mxu1 %v332_v10  ;;  %v4482_v18 = vld [vmem:[%s6823_s1 + $0xc] ss:$44 sps:$4 sm:$0xff]   ;;  %v62_v21 = vld [vmem:[%s6823_s1 + $0x120] sm:$0xff]  ;;  %v4485_v22 = vld [vmem:[%s6823_s1 + $0x8] ss:$44 sps:$4 sm:$0xff]   ;;  %vm3987_vm4 = vcmask 556032  }
   0x6   :  { %368 = vmatprep.subr.bf16.mxu0 %v4468_v7  ;;  %409 = vmatprep.subr.bf16.mxu1 %v4470_v8  ;;  %v61_v19 = vld [vmem:[%s6823_s1 + $0x118] sm:$0xff]  ;;  %v4484_v20 = vld [vmem:[%s6823_s1] ss:$44 sps:$4 sm:$0xff]   ;;  %v4087_v26 = vcombine.high %v62_v21, %v62_v21  ;;  %v4086_v27 = vcombine.low %v62_v21, %v62_v21  ;;  %v4492_v31 = vld [vmem:[%s6823_s1 + $0xc4] ss:$44 sps:$4 sm:$0xff]  }
   0x7   :  { %v21_v23 = vld [vmem:[%s6824_s0] sm:$0x1]  ;;  %v4085_v24 = vcombine.high %v61_v19, %v61_v19  ;;  %v4084_v25 = vcombine.low %v61_v19, %v61_v19  ;;  %v4495_v32 = vld [vmem:[%s6823_s1 + $0xcc] ss:$44 sps:$4 sm:$0xff]   ;;  %v4493_v34 = vld [vmem:[%s6823_s1 + $0xc8] ss:$44 sps:$4 sm:$0xff]  }
   0x8   :  { %v4909_v28 = vpack.c.bf16 %v21_v23, %v21_v23  ;;  %v344_v30 = vsel %vm324_vm0, %v4086_v27, 0  ;;  %v4490_v33 = vld [vmem:[%s6823_s1 + $0xc0] ss:$44 sps:$4 sm:$0xff]   ;;  %v4496_v37 = vld [vmem:[%s6823_s1 + $0x68] ss:$44 sps:$4 sm:$0xff]  }
   0x9   :  { %369 = vmatpush1.bf16.msra.mxu0 %v4472_v11  ;;  %410 = vmatpush1.bf16.msra.mxu1 %v4473_v12  ;;  %v338_v29 = vsel %vm324_vm0, %v4084_v25, 0  ;;  %v4498_v35 = vld [vmem:[%s6823_s1 + $0x6c] ss:$44 sps:$4 sm:$0xff]   ;;  %v4501_v36 = vld [vmem:[%s6823_s1 + $0x74] ss:$44 sps:$4 sm:$0xff]  }
   0xa   :  { %370 = vmatprep.subr.bf16.mxu0 %v4474_v13  ;;  %411 = vmatprep.subr.bf16.mxu1 %v4476_v14  ;;  %v4499_v38 = vld [vmem:[%s6823_s1 + $0x70] ss:$44 sps:$4 sm:$0xff]   ;;  %v4504_v39 = vld [vmem:[%s6823_s1 + $0x14] ss:$44 sps:$4 sm:$0xff]   ;;  %v63_v41 = vld [vmem:[%s6823_s1 + $0x128] sm:$0xff] }
   0xb   :  { %v4507_v40 = vld [vmem:[%s6823_s1 + $0x1c] ss:$44 sps:$4 sm:$0xff]   ;;  %v4505_v43 = vld [vmem:[%s6823_s1 + $0x18] ss:$44 sps:$4 sm:$0xff]   ;;  %v4089_v44 = vcombine.high %v63_v41, %v63_v41  ;;  %v4088_v45 = vcombine.low %v63_v41, %v63_v41  ;;  %v4510_v46 = vld [vmem:[%s6823_s1 + $0x130] ss:$0 sps:$4 sm:$0xff]  }
   0xc   :  { %v4502_v42 = vld [vmem:[%s6823_s1 + $0x10] ss:$44 sps:$4 sm:$0xff]   ;;  %v356_v49 = vsel %vm324_vm0, %v4510_v46, 0  ;;  %v4513_v50 = vld [vmem:[%s6823_s1 + $0xd4] ss:$44 sps:$4 sm:$0xff]  }
   0xd   :  { %371 = vmatpush1.bf16.msra.mxu0 %v4478_v15  ;;  %412 = vmatpush1.bf16.msra.mxu1 %v4479_v16  ;;  %v350_v47 = vsel %vm324_vm0, %v4088_v45, 0  ;;  %v4511_v51 = vld [vmem:[%s6823_s1 + $0xd0] ss:$44 sps:$4 sm:$0xff]   ;;  %v4514_v52 = vld [vmem:[%s6823_s1 + $0xd8] ss:$44 sps:$4 sm:$0xff]  }
   0xe   :  { %372 = vmatprep.subr.bf16.mxu0 %v4480_v17  ;;  %413 = vmatprep.subr.bf16.mxu1 %v4482_v18  ;;  %v4517_v53 = vld [vmem:[%s6823_s1 + $0x7c] ss:$44 sps:$4 sm:$0xff]   ;;  %v4515_v54 = vld [vmem:[%s6823_s1 + $0x78] ss:$44 sps:$4 sm:$0xff]   ;;  %v4518_v55 = vld [vmem:[%s6823_s1 + $0x80] ss:$44 sps:$4 sm:$0xff]  }
   0xf   :  { %v4521_v56 = vld [vmem:[%s6823_s1 + $0x24] ss:$44 sps:$4 sm:$0xff]   ;;  %v4519_v57 = vld [vmem:[%s6823_s1 + $0x20] ss:$44 sps:$4 sm:$0xff]   ;;  %v4522_v58 = vld [vmem:[%s6823_s1 + $0x28] ss:$44 sps:$4 sm:$0xff]  }
  0x10   :  { %v4525_v59 = vld [vmem:[%s6825_s3 + $0x74] ss:$8 sps:$4 sm:$0xff]   ;;  %v4523_v61 = vld [vmem:[%s6825_s3 + $0x70] ss:$8 sps:$4 sm:$0xff]   ;;  %v4531_v63 = vld [vmem:[%s6825_s3 + $0x64] ss:$8 sps:$4 sm:$0xff]  }
  0x11   :  { %373 = vmatpush1.bf16.msra.mxu0 %v4484_v20  ;;  %414 = vmatpush1.bf16.msra.mxu1 %v4485_v22  ;;  %v4528_v60 = vld [vmem:[%s6825_s3 + $0x174] ss:$8 sps:$4 sm:$0xff]   ;;  %v4526_v62 = vld [vmem:[%s6825_s3 + $0x170] ss:$8 sps:$4 sm:$0xff]   ;;  %v4534_v0 = vld [vmem:[%s6825_s3 + $0x164] ss:$8 sps:$4 sm:$0xff]  }
  0x12   :  { %4095 = vmatprep.subr.msk.bf16.mxu0 %vm324_vm0, %v4085_v24  ;;  %4097 = vmatprep.subr.msk.bf16.mxu1 %vm324_vm0, %v4087_v26  ;;  %v4529_v1 = vld [vmem:[%s6825_s3 + $0x60] ss:$8 sps:$4 sm:$0xff]   ;;  %v4537_v4 = vld [vmem:[%s6825_s3 + $0x54] ss:$8 sps:$4 sm:$0xff]   ;;  %v4535_v6 = vld [vmem:[%s6825_s3 + $0x50] ss:$8 sps:$4 sm:$0xff]  }
  0x13   :  { %v4532_v3 = vld [vmem:[%s6825_s3 + $0x160] ss:$8 sps:$4 sm:$0xff]   ;;  %v4540_v5 = vld [vmem:[%s6825_s3 + $0x154] ss:$8 sps:$4 sm:$0xff]   ;;  %v4538_v7 = vld [vmem:[%s6825_s3 + $0x150] ss:$8 sps:$4 sm:$0xff]  }
  0x14   :  { %4092 = vmatmul.mubr.msk.bf16.vlgmr.msra.gmra.mxu0 %vm320_vm1, %v4909_v28  ;;  %4094 = vmatmul.mubr.msk.bf16.vlgmr.msra.gmra.mxu1 %vm320_vm1, %v4909_v28  ;;  %v4543_v8 = vld [vmem:[%s6825_s3 + $0x44] ss:$8 sps:$4 sm:$0xff]   ;;  %v4541_v9 = vld [vmem:[%s6825_s3 + $0x40] ss:$8 sps:$4 sm:$0xff]   ;;  %v4549_v12 = vld [vmem:[%s6825_s3 + $0x34] ss:$8 sps:$4 sm:$0xff]  }
  0x15   :  { %449 = vmatpush1.bf16.msra.mxu0 %v338_v29  ;;  %490 = vmatpush1.bf16.msra.mxu1 %v344_v30  ;;  %v4546_v10 = vld [vmem:[%s6825_s3 + $0x144] ss:$8 sps:$4 sm:$0xff]   ;;  %v4544_v11 = vld [vmem:[%s6825_s3 + $0x140] ss:$8 sps:$4 sm:$0xff]   ;;  %v4552_v13 = vld [vmem:[%s6825_s3 + $0x134] ss:$8 sps:$4 sm:$0xff]  }
  0x16   :  { %450 = vmatprep.subr.bf16.mxu0 %v4492_v31  ;;  %491 = vmatprep.subr.bf16.mxu1 %v4495_v32  ;;  %v4547_v14 = vld [vmem:[%s6825_s3 + $0x30] ss:$8 sps:$4 sm:$0xff]   ;;  %v4555_v16 = vld [vmem:[%s6825_s3 + $0x24] ss:$8 sps:$4 sm:$0xff]   ;;  %v4553_v18 = vld [vmem:[%s6825_s3 + $0x20] ss:$8 sps:$4 sm:$0xff]  }
  0x17   :  { %472 = vmatprep.mubr.bf16.mxu0 %v6829_v2  ;;  %513 = vmatprep.mubr.bf16.mxu1 %v6829_v2  ;;  %v4550_v15 = vld [vmem:[%s6825_s3 + $0x130] ss:$8 sps:$4 sm:$0xff]   ;;  %v4558_v17 = vld [vmem:[%s6825_s3 + $0x124] ss:$8 sps:$4 sm:$0xff]   ;;  %v4556_v19 = vld [vmem:[%s6825_s3 + $0x120] ss:$8 sps:$4 sm:$0xff]  }
  0x18   :  { %v4561_v20 = vld [vmem:[%s6825_s3 + $0x14] ss:$8 sps:$4 sm:$0xff]   ;;  %v4559_v22 = vld [vmem:[%s6825_s3 + $0x10] ss:$8 sps:$4 sm:$0xff]   ;;  %v4567_v24 = vld [vmem:[%s6825_s3 + $0x4] ss:$8 sps:$4 sm:$0xff]  }
  0x19   :  { %451 = vmatpush1.bf16.msra.mxu0 %v4490_v33  ;;  %492 = vmatpush1.bf16.msra.mxu1 %v4493_v34  ;;  %v4564_v21 = vld [vmem:[%s6825_s3 + $0x114] ss:$8 sps:$4 sm:$0xff]   ;;  %v4562_v23 = vld [vmem:[%s6825_s3 + $0x110] ss:$8 sps:$4 sm:$0xff]   ;;  %v4570_v25 = vld [vmem:[%s6825_s3 + $0x104] ss:$8 sps:$4 sm:$0xff]  }
  0x1a   :  { %452 = vmatprep.subr.bf16.mxu0 %v4498_v35  ;;  %493 = vmatprep.subr.bf16.mxu1 %v4501_v36  ;;  %v4565_v26 = vld [vmem:[%s6825_s3] ss:$8 sps:$4 sm:$0xff]   ;;  %v4576_v29 = vld [vmem:[%s6825_s3 + $0x1f4] ss:$8 sps:$4 sm:$0xff]   ;;  %v4571_v30 = vld [vmem:[%s6825_s3 + $0xf0] ss:$8 sps:$4 sm:$0xff]  }
  0x1b   :  { %v4568_v27 = vld [vmem:[%s6825_s3 + $0x100] ss:$8 sps:$4 sm:$0xff]   ;;  %v4574_v31 = vld [vmem:[%s6825_s3 + $0x1f0] ss:$8 sps:$4 sm:$0xff]   ;;  %v4579_v32 = vld [vmem:[%s6825_s3 + $0xe4] ss:$8 sps:$4 sm:$0xff]  }
  0x1c   :  { %v4582_v33 = vld [vmem:[%s6825_s3 + $0x1e4] ss:$8 sps:$4 sm:$0xff]   ;;  %v4577_v34 = vld [vmem:[%s6825_s3 + $0xe0] ss:$8 sps:$4 sm:$0xff]   ;;  %v4585_v36 = vld [vmem:[%s6825_s3 + $0xd4] ss:$8 sps:$4 sm:$0xff]  }
  0x1d   :  { %453 = vmatpush1.bf16.msra.mxu0 %v4496_v37  ;;  %494 = vmatpush1.bf16.msra.mxu1 %v4499_v38  ;;  %v4580_v35 = vld [vmem:[%s6825_s3 + $0x1e0] ss:$8 sps:$4 sm:$0xff]   ;;  %v4588_v37 = vld [vmem:[%s6825_s3 + $0x1d4] ss:$8 sps:$4 sm:$0xff]   ;;  %v4583_v38 = vld [vmem:[%s6825_s3 + $0xd0] ss:$8 sps:$4 sm:$0xff]  }
  0x1e   :  { %454 = vmatprep.subr.bf16.mxu0 %v4504_v39  ;;  %495 = vmatprep.subr.bf16.mxu1 %v4507_v40  ;;  %v4586_v39 = vld [vmem:[%s6825_s3 + $0x1d0] ss:$8 sps:$4 sm:$0xff]   ;;  %v4591_v40 = vld [vmem:[%s6825_s3 + $0xc4] ss:$8 sps:$4 sm:$0xff]   ;;  %v4600_v45 = vld [vmem:[%s6825_s3 + $0x1b4] ss:$8 sps:$4 sm:$0xff]  }
  0x1f   :  { %v4594_v41 = vld [vmem:[%s6825_s3 + $0x1c4] ss:$8 sps:$4 sm:$0xff]   ;;  %v4595_v46 = vld [vmem:[%s6825_s3 + $0xb0] ss:$8 sps:$4 sm:$0xff]  }
  0x21   :  { %455 = vmatpush1.bf16.msra.mxu0 %v4502_v42  ;;  %496 = vmatpush1.bf16.msra.mxu1 %v4505_v43  ;;  %v4589_v42 = vld [vmem:[%s6825_s3 + $0xc0] ss:$8 sps:$4 sm:$0xff]  }
  0x22   :  { %4099 = vmatprep.subr.msk.bf16.mxu0 %vm324_vm0, %v4089_v44  ;;  %4449 = vmatprep.subr.bf16.mxu1 %v4820_v48  ;;  %v4592_v43 = vld [vmem:[%s6825_s3 + $0x1c0] ss:$8 sps:$4 sm:$0xff]   ;;  %v4597_v44 = vld [vmem:[%s6825_s3 + $0xb4] ss:$8 sps:$4 sm:$0xff]  }
  0x24   :  { %4096 = vmatmul.mubr.msk.bf16.vlgmr.msra.gmra.mxu0 %vm320_vm1, %v4909_v28  ;;  %4098 = vmatmul.mubr.msk.bf16.vlgmr.msra.gmra.mxu1 %vm320_vm1, %v4909_v28 }
  0x25   :  { %531 = vmatpush1.bf16.msra.mxu0 %v350_v47  ;;  %4450 = vmatpush3.bf16.msra.mxu1 %v356_v49  ;;  %v4598_v47 = vld [vmem:[%s6825_s3 + $0x1b0] ss:$8 sps:$4 sm:$0xff]   ;;  %v4606_v49 = vld [vmem:[%s6825_s3 + $0x1a4] ss:$8 sps:$4 sm:$0xff]  }
  0x26   :  { %532 = vmatprep.subr.bf16.mxu0 %v4513_v50  ;;  %4451 = vmatprep.subr.bf16.mxu1 %v4820_v48  ;;  %v4601_v50 = vld [vmem:[%s6825_s3 + $0xa0] ss:$8 sps:$4 sm:$0xff]  }
  0x27   :  { %554 = vmatprep.mubr.bf16.mxu0 %v6829_v2  ;;  %4457 = vmatprep.mubr.msk.bf16.mxu1 %vm4821_vm2, %v4820_v48 }
  0x29   :  { %533 = vmatpush1.bf16.msra.mxu0 %v4511_v51  ;;  %4452 = vmatpush3.bf16.msra.mxu1 %v4514_v52  ;;  %v4604_v51 = vld [vmem:[%s6825_s3 + $0x1a0] ss:$8 sps:$4 sm:$0xff]   ;;  %v4609_v52 = vld [vmem:[%s6825_s3 + $0x94] ss:$8 sps:$4 sm:$0xff]  }
  0x2a   :  { %534 = vmatprep.subr.bf16.mxu0 %v4517_v53  ;;  %4453 = vmatprep.subr.bf16.mxu1 %v4820_v48  ;;  %v4612_v53 = vld [vmem:[%s6825_s3 + $0x194] ss:$8 sps:$4 sm:$0xff]  }
  0x2d   :  { %535 = vmatpush1.bf16.msra.mxu0 %v4515_v54  ;;  %4454 = vmatpush3.bf16.msra.mxu1 %v4518_v55  ;;  %v4607_v54 = vld [vmem:[%s6825_s3 + $0x90] ss:$8 sps:$4 sm:$0xff]  }
  0x2e   :  { %536 = vmatprep.subr.bf16.mxu0 %v4521_v56  ;;  %4455 = vmatprep.subr.bf16.mxu1 %v4820_v48  ;;  %v4603_v48 = vld [vmem:[%s6825_s3 + $0xa4] ss:$8 sps:$4 sm:$0xff]   ;;  %v4610_v55 = vld [vmem:[%s6825_s3 + $0x190] ss:$8 sps:$4 sm:$0xff]   ;;  %v4613_v56 = vld [vmem:[%s6825_s3 + $0x80] ss:$8 sps:$4 sm:$0xff]  }
  0x31   :  { %537 = vmatpush1.bf16.msra.mxu0 %v4519_v57  ;;  %4456 = vmatpush3.bf16.msra.mxu1 %v4522_v58  ;;  %v4615_v57 = vld [vmem:[%s6825_s3 + $0x84] ss:$8 sps:$4 sm:$0xff]   ;;  %v4616_v58 = vld [vmem:[%s6825_s3 + $0x180] ss:$8 sps:$4 sm:$0xff]  }
  0x32   :  { %2948 = vmatprep.subr.bf16.mxu0 %v4525_v59  ;;  %3121 = vmatprep.subr.bf16.mxu1 %v4528_v60  ;;  %v4618_v59 = vld [vmem:[%s6825_s3 + $0x184] ss:$8 sps:$4 sm:$0xff]   ;;  %v4621_v60 = vld [vmem:[%s6825_s3 + $0x274] ss:$8 sps:$4 sm:$0xff]  }
  0x34   :  { %4100 = vmatmul.mubr.msk.bf16.vlgmr.msra.gmra.mxu0 %vm320_vm1, %v4909_v28  ;;  %4458 = vmatmul.mubr.msk.bf16.vlgmr.msra.gmra.mxu1 %vm320_vm1, %v4909_v28  ;;  %v4573_v28 = vld [vmem:[%s6825_s3 + $0xf4] ss:$8 sps:$4 sm:$0xff]  }
  0x35   :  { %2949 = vmatpush1.bf16.msra.mxu0 %v4523_v61  ;;  %3122 = vmatpush1.bf16.msra.mxu1 %v4526_v62  ;;  %v4624_v61 = vld [vmem:[%s6825_s3 + $0x374] ss:$8 sps:$4 sm:$0xff]   ;;  %v265_v62 = vlaneseq }
  0x36   :  { %2950 = vmatprep.subr.bf16.mxu0 %v4531_v63  ;;  %3123 = vmatprep.subr.bf16.mxu1 %v4534_v0 }
  0x37   :  { %v5200_v63 = vshrl.u32 %v265_v62, 7 }
  0x39   :  { %2951 = vmatpush1.bf16.msra.mxu0 %v4529_v1  ;;  %3124 = vmatpush1.bf16.msra.mxu1 %v4532_v3  ;;  %v5203_v0 = vsub.s32 0, %v5200_v63  ;;  %v275_v1 = vsub.s32 2, %v5200_v63  ;;  %v65_v3 = vld [vmem:[%s6826_s2] sm:$0xff] }
  0x3a   :  { %2952 = vmatprep.subr.bf16.mxu0 %v4537_v4  ;;  %3125 = vmatprep.subr.bf16.mxu1 %v4540_v5  ;;  %v271_v4 = vsub.s32 1, %v5200_v63  ;;  %v279_v5 = vsub.s32 3, %v5200_v63 }
  0x3d   :  { %2953 = vmatpush1.bf16.msra.mxu0 %v4535_v6  ;;  %3126 = vmatpush1.bf16.msra.mxu1 %v4538_v7  ;;  %v268_v6 = vrot.slane %v65_v3, %v5203_v0  ;;  %v276_v7 = vrot.slane %v65_v3, %v275_v1 }
  0x3e   :  { %2954 = vmatprep.subr.bf16.mxu0 %v4543_v8  ;;  %3127 = vmatprep.subr.bf16.mxu1 %v4546_v10  ;;  %v272_v8 = vrot.slane %v65_v3, %v271_v4 }
  0x41   :  { %2955 = vmatpush1.bf16.msra.mxu0 %v4541_v9  ;;  %3128 = vmatpush1.bf16.msra.mxu1 %v4544_v11  ;;  %v280_v9 = vrot.slane %v65_v3, %v279_v5 }
  0x42   :  { %2956 = vmatprep.subr.bf16.mxu0 %v4549_v12  ;;  %3129 = vmatprep.subr.bf16.mxu1 %v4552_v13 }
  0x45   :  { %2957 = vmatpush1.bf16.msra.mxu0 %v4547_v14  ;;  %3130 = vmatpush1.bf16.msra.mxu1 %v4550_v15 }
  0x46   :  { %2958 = vmatprep.subr.bf16.mxu0 %v4555_v16  ;;  %3131 = vmatprep.subr.bf16.mxu1 %v4558_v17 }
  0x49   :  { %2959 = vmatpush1.bf16.msra.mxu0 %v4553_v18  ;;  %3132 = vmatpush1.bf16.msra.mxu1 %v4556_v19 }
  0x4a   :  { %2960 = vmatprep.subr.bf16.mxu0 %v4561_v20  ;;  %3133 = vmatprep.subr.bf16.mxu1 %v4564_v21 }
  0x4d   :  { %2961 = vmatpush1.bf16.msra.mxu0 %v4559_v22  ;;  %3134 = vmatpush1.bf16.msra.mxu1 %v4562_v23 }
  0x4e   :  { %2962 = vmatprep.subr.bf16.mxu0 %v4567_v24  ;;  %3135 = vmatprep.subr.bf16.mxu1 %v4570_v25 }
  0x51   :  { %2963 = vmatpush1.bf16.msra.mxu0 %v4565_v26  ;;  %3136 = vmatpush1.bf16.msra.mxu1 %v4568_v27 }
  0x52   :  { %2964 = vmatprep.subr.bf16.mxu0 %v4573_v28  ;;  %3137 = vmatprep.subr.bf16.mxu1 %v4576_v29 }
  0x55   :  { %2965 = vmatpush2.bf16.msra.mxu0 %v4571_v30  ;;  %3138 = vmatpush2.bf16.msra.mxu1 %v4574_v31  ;;  %v283_v30 = vsub.s32 4, %v5200_v63  ;;  %v291_v31 = vsub.s32 6, %v5200_v63 }
  0x56   :  { %2966 = vmatprep.subr.bf16.mxu0 %v4579_v32  ;;  %3139 = vmatprep.subr.bf16.mxu1 %v4582_v33  ;;  %v287_v32 = vsub.s32 5, %v5200_v63  ;;  %v295_v33 = vsub.s32 7, %v5200_v63  ;;  %v767_v63 = vld [vmem:[%s6827_s4 + $0x280] sm:$0xff] }
  0x59   :  { %2967 = vmatpush2.bf16.msra.mxu0 %v4577_v34  ;;  %3140 = vmatpush2.bf16.msra.mxu1 %v4580_v35  ;;  %v284_v34 = vrot.slane %v65_v3, %v283_v30  ;;  %v292_v35 = vrot.slane %v65_v3, %v291_v31 }
  0x5a   :  { %2968 = vmatprep.subr.bf16.mxu0 %v4585_v36  ;;  %3141 = vmatprep.subr.bf16.mxu1 %v4588_v37  ;;  %v288_v36 = vrot.slane %v65_v3, %v287_v32  ;;  %v296_v37 = vrot.slane %v65_v3, %v295_v33  ;;  %v681_v32 = vld [vmem:[%s6827_s4 + $0x8] sm:$0xff]  ;;  %v692_v33 = vld [vmem:[%s6827_s4 + $0x58] sm:$0xff] }
  0x5d   :  { %2969 = vmatpush2.bf16.msra.mxu0 %v4583_v38  ;;  %3142 = vmatpush2.bf16.msra.mxu1 %v4586_v39 }
  0x5e   :  { %2970 = vmatprep.subr.bf16.mxu0 %v4591_v40  ;;  %3143 = vmatprep.subr.bf16.mxu1 %v4594_v41 }
  0x61   :  { %2971 = vmatpush2.bf16.msra.mxu0 %v4589_v42  ;;  %3144 = vmatpush2.bf16.msra.mxu1 %v4592_v43 }
  0x62   :  { %2972 = vmatprep.subr.bf16.mxu0 %v4597_v44  ;;  %3145 = vmatprep.subr.bf16.mxu1 %v4600_v45 }
  0x65   :  { %2973 = vmatpush2.bf16.msra.mxu0 %v4595_v46  ;;  %3146 = vmatpush2.bf16.msra.mxu1 %v4598_v47 }
  0x66   :  { %2974 = vmatprep.subr.bf16.mxu0 %v4603_v48  ;;  %3147 = vmatprep.subr.bf16.mxu1 %v4606_v49 }
  0x69   :  { %2975 = vmatpush2.bf16.msra.mxu0 %v4601_v50  ;;  %3148 = vmatpush2.bf16.msra.mxu1 %v4604_v51 }
  0x6a   :  { %2976 = vmatprep.subr.bf16.mxu0 %v4609_v52  ;;  %3149 = vmatprep.subr.bf16.mxu1 %v4612_v53 }
  0x6d   :  { %2977 = vmatpush2.bf16.msra.mxu0 %v4607_v54  ;;  %3150 = vmatpush2.bf16.msra.mxu1 %v4610_v55 }
  0x6e   :  { %2978 = vmatprep.subr.bf16.mxu0 %v4615_v57  ;;  %3151 = vmatprep.subr.bf16.mxu1 %v4618_v59 }
  0x71   :  { %2979 = vmatpush2.bf16.msra.mxu0 %v4613_v56  ;;  %3152 = vmatpush2.bf16.msra.mxu1 %v4616_v58 }
  0x72   :  { %3294 = vmatprep.subr.bf16.mxu0 %v4621_v60  ;;  %3467 = vmatprep.subr.bf16.mxu1 %v4624_v61 }
  0xd4   :  { %v392_v10 = vpop.f32.mrf.mxu0  ;;  %v433_v11 = vpop.f32.mrf.mxu1 }
  0xd5   :  { %v393_v12 = vadd.f32 %v392_v10, %v268_v6  ;;  %v434_v13 = vadd.f32 %v433_v11, %v276_v7 }
  0xd6   :  { %v394_v14 = vpop.f32.mrf.mxu0  ;;  %v435_v15 = vpop.f32.mrf.mxu1 }
  0xd7   :  { %v603_v16 = vsub.f32 0.0, %v393_v12  ;;  %v605_v17 = vsub.f32 0.0, %v434_v13  ;;  %v395_v18 = vadd.f32 %v394_v14, %v272_v8  ;;  %v436_v19 = vadd.f32 %v435_v15, %v280_v9 }
  0xd8   :  { %v396_v20 = vpop.f32.mrf.mxu0  ;;  %v437_v21 = vpop.f32.mrf.mxu1 }
  0xd9   :  { %v614_v22 = vmul.f32 1.442695, %v603_v16  ;;  %v618_v23 = vmul.f32 1.442695, %v605_v17  ;;  %v604_v24 = vsub.f32 0.0, %v395_v18  ;;  %v606_v25 = vsub.f32 0.0, %v436_v19 }
  0xda   :  { %v397_v26 = vpop.f32.mrf.mxu0  ;;  %v438_v27 = vpop.f32.mrf.mxu1 }
  0xdb   :  { %4775 = vpow2.f32 %v614_v22  ;;  %v616_v28 = vmul.f32 1.442695, %v604_v24  ;;  %v620_v29 = vmul.f32 1.442695, %v606_v25 }
  0xdc   :  { %4777 = vpow2.f32 %v618_v23 }
  0xdd   :  { %4779 = vpow2.f32 %v616_v28  ;;  %v680_v28 = vld [vmem:[%s6827_s4] sm:$0xff] }
  0xde   :  { %4781 = vpow2.f32 %v620_v29  ;;  %v686_v29 = vld [vmem:[%s6827_s4 + $0x2c] sm:$0xff] }
  0xe4   :  { %v474_v38 = vpop.f32.mrf.mxu0  ;;  %v515_v39 = vpop.f32.mrf.mxu1 }
  0xe5   :  { %v475_v40 = vadd.f32 %v474_v38, %v284_v34  ;;  %v516_v41 = vadd.f32 %v515_v39, %v292_v35  ;;  %v698_v34 = vld [vmem:[%s6827_s4 + $0x84] sm:$0xff]  ;;  %v699_v38 = vld [vmem:[%s6827_s4 + $0x8c] sm:$0xff] }
  0xe6   :  { %v476_v42 = vpop.f32.mrf.mxu0  ;;  %v517_v43 = vpop.f32.mrf.mxu1 }
  0xe7   :  { %v607_v44 = vsub.f32 0.0, %v475_v40  ;;  %v477_v45 = vadd.f32 %v476_v42, %v288_v36  ;;  %v518_v46 = vadd.f32 %v517_v43, %v296_v37  ;;  %v609_v53 = vsub.f32 0.0, %v516_v41  ;;  %v687_v36 = vld [vmem:[%s6827_s4 + $0x34] sm:$0xff]  ;;  %v693_v37 = vld [vmem:[%s6827_s4 + $0x60] sm:$0xff] }
  0xe8   :  { %v4776_v47 = vpop.eup %4775  ;;  %v478_v48 = vpop.f32.mrf.mxu0 }
  0xe9   :  { %v519_v49 = vpop.f32.mrf.mxu1  ;;  %v4778_v50 = vpop.eup %4777  ;;  %v636_v51 = vadd.f32 1.0, %v4776_v47  ;;  %v608_v52 = vsub.f32 0.0, %v477_v45  ;;  %v610_v56 = vsub.f32 0.0, %v518_v46  ;;  %v622_v61 = vmul.f32 1.442695, %v607_v44 }
  0xea   :  { %v4780_v54 = vpop.eup %4779  ;;  %v638_v55 = vadd.f32 1.0, %v4778_v50  ;;  %v479_v57 = vpop.f32.mrf.mxu0  ;;  %v626_v5 = vmul.f32 1.442695, %v609_v53 }
  0xeb   :  { %v520_v58 = vpop.f32.mrf.mxu1  ;;  %v4782_v59 = vpop.eup %4781  ;;  %4783 = vrcp.f32 %v636_v51  ;;  %v637_v60 = vadd.f32 1.0, %v4780_v54  ;;  %v624_v3 = vmul.f32 1.442695, %v608_v52  ;;  %v628_v6 = vmul.f32 1.442695, %v610_v56 }
  0xec   :  { %4785 = vrcp.f32 %v638_v55  ;;  %v639_v62 = vadd.f32 1.0, %v4782_v59  ;;  %v4619_v54 = vld [vmem:[%s6825_s3 + $0x270] ss:$8 sps:$4 sm:$0xff]  }
  0xed   :  { %4787 = vrcp.f32 %v637_v60  ;;  %v4622_v60 = vld [vmem:[%s6825_s3 + $0x370] ss:$8 sps:$4 sm:$0xff]  }
  0xee   :  { %4789 = vrcp.f32 %v639_v62 }
  0xef   :  { %4791 = vpow2.f32 %v622_v61  ;;  %v4627_v61 = vld [vmem:[%s6825_s3 + $0x264] ss:$8 sps:$4 sm:$0xff]  }
  0xf0   :  { %4793 = vpow2.f32 %v624_v3 }
  0xf1   :  { %4795 = vpow2.f32 %v626_v5  ;;  %v4630_v5 = vld [vmem:[%s6825_s3 + $0x364] ss:$8 sps:$4 sm:$0xff]  }
  0xf2   :  { %4797 = vpow2.f32 %v628_v6  ;;  %v704_v6 = vld [vmem:[%s6827_s4 + $0xb0] sm:$0xff] }
  0xf4   :  { %v5252_v41 = vpop.f32.mrf.mxu0  ;;  %v5254_v42 = vpop.f32.mrf.mxu1 }
  0xf6   :  { %v5264_v51 = vpop.f32.mrf.mxu0  ;;  %v4459_v52 = vpop.f32.mrf.mxu1 }
  0xf8   :  { %v4784_v7 = vpop.eup %4783  ;;  %v560_v58 = vpop.f32.mrf.mxu0 }
  0xf9   :  { %v4786_v8 = vpop.eup %4785  ;;  %v669_v9 = vpack.c.bf16 %v4784_v7, %v4784_v7  ;;  %v600_v59 = vpop.f32.mrf.mxu1  ;;  %v710_v7 = vld [vmem:[%s6827_s4 + $0xdc] sm:$0xff] }
  0xfa   :  { %v4788_v10 = vpop.eup %4787  ;;  %v671_v11 = vpack.c.bf16 %v4786_v8, %v4786_v8  ;;  %v561_v8 = vpop.f32.mrf.mxu0  ;;  %v4646_v59 = vld [vmem:[%s6825_s3 + $0x330] ss:$8 sps:$4 sm:$0xff]  }
  0xfb   :  { %v4790_v12 = vpop.eup %4789  ;;  %v849_v13 = vpack.i.b16 %v669_v9, %v669_v9  ;;  %v670_v14 = vpack.c.bf16 %v4788_v10, %v4788_v10  ;;  %v4460_v9 = vpop.f32.mrf.mxu1  ;;  %v4625_v10 = vld [vmem:[%s6825_s3 + $0x260] ss:$8 sps:$4 sm:$0xff]  }
  0xfc   :  { %v4792_v15 = vpop.eup %4791  ;;  %v863_v16 = vpack.i.b16 %v671_v11, %v671_v11  ;;  %v672_v17 = vpack.c.bf16 %v4790_v12, %v4790_v12  ;;  %v705_v11 = vld [vmem:[%s6827_s4 + $0xb8] sm:$0xff]  ;;  %v711_v12 = vld [vmem:[%s6827_s4 + $0xe4] sm:$0xff] }
  0xfd   :  { %v4794_v18 = vpop.eup %4793  ;;  %v856_v19 = vpack.i.b16 %v670_v14, %v670_v14  ;;  %v640_v20 = vadd.f32 1.0, %v4792_v15  ;;  %v854_v26 = vrot.slane %v849_v13, %v5203_v0  ;;  %v4633_v13 = vld [vmem:[%s6825_s3 + $0x254] ss:$8 sps:$4 sm:$0xff]   ;;  %v4628_v14 = vld [vmem:[%s6825_s3 + $0x360] ss:$8 sps:$4 sm:$0xff]  }
  0xfe   :  { %v4796_v21 = vpop.eup %4795  ;;  %v868_v22 = vrot.slane %v863_v16, %v5203_v0  ;;  %v870_v23 = vpack.i.b16 %v672_v17, %v672_v17  ;;  %v641_v24 = vadd.f32 1.0, %v4794_v18  ;;  %v729_v9 = vld [vmem:[%s6827_s4 + $0x168] sm:$0xff] }
  0xff   :  { %v4798_v25 = vpop.eup %4797  ;;  %v861_v27 = vrot.slane %v856_v19, %v5203_v0  ;;  %v642_v30 = vadd.f32 1.0, %v4796_v21  ;;  %4799 = vrcp.f32 %v640_v20  ;;  %v4636_v19 = vld [vmem:[%s6825_s3 + $0x354] ss:$8 sps:$4 sm:$0xff]  }
 0x100   :  { %v875_v31 = vrot.slane %v870_v23, %v5203_v0  ;;  %4801 = vrcp.f32 %v641_v24  ;;  %v643_v40 = vadd.f32 1.0, %v4798_v25  ;;  %v4631_v23 = vld [vmem:[%s6825_s3 + $0x250] ss:$8 sps:$4 sm:$0xff]  }
 0x101   :  { %v5239_v35 = vcombine.low %v854_v26, %v861_v27  ;;  %4803 = vrcp.f32 %v642_v30  ;;  %v4634_v27 = vld [vmem:[%s6825_s3 + $0x350] ss:$8 sps:$4 sm:$0xff]  }
 0x102   :  { %v5250_v39 = vcombine.low %v868_v22, %v875_v31  ;;  %4805 = vrcp.f32 %v643_v40  ;;  %v722_v31 = vld [vmem:[%s6827_s4 + $0x134] sm:$0xff] }
 0x103   :  { %v959_v43 = vmul.bf16 %v5239_v35, %v680_v28  ;;  %v965_v44 = vmul.bf16 %v5239_v35, %v686_v29  ;;  %v971_v45 = vmul.bf16 %v5239_v35, %v692_v33  ;;  %v977_v46 = vmul.bf16 %v5239_v35, %v698_v34  ;;  %v716_v28 = vld [vmem:[%s6827_s4 + $0x108] sm:$0xff]  ;;  %v723_v34 = vld [vmem:[%s6827_s4 + $0x13c] sm:$0xff] }
 0x104   :  { %v960_v47 = vmul.bf16 %v5250_v39, %v681_v32  ;;  %v966_v48 = vmul.bf16 %v5250_v39, %v687_v36  ;;  %v972_v49 = vmul.bf16 %v5250_v39, %v693_v37  ;;  %v978_v50 = vmul.bf16 %v5250_v39, %v699_v38  ;;  %v4639_v29 = vld [vmem:[%s6825_s3 + $0x244] ss:$8 sps:$4 sm:$0xff]   ;;  %v717_v32 = vld [vmem:[%s6827_s4 + $0x110] sm:$0xff]  ;;  %v4637_v36 = vld [vmem:[%s6825_s3 + $0x240] ss:$8 sps:$4 sm:$0xff]  }
 0x105   :  { %v4109_v53 = vcombine.high %v959_v43, %v965_v44  ;;  %v4108_v55 = vcombine.low %v959_v43, %v965_v44  ;;  %v4120_v62 = vcombine.high %v971_v45, %v977_v46  ;;  %v983_v15 = vmul.bf16 %v5239_v35, %v704_v6  ;;  %v4642_v33 = vld [vmem:[%s6825_s3 + $0x344] ss:$8 sps:$4 sm:$0xff]   ;;  %v4640_v43 = vld [vmem:[%s6825_s3 + $0x340] ss:$8 sps:$4 sm:$0xff]   ;;  %v4645_v44 = vld [vmem:[%s6825_s3 + $0x234] ss:$8 sps:$4 sm:$0xff]  }
 0x106   :  { %v4111_v56 = vcombine.high %v960_v47, %v966_v48  ;;  %v4110_v57 = vcombine.low %v960_v47, %v966_v48  ;;  %v4122_v3 = vcombine.high %v972_v49, %v978_v50  ;;  %v989_v16 = vmul.bf16 %v5239_v35, %v710_v7  ;;  %v4648_v47 = vld [vmem:[%s6825_s3 + $0x334] ss:$8 sps:$4 sm:$0xff]   ;;  %v4654_v6 = vld [vmem:[%s6825_s3 + $0x324] ss:$8 sps:$4 sm:$0xff]  }
 0x107   :  { %2980 = vmatprep.mubr.bf16.mxu0 %v4109_v53  ;;  %v5302_v17 = vmul.bf16 %v5250_v39, %v705_v11  ;;  %v990_v18 = vmul.bf16 %v5250_v39, %v711_v12  ;;  %v4119_v22 = vcombine.low %v971_v45, %v977_v46  ;;  %v4121_v25 = vcombine.low %v972_v49, %v978_v50  ;;  %v4643_v53 = vld [vmem:[%s6825_s3 + $0x230] ss:$8 sps:$4 sm:$0xff]  }
 0x108   :  { %3153 = vmatprep.mubr.bf16.mxu1 %v4111_v56  ;;  %2981 = vmatmul.mubr.bf16.vlgmr.msra.gmra.mxu0 %v4108_v55  ;;  %v4131_v26 = vcombine.high %v983_v15, %v989_v16  ;;  %v5337_v37 = vmul.bf16 %v5239_v35, %v716_v28  ;;  %v5340_v38 = vmul.bf16 %v5239_v35, %v722_v31  ;;  %v4658_v28 = vld [vmem:[%s6825_s3 + $0x310] ss:$8 sps:$4 sm:$0xff]  }
 0x109   :  { %3154 = vmatmul.mubr.bf16.vlgmr.msra.gmra.mxu1 %v4110_v57  ;;  %3295 = vmatpush1.bf16.msra.mxu0 %v4619_v54  ;;  %v4133_v30 = vcombine.high %v5302_v17, %v990_v18  ;;  %v5343_v40 = vmul.bf16 %v5250_v39, %v717_v32  ;;  %v5352_v46 = vmul.bf16 %v5250_v39, %v723_v34  ;;  %v740_v31 = vld [vmem:[%s6827_s4 + $0x1b8] sm:$0xff]  ;;  %v746_v32 = vld [vmem:[%s6827_s4 + $0x1e4] sm:$0xff] }
 0x10a   :  { %2990 = vmatprep.mubr.bf16.mxu0 %v4120_v62  ;;  %3163 = vmatprep.mubr.bf16.mxu1 %v4122_v3  ;;  %v4130_v52 = vcombine.low %v983_v15, %v989_v16  ;;  %v4132_v57 = vcombine.low %v5302_v17, %v990_v18  ;;  %v4142_v58 = vcombine.high %v5337_v37, %v5340_v38  ;;  %v728_v3 = vld [vmem:[%s6827_s4 + $0x160] sm:$0xff]  ;;  %v4657_v18 = vld [vmem:[%s6825_s3 + $0x214] ss:$8 sps:$4 sm:$0xff]  }
 0x10b   :  { %3468 = vmatpush1.bf16.msra.mxu1 %v4622_v60  ;;  %3296 = vmatprep.subr.bf16.mxu0 %v4627_v61  ;;  %v4651_v60 = vld [vmem:[%s6825_s3 + $0x224] ss:$8 sps:$4 sm:$0xff]   ;;  %v4144_v62 = vcombine.high %v5343_v40, %v5352_v46  ;;  %v1007_v15 = vmul.bf16 %v5239_v35, %v728_v3  ;;  %v4652_v17 = vld [vmem:[%s6825_s3 + $0x320] ss:$8 sps:$4 sm:$0xff]  }
 0x10c   :  { %3469 = vmatprep.subr.bf16.mxu1 %v4630_v5  ;;  %v4800_v20 = vpop.eup %4799  ;;  %v734_v5 = vld [vmem:[%s6827_s4 + $0x18c] sm:$0xff]  ;;  %v741_v34 = vld [vmem:[%s6827_s4 + $0x1c0] sm:$0xff] }
 0x10d   :  { %3297 = vmatpush1.bf16.msra.mxu0 %v4625_v10  ;;  %v4802_v21 = vpop.eup %4801  ;;  %v673_v48 = vpack.c.bf16 %v4800_v20, %v4800_v20  ;;  %v735_v10 = vld [vmem:[%s6827_s4 + $0x194] sm:$0xff]  ;;  %v1013_v16 = vmul.bf16 %v5239_v35, %v734_v5  ;;  %v1008_v20 = vmul.bf16 %v5250_v39, %v729_v9 }
 0x10e   :  { %3298 = vmatprep.subr.bf16.mxu0 %v4633_v13  ;;  %v4804_v24 = vpop.eup %4803  ;;  %v674_v49 = vpack.c.bf16 %v4802_v21, %v4802_v21  ;;  %v4649_v13 = vld [vmem:[%s6825_s3 + $0x220] ss:$8 sps:$4 sm:$0xff]   ;;  %v1014_v21 = vmul.bf16 %v5250_v39, %v735_v10  ;;  %v4684_v10 = vld [vmem:[%s6825_s3 + $0x3d4] ss:$8 sps:$4 sm:$0xff]  }
 0x10f   :  { %3470 = vmatpush1.bf16.msra.mxu1 %v4628_v14  ;;  %v4806_v45 = vpop.eup %4805  ;;  %v675_v50 = vpack.c.bf16 %v4804_v24, %v4804_v24  ;;  %v877_v54 = vpack.i.b16 %v673_v48, %v673_v48  ;;  %v4141_v24 = vcombine.low %v5337_v37, %v5340_v38  ;;  %v4661_v37 = vld [vmem:[%s6825_s3 + $0x200] ss:$8 sps:$4 sm:$0xff]   ;;  %v1019_v38 = vmul.bf16 %v5239_v35, %v740_v31 }
 0x110   :  { %2991 = vmatmul.mubr.bf16.gmra.mxu0 %v4119_v22  ;;  %3471 = vmatprep.subr.bf16.mxu1 %v4636_v19  ;;  %v884_v55 = vpack.i.b16 %v674_v49, %v674_v49  ;;  %v676_v61 = vpack.c.bf16 %v4806_v45, %v4806_v45  ;;  %v4660_v22 = vld [vmem:[%s6825_s3 + $0x314] ss:$8 sps:$4 sm:$0xff]   ;;  %v1020_v45 = vmul.bf16 %v5250_v39, %v741_v34  ;;  %v4667_v49 = vld [vmem:[%s6825_s3 + $0x2f0] ss:$8 sps:$4 sm:$0xff]  }
 0x111   :  { %3164 = vmatmul.mubr.bf16.gmra.mxu1 %v4121_v25  ;;  %3000 = vmatprep.mubr.bf16.mxu0 %v4131_v26  ;;  %v891_v56 = vpack.i.b16 %v675_v50, %v675_v50  ;;  %v882_v7 = vrot.slane %v877_v54, %v5203_v0  ;;  %v4655_v25 = vld [vmem:[%s6825_s3 + $0x210] ss:$8 sps:$4 sm:$0xff]   ;;  %v4143_v26 = vcombine.low %v5343_v40, %v5352_v46  ;;  %v4675_v54 = vld [vmem:[%s6825_s3 + $0x2e4] ss:$8 sps:$4 sm:$0xff]  }
 0x112   :  { %3173 = vmatprep.mubr.bf16.mxu1 %v4133_v30  ;;  %3299 = vmatpush1.bf16.msra.mxu0 %v4631_v23  ;;  %v889_v8 = vrot.slane %v884_v55, %v5203_v0  ;;  %v898_v12 = vpack.i.b16 %v676_v61, %v676_v61  ;;  %v4155_v30 = vcombine.high %v1008_v20, %v1014_v21  ;;  %v4673_v61 = vld [vmem:[%s6825_s3 + $0x2e0] ss:$8 sps:$4 sm:$0xff]  }
 0x113   :  { %3472 = vmatpush1.bf16.msra.mxu1 %v4634_v27  ;;  %3300 = vmatprep.subr.bf16.mxu0 %v4639_v29  ;;  %v896_v11 = vrot.slane %v891_v56, %v5203_v0  ;;  %v4153_v27 = vcombine.high %v1007_v15, %v1013_v16  ;;  %v4663_v29 = vld [vmem:[%s6825_s3 + $0x204] ss:$8 sps:$4 sm:$0xff]   ;;  %v1025_v40 = vmul.bf16 %v5239_v35, %v746_v32  ;;  %v752_v56 = vld [vmem:[%s6827_s4 + $0x210] sm:$0xff] }
 0x114   :  { %3473 = vmatprep.subr.bf16.mxu1 %v4642_v33  ;;  %v5392_v14 = vcombine.low %v882_v7, %v889_v8  ;;  %v903_v19 = vrot.slane %v898_v12, %v5203_v0  ;;  %v4666_v33 = vld [vmem:[%s6825_s3 + $0x304] ss:$8 sps:$4 sm:$0xff]   ;;  %v4152_v48 = vcombine.low %v1007_v15, %v1013_v16  ;;  %v4154_v50 = vcombine.low %v1008_v20, %v1014_v21  ;;  %v4681_v7 = vld [vmem:[%s6825_s3 + $0x2d4] ss:$8 sps:$4 sm:$0xff]   ;;  %v4679_v16 = vld [vmem:[%s6825_s3 + $0x2d0] ss:$8 sps:$4 sm:$0xff]  }
 0x115   :  { %v1031_v3 = vmul.bf16 %v5239_v35, %v752_v56  ;;  %v4693_v32 = vld [vmem:[%s6825_s3 + $0x2b4] ss:$8 sps:$4 sm:$0xff]  }
 0x116   :  { %3301 = vmatpush1.bf16.msra.mxu0 %v4637_v36  ;;  %v5408_v23 = vcombine.low %v896_v11, %v903_v19  ;;  %v747_v36 = vld [vmem:[%s6827_s4 + $0x1ec] sm:$0xff] }
 0x117   :  { %3474 = vmatpush1.bf16.msra.mxu1 %v4640_v43  ;;  %3302 = vmatprep.subr.bf16.mxu0 %v4645_v44  ;;  %v4664_v43 = vld [vmem:[%s6825_s3 + $0x300] ss:$8 sps:$4 sm:$0xff]   ;;  %v4669_v44 = vld [vmem:[%s6825_s3 + $0x2f4] ss:$8 sps:$4 sm:$0xff]   ;;  %v1026_v46 = vmul.bf16 %v5250_v39, %v747_v36  ;;  %v4687_v19 = vld [vmem:[%s6825_s3 + $0x2c4] ss:$8 sps:$4 sm:$0xff]  }
 0x118   :  { %3001 = vmatmul.mubr.bf16.gmra.mxu0 %v4130_v52  ;;  %3475 = vmatprep.subr.bf16.mxu1 %v4648_v47  ;;  %v4672_v47 = vld [vmem:[%s6825_s3 + $0x3f4] ss:$8 sps:$4 sm:$0xff]   ;;  %v4164_v52 = vcombine.high %v1019_v38, %v1025_v40 }
 0x119   :  { %3174 = vmatmul.mubr.bf16.gmra.mxu1 %v4132_v57  ;;  %3010 = vmatprep.mubr.bf16.mxu0 %v4142_v58  ;;  %v4166_v55 = vcombine.high %v1020_v45, %v1026_v46  ;;  %v758_v57 = vld [vmem:[%s6827_s4 + $0x23c] sm:$0xff]  ;;  %v4678_v58 = vld [vmem:[%s6825_s3 + $0x3e4] ss:$8 sps:$4 sm:$0xff]   ;;  %v4165_v15 = vcombine.low %v1020_v45, %v1026_v46  ;;  %v4694_v46 = vld [vmem:[%s6825_s3 + $0x3b0] ss:$8 sps:$4 sm:$0xff]  }
 0x11a   :  { %3183 = vmatprep.mubr.bf16.mxu1 %v4144_v62  ;;  %3303 = vmatpush1.bf16.msra.mxu0 %v4643_v53  ;;  %v4670_v53 = vld [vmem:[%s6825_s3 + $0x3f0] ss:$8 sps:$4 sm:$0xff]   ;;  %v5484_v62 = vld [vmem:[%s6826_s2 + $0x8] sm:$0x7]  ;;  %v1037_v5 = vmul.bf16 %v5239_v35, %v758_v57 }
 0x11b   :  { %3476 = vmatpush1.bf16.msra.mxu1 %v4646_v59  ;;  %3304 = vmatprep.subr.bf16.mxu0 %v4651_v60  ;;  %v753_v59 = vld [vmem:[%s6827_s4 + $0x218] sm:$0xff]  ;;  %v759_v60 = vld [vmem:[%s6827_s4 + $0x244] sm:$0xff]  ;;  %v300_v11 = vrot.slane %v5484_v62, %v5203_v0  ;;  %v304_v12 = vrot.slane %v5484_v62, %v271_v4 }
 0x11c   :  { %3477 = vmatprep.subr.bf16.mxu1 %v4654_v6  ;;  %v4676_v6 = vld [vmem:[%s6825_s3 + $0x3e0] ss:$8 sps:$4 sm:$0xff]   ;;  %v1032_v8 = vmul.bf16 %v5250_v39, %v753_v59  ;;  %v1038_v9 = vmul.bf16 %v5250_v39, %v759_v60  ;;  %v4705_v59 = vld [vmem:[%s6825_s3 + $0x294] ss:$8 sps:$4 sm:$0xff]  }
 0x11d   :  { %v557_v4 = vadd.f32 %v5252_v41, %v300_v11  ;;  %v559_v20 = vadd.f32 %v5264_v51, %v304_v12  ;;  %v765_v41 = vld [vmem:[%s6827_s4 + $0x270] sm:$0xff]  ;;  %v771_v51 = vld [vmem:[%s6827_s4 + $0x29c] sm:$0xff] }
 0x11e   :  { %3305 = vmatpush1.bf16.msra.mxu0 %v4649_v13  ;;  %v4163_v13 = vcombine.low %v1019_v38, %v1025_v40  ;;  %v4177_v21 = vcombine.high %v1032_v8, %v1038_v9  ;;  %v1044_v36 = vmul.bf16 %v5250_v39, %v765_v41  ;;  %v4696_v38 = vld [vmem:[%s6825_s3 + $0x3b4] ss:$8 sps:$4 sm:$0xff]   ;;  %v4174_v40 = vcombine.low %v1031_v3, %v1037_v5 }
 0x11f   :  { %3478 = vmatpush1.bf16.msra.mxu1 %v4652_v17  ;;  %3306 = vmatprep.subr.bf16.mxu0 %v4657_v18  ;;  %v4175_v17 = vcombine.high %v1031_v3, %v1037_v5  ;;  %v4682_v18 = vld [vmem:[%s6825_s3 + $0x3d0] ss:$8 sps:$4 sm:$0xff]   ;;  %v4708_v3 = vld [vmem:[%s6825_s3 + $0x394] ss:$8 sps:$4 sm:$0xff]  }
 0x120   :  { %3011 = vmatmul.mubr.bf16.gmra.mxu0 %v4141_v24  ;;  %3479 = vmatprep.subr.bf16.mxu1 %v4660_v22  ;;  %v764_v22 = vld [vmem:[%s6827_s4 + $0x268] sm:$0xff]  ;;  %v770_v24 = vld [vmem:[%s6827_s4 + $0x294] sm:$0xff] }
 0x121   :  { %3184 = vmatmul.mubr.bf16.gmra.mxu1 %v4143_v26  ;;  %3020 = vmatprep.mubr.bf16.mxu0 %v4153_v27  ;;  %v611_v26 = vsub.f32 0.0, %v557_v4  ;;  %v612_v27 = vsub.f32 0.0, %v559_v20  ;;  %v1049_v31 = vmul.bf16 %v5239_v35, %v770_v24  ;;  %v788_v12 = vld [vmem:[%s6827_s4 + $0x318] sm:$0xff] }
 0x122   :  { %3193 = vmatprep.mubr.bf16.mxu1 %v4155_v30  ;;  %3307 = vmatpush1.bf16.msra.mxu0 %v4655_v25  ;;  %v4690_v25 = vld [vmem:[%s6825_s3 + $0x3c4] ss:$8 sps:$4 sm:$0xff]   ;;  %v1043_v30 = vmul.bf16 %v5239_v35, %v764_v22  ;;  %v1067_v20 = vmul.bf16 %v5239_v35, %v788_v12  ;;  %v4712_v22 = vld [vmem:[%s6825_s3 + $0x380] ss:$8 sps:$4 sm:$0xff]   ;;  %v4717_v24 = vld [vmem:[%s6825_s3 + $0x474] ss:$8 sps:$4 sm:$0xff]  }
 0x123   :  { %3480 = vmatpush1.bf16.msra.mxu1 %v4658_v28  ;;  %3308 = vmatprep.subr.bf16.mxu0 %v4663_v29  ;;  %v4685_v28 = vld [vmem:[%s6825_s3 + $0x2c0] ss:$8 sps:$4 sm:$0xff]   ;;  %v632_v34 = vmul.f32 1.442695, %v612_v27 }
 0x124   :  { %3481 = vmatprep.subr.bf16.mxu1 %v4666_v33  ;;  %v4688_v29 = vld [vmem:[%s6825_s3 + $0x3c0] ss:$8 sps:$4 sm:$0xff]   ;;  %v630_v33 = vmul.f32 1.442695, %v611_v26  ;;  %v4186_v45 = vcombine.high %v1043_v30, %v1049_v31  ;;  %v4185_v5 = vcombine.low %v1043_v30, %v1049_v31  ;;  %v4720_v26 = vld [vmem:[%s6825_s3 + $0x534] ss:$8 sps:$4 sm:$0xff]  }
 0x126   :  { %3309 = vmatpush1.bf16.msra.mxu0 %v4661_v37  ;;  %v1050_v37 = vmul.bf16 %v5250_v39, %v771_v51  ;;  %4807 = vpow2.f32 %v630_v33  ;;  %v806_v33 = vld [vmem:[%s6827_s4 + $0x39c] sm:$0xff] }
 0x127   :  { %3482 = vmatpush1.bf16.msra.mxu1 %v4664_v43  ;;  %3310 = vmatprep.subr.bf16.mxu0 %v4669_v44  ;;  %v4691_v43 = vld [vmem:[%s6825_s3 + $0x2b0] ss:$8 sps:$4 sm:$0xff]   ;;  %4809 = vpow2.f32 %v632_v34  ;;  %v4176_v44 = vcombine.low %v1032_v8, %v1038_v9 }
 0x128   :  { %3021 = vmatmul.mubr.bf16.gmra.mxu0 %v4152_v48  ;;  %3483 = vmatprep.subr.bf16.mxu1 %v4672_v47  ;;  %v4699_v47 = vld [vmem:[%s6825_s3 + $0x2a4] ss:$8 sps:$4 sm:$0xff]   ;;  %v4188_v48 = vcombine.high %v1044_v36, %v1050_v37  ;;  %v4706_v9 = vld [vmem:[%s6825_s3 + $0x390] ss:$8 sps:$4 sm:$0xff]  }
 0x129   :  { %3194 = vmatmul.mubr.bf16.gmra.mxu1 %v4154_v50  ;;  %3030 = vmatprep.mubr.bf16.mxu0 %v4164_v52  ;;  %v782_v50 = vld [vmem:[%s6827_s4 + $0x2ec] sm:$0xff]  ;;  %v801_v34 = vld [vmem:[%s6827_s4 + $0x378] sm:$0xff] }
 0x12a   :  { %3203 = vmatprep.mubr.bf16.mxu1 %v4166_v55  ;;  %3311 = vmatpush2.bf16.msra.mxu0 %v4667_v49  ;;  %v776_v49 = vld [vmem:[%s6827_s4 + $0x2c0] sm:$0xff]  ;;  %v1061_v57 = vmul.bf16 %v5239_v35, %v782_v50  ;;  %v813_v50 = vld [vmem:[%s6827_s4 + $0x3d0] sm:$0xff] }
 0x12b   :  { %3484 = vmatpush2.bf16.msra.mxu1 %v4670_v53  ;;  %3312 = vmatprep.subr.bf16.mxu0 %v4675_v54  ;;  %v4702_v52 = vld [vmem:[%s6825_s3 + $0x3a4] ss:$8 sps:$4 sm:$0xff]   ;;  %v783_v54 = vld [vmem:[%s6827_s4 + $0x2f4] sm:$0xff]  ;;  %v4697_v55 = vld [vmem:[%s6825_s3 + $0x2a0] ss:$8 sps:$4 sm:$0xff]   ;;  %v1055_v56 = vmul.bf16 %v5239_v35, %v776_v49 }
 0x12c   :  { %3485 = vmatprep.subr.bf16.mxu1 %v4678_v58  ;;  %v777_v53 = vld [vmem:[%s6827_s4 + $0x2c8] sm:$0xff]  ;;  %v818_v49 = vld [vmem:[%s6827_s4 + $0x3f4] sm:$0xff] }
 0x12d   :  { %v4700_v58 = vld [vmem:[%s6825_s3 + $0x3a0] ss:$8 sps:$4 sm:$0xff]   ;;  %v1056_v60 = vmul.bf16 %v5250_v39, %v777_v53  ;;  %v4197_v8 = vcombine.high %v1055_v56, %v1061_v57 }
 0x12e   :  { %3313 = vmatpush2.bf16.msra.mxu0 %v4673_v61  ;;  %v1062_v61 = vmul.bf16 %v5250_v39, %v783_v54 }
 0x12f   :  { %3486 = vmatpush2.bf16.msra.mxu1 %v4676_v6  ;;  %3314 = vmatprep.subr.bf16.mxu0 %v4681_v7  ;;  %v4703_v6 = vld [vmem:[%s6825_s3 + $0x290] ss:$8 sps:$4 sm:$0xff]   ;;  %v4187_v7 = vcombine.low %v1044_v36, %v1050_v37  ;;  %v807_v36 = vld [vmem:[%s6827_s4 + $0x3a4] sm:$0xff] }
 0x130   :  { %3031 = vmatmul.mubr.bf16.gmra.mxu0 %v4163_v13  ;;  %3487 = vmatprep.subr.bf16.mxu1 %v4684_v10  ;;  %v4711_v10 = vld [vmem:[%s6825_s3 + $0x284] ss:$8 sps:$4 sm:$0xff]   ;;  %v4199_v11 = vcombine.high %v1056_v60, %v1062_v61 }
 0x131   :  { %3204 = vmatmul.mubr.bf16.gmra.mxu1 %v4165_v15  ;;  %3040 = vmatprep.mubr.bf16.mxu0 %v4175_v17  ;;  %v794_v13 = vld [vmem:[%s6827_s4 + $0x344] sm:$0xff]  ;;  %v795_v17 = vld [vmem:[%s6827_s4 + $0x34c] sm:$0xff] }
 0x132   :  { %3213 = vmatprep.mubr.bf16.mxu1 %v4177_v21  ;;  %3315 = vmatpush2.bf16.msra.mxu0 %v4679_v16  ;;  %v4714_v15 = vld [vmem:[%s6825_s3 + $0x384] ss:$8 sps:$4 sm:$0xff]   ;;  %v1073_v21 = vmul.bf16 %v5239_v35, %v794_v13  ;;  %v1074_v51 = vmul.bf16 %v5250_v39, %v795_v17 }
 0x133   :  { %3488 = vmatpush2.bf16.msra.mxu1 %v4682_v18  ;;  %3316 = vmatprep.subr.bf16.mxu0 %v4687_v19  ;;  %v789_v16 = vld [vmem:[%s6827_s4 + $0x320] sm:$0xff]  ;;  %v4808_v18 = vpop.eup %4807  ;;  %v825_v13 = vld [vmem:[%s6827_s4 + $0x428] sm:$0xff] }
 0x134   :  { %3489 = vmatprep.subr.bf16.mxu1 %v4690_v25  ;;  %v4709_v19 = vld [vmem:[%s6825_s3 + $0x280] ss:$8 sps:$4 sm:$0xff]   ;;  %v4810_v4 = vpop.eup %4809  ;;  %v644_v25 = vadd.f32 1.0, %v4808_v18  ;;  %v1068_v41 = vmul.bf16 %v5250_v39, %v789_v16  ;;  %v4208_v30 = vcombine.high %v1067_v20, %v1073_v21 }
 0x135   :  { %v645_v27 = vadd.f32 1.0, %v4810_v4 }
 0x136   :  { %3317 = vmatpush2.bf16.msra.mxu0 %v4685_v28  ;;  %4811 = vrcp.f32 %v644_v25  ;;  %v4196_v28 = vcombine.low %v1055_v56, %v1061_v57  ;;  %v4210_v31 = vcombine.high %v1068_v41, %v1074_v51  ;;  %v1097_v56 = vmul.bf16 %v5239_v35, %v818_v49  ;;  %v836_v25 = vld [vmem:[%s6827_s4 + $0x478] sm:$0xff]  ;;  %v694_v49 = vld [vmem:[%s6827_s4 + $0x68] sm:$0xff] }
 0x137   :  { %3490 = vmatpush2.bf16.msra.mxu1 %v4688_v29  ;;  %3318 = vmatprep.subr.bf16.mxu0 %v4693_v32  ;;  %4813 = vrcp.f32 %v645_v27  ;;  %v4198_v29 = vcombine.low %v1056_v60, %v1062_v61  ;;  %v800_v32 = vld [vmem:[%s6827_s4 + $0x370] sm:$0xff]  ;;  %v1115_v27 = vmul.bf16 %v5239_v35, %v836_v25 }
 0x138   :  { %3041 = vmatmul.mubr.bf16.gmra.mxu0 %v4174_v40  ;;  %3491 = vmatprep.subr.bf16.mxu1 %v4696_v38  ;;  %v1079_v37 = vmul.bf16 %v5239_v35, %v800_v32  ;;  %v1085_v38 = vmul.bf16 %v5239_v35, %v806_v33  ;;  %v1080_v40 = vmul.bf16 %v5250_v39, %v801_v34  ;;  %v682_v32 = vld [vmem:[%s6827_s4 + $0x10] sm:$0xff]  ;;  %v688_v33 = vld [vmem:[%s6827_s4 + $0x3c] sm:$0xff] }
 0x139   :  { %3214 = vmatmul.mubr.bf16.gmra.mxu1 %v4176_v44  ;;  %3050 = vmatprep.mubr.bf16.mxu0 %v4186_v45  ;;  %v4207_v44 = vcombine.low %v1067_v20, %v1073_v21  ;;  %v4209_v45 = vcombine.low %v1068_v41, %v1074_v51  ;;  %v842_v41 = vld [vmem:[%s6827_s4 + $0x4a4] sm:$0xff] }
 0x13a   :  { %3223 = vmatprep.mubr.bf16.mxu1 %v4188_v48  ;;  %3319 = vmatpush2.bf16.msra.mxu0 %v4691_v43  ;;  %v1086_v43 = vmul.bf16 %v5250_v39, %v807_v36  ;;  %v812_v48 = vld [vmem:[%s6827_s4 + $0x3c8] sm:$0xff]  ;;  %v837_v51 = vld [vmem:[%s6827_s4 + $0x480] sm:$0xff] }
 0x13b   :  { %3492 = vmatpush2.bf16.msra.mxu1 %v4694_v46  ;;  %3320 = vmatprep.subr.bf16.mxu0 %v4699_v47  ;;  %v4219_v46 = vcombine.high %v1079_v37, %v1085_v38 }
 0x13c   :  { %3493 = vmatprep.subr.bf16.mxu1 %v4702_v52  ;;  %v4221_v47 = vcombine.high %v1080_v40, %v1086_v43  ;;  %v819_v52 = vld [vmem:[%s6827_s4 + $0x3fc] sm:$0xff] }
 0x13e   :  { %3321 = vmatpush2.bf16.msra.mxu0 %v4697_v55  ;;  %v1091_v55 = vmul.bf16 %v5239_v35, %v812_v48 }
 0x13f   :  { %3494 = vmatpush2.bf16.msra.mxu1 %v4700_v58  ;;  %3322 = vmatprep.subr.bf16.mxu0 %v4705_v59  ;;  %v1092_v58 = vmul.bf16 %v5250_v39, %v813_v50  ;;  %v1098_v59 = vmul.bf16 %v5250_v39, %v819_v52  ;;  %v700_v50 = vld [vmem:[%s6827_s4 + $0x94] sm:$0xff] }
 0x140   :  { %3051 = vmatmul.mubr.bf16.gmra.mxu0 %v4185_v5  ;;  %3495 = vmatprep.subr.bf16.mxu1 %v4708_v3  ;;  %v4218_v3 = vcombine.low %v1079_v37, %v1085_v38  ;;  %v4229_v20 = vcombine.low %v1091_v55, %v1097_v56  ;;  %v683_v37 = vld [vmem:[%s6827_s4 + $0x18] sm:$0xff]  ;;  %v961_v38 = vmul.bf16 %v5392_v14, %v682_v32  ;;  %v695_v52 = vld [vmem:[%s6827_s4 + $0x70] sm:$0xff]  ;;  %v4727_v32 = vld [vmem:[%s6825_s3 + $0x440] ss:$8 sps:$4 sm:$0xff]  }
 0x141   :  { %3224 = vmatmul.mubr.bf16.gmra.mxu1 %v4187_v7  ;;  %3060 = vmatprep.mubr.bf16.mxu0 %v4197_v8  ;;  %v4230_v7 = vcombine.high %v1091_v55, %v1097_v56  ;;  %v4231_v21 = vcombine.low %v1092_v58, %v1098_v59  ;;  %v979_v55 = vmul.bf16 %v5392_v14, %v700_v50  ;;  %v737_v50 = vld [vmem:[%s6827_s4 + $0x1a4] sm:$0xff] }
 0x142   :  { %3233 = vmatprep.mubr.bf16.mxu1 %v4199_v11  ;;  %3323 = vmatpush2.bf16.msra.mxu0 %v4703_v6  ;;  %v4220_v6 = vcombine.low %v1080_v40, %v1086_v43  ;;  %v830_v11 = vld [vmem:[%s6827_s4 + $0x44c] sm:$0xff]  ;;  %v967_v40 = vmul.bf16 %v5392_v14, %v688_v33  ;;  %v962_v43 = vmul.bf16 %v5408_v23, %v683_v37  ;;  %v4763_v37 = vld [vmem:[%s6825_s3 + $0x500] ss:$8 sps:$4 sm:$0xff]  }
 0x143   :  { %3496 = vmatpush2.bf16.msra.mxu1 %v4706_v9  ;;  %3324 = vmatprep.subr.bf16.mxu0 %v4711_v10  ;;  %v4812_v53 = vpop.eup %4811  ;;  %v4232_v9 = vcombine.high %v1092_v58, %v1098_v59  ;;  %v824_v10 = vld [vmem:[%s6827_s4 + $0x420] sm:$0xff]  ;;  %v1109_v18 = vmul.bf16 %v5239_v35, %v830_v11  ;;  %v974_v56 = vmul.bf16 %v5408_v23, %v695_v52  ;;  %v4715_v59 = vld [vmem:[%s6825_s3 + $0x470] ss:$8 sps:$4 sm:$0xff]   ;;  %v707_v11 = vld [vmem:[%s6827_s4 + $0xc8] sm:$0xff] }
 0x144   :  { %3497 = vmatprep.subr.bf16.mxu1 %v4714_v15  ;;  %v4814_v54 = vpop.eup %4813  ;;  %v677_v57 = vpack.c.bf16 %v4812_v53, %v4812_v53  ;;  %v831_v15 = vld [vmem:[%s6827_s4 + $0x454] sm:$0xff]  ;;  %v1103_v17 = vmul.bf16 %v5239_v35, %v824_v10  ;;  %v701_v53 = vld [vmem:[%s6827_s4 + $0x9c] sm:$0xff] }
 0x145   :  { %v678_v60 = vpack.c.bf16 %v4814_v54, %v4814_v54  ;;  %v1110_v4 = vmul.bf16 %v5250_v39, %v831_v15  ;;  %v973_v54 = vmul.bf16 %v5392_v14, %v694_v49  ;;  %v4721_v10 = vld [vmem:[%s6825_s3 + $0x460] ss:$8 sps:$4 sm:$0xff]   ;;  %v731_v49 = vld [vmem:[%s6827_s4 + $0x178] sm:$0xff] }
 0x146   :  { %3325 = vmatpush2.bf16.msra.mxu0 %v4709_v19  ;;  %v905_v61 = vpack.i.b16 %v677_v57, %v677_v57  ;;  %v1104_v19 = vmul.bf16 %v5250_v39, %v825_v13  ;;  %v980_v57 = vmul.bf16 %v5408_v23, %v701_v53  ;;  %v4726_v13 = vld [vmem:[%s6825_s3 + $0x454] ss:$8 sps:$4 sm:$0xff]   ;;  %v4736_v52 = vld [vmem:[%s6825_s3 + $0x420] ss:$8 sps:$4 sm:$0xff]  }
 0x147   :  { %3498 = vmatpush2.bf16.msra.mxu1 %v4712_v22  ;;  %3640 = vmatprep.subr.bf16.mxu0 %v4717_v24  ;;  %v912_v5 = vpack.i.b16 %v678_v60, %v678_v60  ;;  %v4241_v22 = vcombine.high %v1103_v17, %v1109_v18  ;;  %v4112_v60 = vcombine.low %v961_v38, %v967_v40 }
 0x148   :  { %3061 = vmatmul.mubr.bf16.gmra.mxu0 %v4196_v28  ;;  %3821 = vmatprep.subr.bf16.mxu1 %v4720_v26  ;;  %v910_v8 = vrot.slane %v905_v61, %v5203_v0  ;;  %v4243_v24 = vcombine.high %v1104_v19, %v1110_v4  ;;  %v843_v26 = vld [vmem:[%s6827_s4 + $0x4ac] sm:$0xff]  ;;  %v1121_v28 = vmul.bf16 %v5239_v35, %v842_v41  ;;  %v689_v35 = vld [vmem:[%s6827_s4 + $0x44] sm:$0xff] }
 0x149   :  { %3234 = vmatmul.mubr.bf16.gmra.mxu1 %v4198_v29  ;;  %3070 = vmatprep.mubr.bf16.mxu0 %v4208_v30  ;;  %v917_v12 = vrot.slane %v912_v5, %v5203_v0  ;;  %v1116_v29 = vmul.bf16 %v5250_v39, %v837_v51  ;;  %v1122_v30 = vmul.bf16 %v5250_v39, %v843_v26  ;;  %v4718_v61 = vld [vmem:[%s6825_s3 + $0x530] ss:$8 sps:$4 sm:$0xff]   ;;  %v4729_v41 = vld [vmem:[%s6825_s3 + $0x444] ss:$8 sps:$4 sm:$0xff]  }
 0x14a   :  { %3243 = vmatprep.mubr.bf16.mxu1 %v4210_v31  ;;  %v4240_v31 = vcombine.low %v1103_v17, %v1109_v18  ;;  %v4242_v34 = vcombine.low %v1104_v19, %v1110_v4  ;;  %v4252_v36 = vcombine.high %v1115_v27, %v1121_v28  ;;  %v4124_v5 = vcombine.high %v973_v54, %v979_v55  ;;  %v4733_v18 = vld [vmem:[%s6825_s3 + $0x520] ss:$8 sps:$4 sm:$0xff]   ;;  %v4748_v51 = vld [vmem:[%s6825_s3 + $0x510] ss:$8 sps:$4 sm:$0xff]  }
 0x14b   :  { %v5672_v16 = vcombine.low %v910_v8, %v917_v12  ;;  %v4254_v39 = vcombine.high %v1116_v29, %v1122_v30  ;;  %v4253_v48 = vcombine.low %v1116_v29, %v1122_v30  ;;  %v712_v8 = vld [vmem:[%s6827_s4 + $0xec] sm:$0xff]  ;;  %v713_v12 = vld [vmem:[%s6827_s4 + $0xf4] sm:$0xff]  ;;  %v986_v19 = vmul.bf16 %v5408_v23, %v707_v11  ;;  %v719_v30 = vld [vmem:[%s6827_s4 + $0x120] sm:$0xff] }
 0x14c   :  { %v991_v17 = vmul.bf16 %v5392_v14, %v712_v8  ;;  %v992_v4 = vmul.bf16 %v5408_v23, %v713_v12  ;;  %v4765_v29 = vld [vmem:[%s6825_s3 + $0x504] ss:$8 sps:$4 sm:$0xff]   ;;  %v743_v8 = vld [vmem:[%s6827_s4 + $0x1d0] sm:$0xff] }
 0x14e   :  { %v4137_v26 = vcombine.high %v986_v19, %v992_v4 }
 0x150   :  { %3071 = vmatmul.mubr.bf16.gmra.mxu0 %v4207_v44  ;;  %v968_v44 = vmul.bf16 %v5408_v23, %v689_v35  ;;  %v998_v35 = vmul.bf16 %v5408_v23, %v719_v30 }
 0x151   :  { %3244 = vmatmul.mubr.bf16.gmra.mxu1 %v4209_v45  ;;  %3080 = vmatprep.mubr.bf16.mxu0 %v4219_v46  ;;  %v4113_v45 = vcombine.high %v961_v38, %v967_v40  ;;  %v4251_v46 = vcombine.low %v1115_v27, %v1121_v28  ;;  %v718_v27 = vld [vmem:[%s6827_s4 + $0x118] sm:$0xff]  ;;  %v724_v28 = vld [vmem:[%s6827_s4 + $0x144] sm:$0xff] }
 0x152   :  { %3253 = vmatprep.mubr.bf16.mxu1 %v4221_v47  ;;  %v4115_v47 = vcombine.high %v962_v43, %v968_v44  ;;  %v4114_v58 = vcombine.low %v962_v43, %v968_v44  ;;  %v997_v33 = vmul.bf16 %v5392_v14, %v718_v27  ;;  %v4730_v40 = vld [vmem:[%s6825_s3 + $0x430] ss:$8 sps:$4 sm:$0xff]   ;;  %v4136_v43 = vcombine.low %v986_v19, %v992_v4 }
 0x153   :  { %v4745_v19 = vld [vmem:[%s6825_s3 + $0x4f0] ss:$8 sps:$4 sm:$0xff]  }
 0x158   :  { %3081 = vmatmul.mubr.bf16.gmra.mxu0 %v4218_v3  ;;  %v4723_v3 = vld [vmem:[%s6825_s3 + $0x464] ss:$8 sps:$4 sm:$0xff]  }
 0x159   :  { %3254 = vmatmul.mubr.bf16.gmra.mxu1 %v4220_v6  ;;  %3090 = vmatprep.mubr.bf16.mxu0 %v4230_v7  ;;  %v4126_v6 = vcombine.high %v974_v56, %v980_v57  ;;  %v706_v7 = vld [vmem:[%s6827_s4 + $0xc0] sm:$0xff] }
 0x15a   :  { %3263 = vmatprep.mubr.bf16.mxu1 %v4232_v9  ;;  %v4735_v9 = vld [vmem:[%s6825_s3 + $0x524] ss:$8 sps:$4 sm:$0xff]   ;;  %v985_v15 = vmul.bf16 %v5392_v14, %v706_v7  ;;  %v748_v7 = vld [vmem:[%s6827_s4 + $0x1f4] sm:$0xff] }
 0x15b   :  { %v1027_v12 = vmul.bf16 %v5392_v14, %v748_v7 }
 0x15c   :  { %v4135_v25 = vcombine.high %v985_v15, %v991_v17  ;;  %v4134_v38 = vcombine.low %v985_v15, %v991_v17  ;;  %v1022_v15 = vmul.bf16 %v5408_v23, %v743_v8 }
 0x160   :  { %3091 = vmatmul.mubr.bf16.gmra.mxu0 %v4229_v20  ;;  %v4750_v20 = vld [vmem:[%s6825_s3 + $0x514] ss:$8 sps:$4 sm:$0xff]  }
 0x161   :  { %3264 = vmatmul.mubr.bf16.gmra.mxu1 %v4231_v21  ;;  %3100 = vmatprep.mubr.bf16.mxu0 %v4241_v22  ;;  %v4123_v21 = vcombine.low %v973_v54, %v979_v55  ;;  %v4724_v22 = vld [vmem:[%s6825_s3 + $0x450] ss:$8 sps:$4 sm:$0xff]   ;;  %v4741_v55 = vld [vmem:[%s6825_s3 + $0x414] ss:$8 sps:$4 sm:$0xff]  }
 0x162   :  { %3273 = vmatprep.mubr.bf16.mxu1 %v4243_v24  ;;  %v4125_v24 = vcombine.low %v974_v56, %v980_v57  ;;  %v1010_v56 = vmul.bf16 %v5408_v23, %v731_v49  ;;  %v1016_v57 = vmul.bf16 %v5408_v23, %v737_v50  ;;  %v4760_v50 = vld [vmem:[%s6825_s3 + $0x4b0] ss:$8 sps:$4 sm:$0xff]  }
 0x164   :  { %v4158_v4 = vcombine.low %v1010_v56, %v1016_v57 }
 0x168   :  { %3101 = vmatmul.mubr.bf16.gmra.mxu0 %v4240_v31  ;;  %v725_v31 = vld [vmem:[%s6827_s4 + $0x14c] sm:$0xff] }
 0x169   :  { %3274 = vmatmul.mubr.bf16.gmra.mxu1 %v4242_v34  ;;  %3110 = vmatprep.mubr.bf16.mxu0 %v4252_v36  ;;  %v1003_v34 = vmul.bf16 %v5392_v14, %v724_v28  ;;  %v4732_v36 = vld [vmem:[%s6825_s3 + $0x434] ss:$8 sps:$4 sm:$0xff]  }
 0x16a   :  { %3283 = vmatprep.mubr.bf16.mxu1 %v4254_v39  ;;  %v1004_v39 = vmul.bf16 %v5408_v23, %v725_v31 }
 0x16b   :  { %v4146_v44 = vcombine.high %v997_v33, %v1003_v34 }
 0x170   :  { %3111 = vmatmul.mubr.bf16.gmra.mxu0 %v4251_v46  ;;  %v4148_v46 = vcombine.high %v998_v35, %v1004_v39 }
 0x171   :  { %3284 = vmatmul.mubr.bf16.gmra.mxu1 %v4253_v48  ;;  %3326 = vmatprep.mubr.bf16.mxu0 %v4113_v45  ;;  %v4738_v45 = vld [vmem:[%s6825_s3 + $0x424] ss:$8 sps:$4 sm:$0xff]   ;;  %v736_v48 = vld [vmem:[%s6827_s4 + $0x19c] sm:$0xff] }
 0x172   :  { %3499 = vmatprep.mubr.bf16.mxu1 %v4115_v47  ;;  %v730_v47 = vld [vmem:[%s6827_s4 + $0x170] sm:$0xff]  ;;  %v1015_v54 = vmul.bf16 %v5392_v14, %v736_v48 }
 0x173   :  { %v1009_v53 = vmul.bf16 %v5392_v14, %v730_v47  ;;  %v1046_v47 = vmul.bf16 %v5408_v23, %v767_v63 }
 0x178   :  { %3327 = vmatmul.mubr.bf16.vlgmr.msra.gmra.mxu0 %v4112_v60  ;;  %v4147_v60 = vcombine.low %v998_v35, %v1004_v39  ;;  %v4759_v35 = vld [vmem:[%s6825_s3 + $0x4c4] ss:$8 sps:$4 sm:$0xff]  }
 0x179   :  { %3500 = vmatmul.mubr.bf16.vlgmr.msra.gmra.mxu1 %v4114_v58  ;;  %3641 = vmatpush1.bf16.msra.mxu0 %v4715_v59  ;;  %v4145_v58 = vcombine.low %v997_v33, %v1003_v34  ;;  %v4739_v59 = vld [vmem:[%s6825_s3 + $0x410] ss:$8 sps:$4 sm:$0xff]   ;;  %v308_v34 = vrot.slane %v5484_v62, %v275_v1  ;;  %v4757_v62 = vld [vmem:[%s6825_s3 + $0x4c0] ss:$8 sps:$4 sm:$0xff]  }
 0x17a   :  { %3336 = vmatprep.mubr.bf16.mxu0 %v4124_v5  ;;  %3509 = vmatprep.mubr.bf16.mxu1 %v4126_v6  ;;  %v4159_v5 = vcombine.high %v1010_v56, %v1016_v57  ;;  %v742_v6 = vld [vmem:[%s6827_s4 + $0x1c8] sm:$0xff]  ;;  %v4754_v33 = vld [vmem:[%s6825_s3 + $0x4d0] ss:$8 sps:$4 sm:$0xff]   ;;  %v784_v57 = vld [vmem:[%s6827_s4 + $0x2fc] sm:$0xff] }
 0x17b   :  { %3822 = vmatpush1.bf16.msra.mxu1 %v4718_v61  ;;  %3642 = vmatprep.subr.bf16.mxu0 %v4723_v3  ;;  %v4157_v61 = vcombine.high %v1009_v53, %v1015_v54  ;;  %v4744_v3 = vld [vmem:[%s6825_s3 + $0x404] ss:$8 sps:$4 sm:$0xff]   ;;  %v1021_v11 = vmul.bf16 %v5392_v14, %v742_v6  ;;  %v778_v56 = vld [vmem:[%s6827_s4 + $0x2d0] sm:$0xff] }
 0x17c   :  { %3823 = vmatprep.subr.bf16.mxu1 %v4735_v9  ;;  %v749_v9 = vld [vmem:[%s6827_s4 + $0x1fc] sm:$0xff]  ;;  %v773_v1 = vld [vmem:[%s6827_s4 + $0x2ac] sm:$0xff] }
 0x17d   :  { %3643 = vmatpush1.bf16.msra.mxu0 %v4721_v10  ;;  %v4742_v10 = vld [vmem:[%s6825_s3 + $0x400] ss:$8 sps:$4 sm:$0xff]   ;;  %v1028_v17 = vmul.bf16 %v5408_v23, %v749_v9  ;;  %v1052_v48 = vmul.bf16 %v5408_v23, %v773_v1  ;;  %v4771_v6 = vld [vmem:[%s6825_s3 + $0x494] ss:$8 sps:$4 sm:$0xff]  }
 0x17e   :  { %3644 = vmatprep.subr.bf16.mxu0 %v4726_v13  ;;  %v4747_v13 = vld [vmem:[%s6825_s3 + $0x4f4] ss:$8 sps:$4 sm:$0xff]  }
 0x17f   :  { %3824 = vmatpush1.bf16.msra.mxu1 %v4733_v18  ;;  %v4156_v18 = vcombine.low %v1009_v53, %v1015_v54  ;;  %v4768_v54 = vld [vmem:[%s6825_s3 + $0x4a4] ss:$8 sps:$4 sm:$0xff]   ;;  %v814_v1 = vld [vmem:[%s6827_s4 + $0x3d8] sm:$0xff] }
 0x180   :  { %3337 = vmatmul.mubr.bf16.gmra.mxu0 %v4123_v21  ;;  %3825 = vmatprep.subr.bf16.mxu1 %v4750_v20  ;;  %v4168_v20 = vcombine.high %v1021_v11, %v1027_v12  ;;  %v4753_v21 = vld [vmem:[%s6825_s3 + $0x4e4] ss:$8 sps:$4 sm:$0xff]  }
 0x181   :  { %3510 = vmatmul.mubr.bf16.gmra.mxu1 %v4125_v24  ;;  %3346 = vmatprep.mubr.bf16.mxu0 %v4135_v25  ;;  %v754_v24 = vld [vmem:[%s6827_s4 + $0x220] sm:$0xff]  ;;  %v760_v25 = vld [vmem:[%s6827_s4 + $0x24c] sm:$0xff] }
 0x182   :  { %3519 = vmatprep.mubr.bf16.mxu1 %v4137_v26  ;;  %3645 = vmatpush1.bf16.msra.mxu0 %v4724_v22  ;;  %v4170_v22 = vcombine.high %v1022_v15, %v1028_v17  ;;  %v4751_v26 = vld [vmem:[%s6825_s3 + $0x4e0] ss:$8 sps:$4 sm:$0xff]   ;;  %v1033_v27 = vmul.bf16 %v5392_v14, %v754_v24  ;;  %v1039_v28 = vmul.bf16 %v5392_v14, %v760_v25 }
 0x183   :  { %3646 = vmatprep.subr.bf16.mxu0 %v4729_v41  ;;  %3826 = vmatpush1.bf16.msra.mxu1 %v4748_v51  ;;  %v755_v41 = vld [vmem:[%s6827_s4 + $0x228] sm:$0xff]  ;;  %v761_v51 = vld [vmem:[%s6827_s4 + $0x254] sm:$0xff] }
 0x184   :  { %3827 = vmatprep.subr.bf16.mxu1 %v4765_v29  ;;  %v4756_v29 = vld [vmem:[%s6825_s3 + $0x4d4] ss:$8 sps:$4 sm:$0xff]   ;;  %v1034_v30 = vmul.bf16 %v5408_v23, %v755_v41  ;;  %v1040_v31 = vmul.bf16 %v5408_v23, %v761_v51  ;;  %v4178_v49 = vcombine.low %v1033_v27, %v1039_v28 }
 0x186   :  { %3647 = vmatpush1.bf16.msra.mxu0 %v4727_v32  ;;  %v4167_v32 = vcombine.low %v1021_v11, %v1027_v12  ;;  %v4181_v39 = vcombine.high %v1034_v30, %v1040_v31  ;;  %v4191_v11 = vcombine.low %v1046_v47, %v1052_v48 }
 0x187   :  { %3648 = vmatprep.subr.bf16.mxu0 %v4732_v36  ;;  %3828 = vmatpush1.bf16.msra.mxu1 %v4763_v37  ;;  %v4169_v36 = vcombine.low %v1022_v15, %v1028_v17  ;;  %v4179_v37 = vcombine.high %v1033_v27, %v1039_v28  ;;  %v790_v17 = vld [vmem:[%s6827_s4 + $0x328] sm:$0xff]  ;;  %v802_v28 = vld [vmem:[%s6827_s4 + $0x380] sm:$0xff] }
 0x188   :  { %3347 = vmatmul.mubr.bf16.gmra.mxu0 %v4134_v38  ;;  %v766_v38 = vld [vmem:[%s6827_s4 + $0x278] sm:$0xff] }
 0x189   :  { %3520 = vmatmul.mubr.bf16.gmra.mxu1 %v4136_v43  ;;  %3356 = vmatprep.mubr.bf16.mxu0 %v4146_v44  ;;  %v598_v43 = vadd.f32 %v5254_v42, %v308_v34  ;;  %v1045_v44 = vmul.bf16 %v5392_v14, %v766_v38 }
 0x18a   :  { %3529 = vmatprep.mubr.bf16.mxu1 %v4148_v46  ;;  %3649 = vmatpush1.bf16.msra.mxu0 %v4730_v40  ;;  %v772_v40 = vld [vmem:[%s6827_s4 + $0x2a4] sm:$0xff]  ;;  %v4762_v46 = vld [vmem:[%s6825_s3 + $0x4b4] ss:$8 sps:$4 sm:$0xff]  }
 0x18b   :  { %3650 = vmatprep.subr.bf16.mxu0 %v4738_v45  ;;  %v1051_v45 = vmul.bf16 %v5392_v14, %v772_v40  ;;  %v613_v42 = vsub.f32 0.0, %v598_v43  ;;  %v815_v43 = vld [vmem:[%s6827_s4 + $0x3e0] sm:$0xff] }
 0x18d   :  { %v4190_v53 = vcombine.high %v1045_v44, %v1051_v45  ;;  %v4189_v9 = vcombine.low %v1045_v44, %v1051_v45  ;;  %v821_v44 = vld [vmem:[%s6827_s4 + $0x40c] sm:$0xff]  ;;  %v1093_v45 = vmul.bf16 %v5392_v14, %v814_v1 }
 0x18e   :  { %3651 = vmatpush1.bf16.msra.mxu0 %v4736_v52  ;;  %v4180_v52 = vcombine.low %v1034_v30, %v1040_v31  ;;  %v803_v30 = vld [vmem:[%s6827_s4 + $0x388] sm:$0xff]  ;;  %v809_v31 = vld [vmem:[%s6827_s4 + $0x3b4] sm:$0xff] }
 0x18f   :  { %3652 = vmatprep.subr.bf16.mxu0 %v4741_v55  ;;  %v4192_v55 = vcombine.high %v1046_v47, %v1052_v48  ;;  %v1094_v47 = vmul.bf16 %v5408_v23, %v815_v43  ;;  %v1100_v48 = vmul.bf16 %v5408_v23, %v821_v44 }
 0x190   :  { %3357 = vmatmul.mubr.bf16.gmra.mxu0 %v4145_v58  ;;  %v779_v58 = vld [vmem:[%s6827_s4 + $0x2d8] sm:$0xff] }
 0x191   :  { %3530 = vmatmul.mubr.bf16.gmra.mxu1 %v4147_v60  ;;  %3366 = vmatprep.mubr.bf16.mxu0 %v4157_v61  ;;  %v4766_v60 = vld [vmem:[%s6825_s3 + $0x4a0] ss:$8 sps:$4 sm:$0xff]   ;;  %v634_v61 = vmul.f32 1.442695, %v613_v42  ;;  %v1058_v7 = vmul.bf16 %v5408_v23, %v779_v58 }
 0x192   :  { %3539 = vmatprep.mubr.bf16.mxu1 %v4159_v5  ;;  %3653 = vmatpush1.bf16.msra.mxu0 %v4739_v59  ;;  %v785_v59 = vld [vmem:[%s6827_s4 + $0x304] sm:$0xff]  ;;  %v1063_v5 = vmul.bf16 %v5392_v14, %v784_v57  ;;  %v827_v57 = vld [vmem:[%s6827_s4 + $0x438] sm:$0xff] }
 0x193   :  { %3654 = vmatprep.subr.bf16.mxu0 %v4744_v3  ;;  %v1057_v3 = vmul.bf16 %v5392_v14, %v778_v56  ;;  %v1064_v8 = vmul.bf16 %v5408_v23, %v785_v59  ;;  %4815 = vpow2.f32 %v634_v61  ;;  %v833_v58 = vld [vmem:[%s6827_s4 + $0x464] sm:$0xff] }
 0x195   :  { %v4201_v12 = vcombine.high %v1057_v3, %v1063_v5  ;;  %v4203_v15 = vcombine.high %v1058_v7, %v1064_v8  ;;  %v4200_v41 = vcombine.low %v1057_v3, %v1063_v5  ;;  %v4202_v51 = vcombine.low %v1058_v7, %v1064_v8 }
 0x196   :  { %3655 = vmatpush1.bf16.msra.mxu0 %v4742_v10  ;;  %v4769_v10 = vld [vmem:[%s6825_s3 + $0x490] ss:$8 sps:$4 sm:$0xff]   ;;  %v1106_v8 = vmul.bf16 %v5408_v23, %v827_v57 }
 0x197   :  { %3656 = vmatprep.subr.bf16.mxu0 %v4747_v13  ;;  %v4774_v13 = vld [vmem:[%s6825_s3 + $0x484] ss:$8 sps:$4 sm:$0xff]  }
 0x198   :  { %3367 = vmatmul.mubr.bf16.gmra.mxu0 %v4156_v18  ;;  %v796_v18 = vld [vmem:[%s6827_s4 + $0x354] sm:$0xff] }
 0x199   :  { %3540 = vmatmul.mubr.bf16.gmra.mxu1 %v4158_v4  ;;  %3376 = vmatprep.mubr.bf16.mxu0 %v4168_v20  ;;  %v797_v4 = vld [vmem:[%s6827_s4 + $0x35c] sm:$0xff] }
 0x19a   :  { %3549 = vmatprep.mubr.bf16.mxu1 %v4170_v22  ;;  %3657 = vmatpush2.bf16.msra.mxu0 %v4745_v19  ;;  %v791_v19 = vld [vmem:[%s6827_s4 + $0x330] sm:$0xff]  ;;  %v4772_v20 = vld [vmem:[%s6825_s3 + $0x480] ss:$8 sps:$4 sm:$0xff]   ;;  %v1075_v22 = vmul.bf16 %v5392_v14, %v796_v18  ;;  %v1076_v25 = vmul.bf16 %v5408_v23, %v797_v4 }
 0x19b   :  { %3658 = vmatprep.subr.bf16.mxu0 %v4753_v21  ;;  %v1069_v21 = vmul.bf16 %v5392_v14, %v790_v17  ;;  %v1070_v24 = vmul.bf16 %v5408_v23, %v791_v19  ;;  %v4235_v17 = vcombine.low %v1094_v47, %v1100_v48 }
 0x19d   :  { %v4214_v27 = vcombine.high %v1070_v24, %v1076_v25  ;;  %v4213_v38 = vcombine.low %v1070_v24, %v1076_v25  ;;  %v844_v24 = vld [vmem:[%s6827_s4 + $0x4b4] sm:$0xff] }
 0x19e   :  { %3659 = vmatpush2.bf16.msra.mxu0 %v4751_v26  ;;  %v4212_v26 = vcombine.high %v1069_v21, %v1075_v22 }
 0x19f   :  { %3660 = vmatprep.subr.bf16.mxu0 %v4756_v29  ;;  %v808_v29 = vld [vmem:[%s6827_s4 + $0x3ac] sm:$0xff] }
 0x1a0   :  { %3377 = vmatmul.mubr.bf16.gmra.mxu0 %v4167_v32  ;;  %v1081_v32 = vmul.bf16 %v5392_v14, %v802_v28  ;;  %v4816_v34 = vpop.eup %4815 }
 0x1a1   :  { %3550 = vmatmul.mubr.bf16.gmra.mxu1 %v4169_v36  ;;  %3386 = vmatprep.mubr.bf16.mxu0 %v4179_v37  ;;  %v1082_v36 = vmul.bf16 %v5408_v23, %v803_v30  ;;  %v1088_v37 = vmul.bf16 %v5408_v23, %v809_v31  ;;  %v1123_v31 = vmul.bf16 %v5392_v14, %v844_v24 }
 0x1a2   :  { %3559 = vmatprep.mubr.bf16.mxu1 %v4181_v39  ;;  %3661 = vmatpush2.bf16.msra.mxu0 %v4754_v33  ;;  %v1087_v33 = vmul.bf16 %v5392_v14, %v808_v29  ;;  %v646_v39 = vadd.f32 1.0, %v4816_v34 }
 0x1a3   :  { %3662 = vmatprep.subr.bf16.mxu0 %v4759_v35  ;;  %v4211_v35 = vcombine.low %v1069_v21, %v1075_v22  ;;  %v4225_v63 = vcombine.high %v1082_v36, %v1088_v37  ;;  %v838_v22 = vld [vmem:[%s6827_s4 + $0x488] sm:$0xff] }
 0x1a4   :  { %v4223_v40 = vcombine.high %v1081_v32, %v1087_v33  ;;  %4817 = vrcp.f32 %v646_v39  ;;  %v1117_v30 = vmul.bf16 %v5392_v14, %v838_v22 }
 0x1a6   :  { %3663 = vmatpush2.bf16.msra.mxu0 %v4757_v62  ;;  %v820_v62 = vld [vmem:[%s6827_s4 + $0x404] sm:$0xff] }
 0x1a7   :  { %3664 = vmatprep.subr.bf16.mxu0 %v4762_v46  ;;  %v1099_v46 = vmul.bf16 %v5392_v14, %v820_v62  ;;  %v4256_v62 = vcombine.high %v1117_v30, %v1123_v31 }
 0x1a8   :  { %3387 = vmatmul.mubr.bf16.gmra.mxu0 %v4178_v49  ;;  %v4222_v49 = vcombine.low %v1081_v32, %v1087_v33 }
 0x1a9   :  { %3560 = vmatmul.mubr.bf16.gmra.mxu1 %v4180_v52  ;;  %3396 = vmatprep.mubr.bf16.mxu0 %v4190_v53  ;;  %v4234_v42 = vcombine.high %v1093_v45, %v1099_v46  ;;  %v4236_v53 = vcombine.high %v1094_v47, %v1100_v48 }
 0x1aa   :  { %3569 = vmatprep.mubr.bf16.mxu1 %v4192_v55  ;;  %3665 = vmatpush2.bf16.msra.mxu0 %v4760_v50  ;;  %v4224_v50 = vcombine.low %v1082_v36, %v1088_v37  ;;  %v832_v55 = vld [vmem:[%s6827_s4 + $0x45c] sm:$0xff] }
 0x1ab   :  { %3666 = vmatprep.subr.bf16.mxu0 %v4768_v54  ;;  %v826_v54 = vld [vmem:[%s6827_s4 + $0x430] sm:$0xff]  ;;  %v1111_v5 = vmul.bf16 %v5392_v14, %v832_v55 }
 0x1ac   :  { %v1105_v3 = vmul.bf16 %v5392_v14, %v826_v54 }
 0x1ae   :  { %3667 = vmatpush2.bf16.msra.mxu0 %v4766_v60  ;;  %v4245_v18 = vcombine.high %v1105_v3, %v1111_v5 }
 0x1af   :  { %3668 = vmatprep.subr.bf16.mxu0 %v4771_v6 }
 0x1b0   :  { %3397 = vmatmul.mubr.bf16.gmra.mxu0 %v4189_v9  ;;  %v1112_v9 = vmul.bf16 %v5408_v23, %v833_v58  ;;  %v4255_v58 = vcombine.low %v1117_v30, %v1123_v31 }
 0x1b1   :  { %3570 = vmatmul.mubr.bf16.gmra.mxu1 %v4191_v11  ;;  %3406 = vmatprep.mubr.bf16.mxu0 %v4201_v12  ;;  %v4818_v19 = vpop.eup %4817 }
 0x1b2   :  { %3579 = vmatprep.mubr.bf16.mxu1 %v4203_v15  ;;  %3669 = vmatpush2.bf16.msra.mxu0 %v4769_v10  ;;  %v4247_v21 = vcombine.high %v1106_v8, %v1112_v9  ;;  %v679_v28 = vpack.c.bf16 %v4818_v19, %v4818_v19  ;;  %v4246_v1 = vcombine.low %v1106_v8, %v1112_v9  ;;  %v685_v9 = vld [vmem:[%s6827_s4 + $0x28] sm:$0xf] }
 0x1b3   :  { %3670 = vmatprep.subr.bf16.mxu0 %v4774_v13  ;;  %v4233_v13 = vcombine.low %v1093_v45, %v1099_v46  ;;  %v684_v45 = vld [vmem:[%s6827_s4 + $0x20] sm:$0xff] }
 0x1b6   :  { %3671 = vmatpush2.bf16.msra.mxu0 %v4772_v20 }
 0x1b8   :  { %3407 = vmatmul.mubr.bf16.gmra.mxu0 %v4200_v41  ;;  %v839_v41 = vld [vmem:[%s6827_s4 + $0x490] sm:$0xff] }
 0x1b9   :  { %3580 = vmatmul.mubr.bf16.gmra.mxu1 %v4202_v51  ;;  %3416 = vmatprep.mubr.bf16.mxu0 %v4212_v26  ;;  %v845_v51 = vld [vmem:[%s6827_s4 + $0x4bc] sm:$0xff]  ;;  %v1118_v34 = vmul.bf16 %v5408_v23, %v839_v41 }
 0x1ba   :  { %3589 = vmatprep.mubr.bf16.mxu1 %v4214_v27  ;;  %v1124_v36 = vmul.bf16 %v5408_v23, %v845_v51  ;;  %v690_v23 = vld [vmem:[%s6827_s4 + $0x4c] sm:$0xff] }
 0x1bc   :  { %v4258_v14 = vcombine.high %v1118_v34, %v1124_v36 }
 0x1c0   :  { %3417 = vmatmul.mubr.bf16.gmra.mxu0 %v4211_v35 }
 0x1c1   :  { %3590 = vmatmul.mubr.bf16.gmra.mxu1 %v4213_v38  ;;  %3426 = vmatprep.mubr.bf16.mxu0 %v4223_v40  ;;  %v4244_v38 = vcombine.low %v1105_v3, %v1111_v5  ;;  %v919_v40 = vpack.i.b16 %v679_v28, %v679_v28  ;;  %v4257_v3 = vcombine.low %v1118_v34, %v1124_v36 }
 0x1c2   :  { %3599 = vmatprep.mubr.bf16.mxu1 %v4225_v63 }
 0x1c8   :  { %v2982_v52 = vpop.f32.mrf.mxu0  ;;  %3427 = vmatmul.mubr.bf16.gmra.mxu0 %v4222_v49  ;;  %v924_v49 = vrot.slane %v919_v40, %v5203_v0  ;;  %v696_v0 = vld [vmem:[%s6827_s4 + $0x78] sm:$0xff] }
 0x1c9   :  { %v3155_v56 = vpop.f32.mrf.mxu1  ;;  %3600 = vmatmul.mubr.bf16.gmra.mxu1 %v4224_v50  ;;  %3436 = vmatprep.mubr.bf16.mxu0 %v4234_v42  ;;  %v963_v42 = vmul.bf16 %v5672_v16, %v684_v45 }
 0x1ca   :  { %v6016_v59 = vadd.f32 %v3155_v56, %v2982_v52  ;;  %3609 = vmatprep.mubr.bf16.mxu1 %v4236_v53  ;;  %v2984_v60 = vpop.f32.mrf.mxu0  ;;  %v969_v52 = vmul.bf16 %v5672_v16, %v690_v23 }
 0x1cb   :  { %v3157_v61 = vpop.f32.mrf.mxu1 }
 0x1cc   :  { %v6020_v6 = vadd.f32 %v3157_v61, %v2984_v60  ;;  %v2986_v7 = vpop.f32.mrf.mxu0  ;;  %v6067_v60 = vcombine.low %v924_v49, %v924_v49  ;;  %v4117_v5 = vcombine.high %v963_v42, %v969_v52  ;;  %v4116_v51 = vcombine.low %v963_v42, %v969_v52 }
 0x1cd   :  { %v3159_v10 = vpop.f32.mrf.mxu1 }
 0x1ce   :  { %v6024_v11 = vadd.f32 %v3159_v10, %v2986_v7  ;;  %v2988_v12 = vpop.f32.mrf.mxu0  ;;  %v691_v10 = vld [vmem:[%s6827_s4 + $0x54] sm:$0xf]  ;;  %v964_v19 = vmul.bf16 %v6067_v60, %v685_v9 }
 0x1cf   :  { %v3161_v15 = vpop.f32.mrf.mxu1 }
 0x1d0   :  { %v6026_v4 = vadd.f32 %v3161_v15, %v2988_v12  ;;  %v2992_v20 = vpop.f32.mrf.mxu0  ;;  %3437 = vmatmul.mubr.bf16.gmra.mxu0 %v4233_v13  ;;  %v702_v12 = vld [vmem:[%s6827_s4 + $0xa4] sm:$0xff] }
 0x1d1   :  { %v3165_v25 = vpop.f32.mrf.mxu1  ;;  %3610 = vmatmul.mubr.bf16.gmra.mxu1 %v4235_v17  ;;  %3446 = vmatprep.mubr.bf16.mxu0 %v4245_v18  ;;  %v981_v22 = vmul.bf16 %v5672_v16, %v702_v12 }
 0x1d2   :  { %v6040_v26 = vadd.f32 %v3165_v25, %v2992_v20  ;;  %3619 = vmatprep.mubr.bf16.mxu1 %v4247_v21  ;;  %v2994_v27 = vpop.f32.mrf.mxu0  ;;  %v970_v20 = vmul.bf16 %v6067_v60, %v691_v10  ;;  %v975_v21 = vmul.bf16 %v5672_v16, %v696_v0  ;;  %v720_v0 = vld [vmem:[%s6827_s4 + $0x128] sm:$0xff] }
 0x1d3   :  { %v3167_v29 = vpop.f32.mrf.mxu1 }
 0x1d4   :  { %v6044_v32 = vadd.f32 %v3167_v29, %v2994_v27  ;;  %v2996_v33 = vpop.f32.mrf.mxu0  ;;  %v4118_v30 = vcombine.low %v964_v19, %v970_v20  ;;  %v4128_v31 = vcombine.high %v975_v21, %v981_v22  ;;  %v4127_v52 = vcombine.low %v975_v21, %v981_v22 }
 0x1d5   :  { %v3169_v37 = vpop.f32.mrf.mxu1  ;;  %v999_v19 = vmul.bf16 %v5672_v16, %v720_v0 }
 0x1d6   :  { %v6048_v35 = vadd.f32 %v3169_v37, %v2996_v33  ;;  %v2998_v39 = vpop.f32.mrf.mxu0  ;;  %v708_v33 = vld [vmem:[%s6827_s4 + $0xd0] sm:$0xff]  ;;  %v697_v37 = vld [vmem:[%s6827_s4 + $0x80] sm:$0xf] }
 0x1d7   :  { %v3171_v63 = vpop.f32.mrf.mxu1  ;;  %v987_v45 = vmul.bf16 %v5672_v16, %v708_v33  ;;  %v721_v33 = vld [vmem:[%s6827_s4 + $0x130] sm:$0xf] }
 0x1d8   :  { %v6050_v43 = vadd.f32 %v3171_v63, %v2998_v39  ;;  %v3002_v44 = vpop.f32.mrf.mxu0  ;;  %3447 = vmatmul.mubr.bf16.gmra.mxu0 %v4244_v38  ;;  %v703_v39 = vld [vmem:[%s6827_s4 + $0xac] sm:$0xf]  ;;  %v714_v38 = vld [vmem:[%s6827_s4 + $0xfc] sm:$0xff] }
 0x1d9   :  { %v3175_v46 = vpop.f32.mrf.mxu1  ;;  %3620 = vmatmul.mubr.bf16.gmra.mxu1 %v4246_v1  ;;  %3456 = vmatprep.mubr.bf16.mxu0 %v4256_v62  ;;  %v993_v23 = vmul.bf16 %v5672_v16, %v714_v38  ;;  %v732_v38 = vld [vmem:[%s6827_s4 + $0x180] sm:$0xff] }
 0x1da   :  { %v6058_v47 = vadd.f32 %v3175_v46, %v3002_v44  ;;  %3629 = vmatprep.mubr.bf16.mxu1 %v4258_v14  ;;  %v3004_v48 = vpop.f32.mrf.mxu0  ;;  %v976_v44 = vmul.bf16 %v6067_v60, %v697_v37  ;;  %v982_v14 = vmul.bf16 %v6067_v60, %v703_v39  ;;  %v727_v39 = vld [vmem:[%s6827_s4 + $0x15c] sm:$0xf] }
 0x1db   :  { %v3177_v50 = vpop.f32.mrf.mxu1 }
 0x1dc   :  { %v6063_v53 = vadd.f32 %v3177_v50, %v3004_v48  ;;  %v3006_v54 = vpop.f32.mrf.mxu0 }
 0x1dd   :  { %v3179_v55 = vpop.f32.mrf.mxu1 }
 0x1de   :  { %v6065_v56 = vadd.f32 %v3179_v55, %v3006_v54  ;;  %v3008_v57 = vpop.f32.mrf.mxu0  ;;  %v4129_v55 = vcombine.low %v976_v44, %v982_v14 }
 0x1df   :  { %v3181_v61 = vpop.f32.mrf.mxu1 }
 0x1e0   :  { %v6072_v7 = vadd.f32 %v3181_v61, %v3008_v57  ;;  %v3012_v8 = vpop.f32.mrf.mxu0  ;;  %3457 = vmatmul.mubr.bf16.gmra.mxu0 %v4255_v58  ;;  %v4139_v57 = vcombine.high %v987_v45, %v993_v23  ;;  %v709_v58 = vld [vmem:[%s6827_s4 + $0xd8] sm:$0xf] }
 0x1e1   :  { %v3185_v13 = vpop.f32.mrf.mxu1  ;;  %3630 = vmatmul.mubr.bf16.gmra.mxu1 %v4257_v3  ;;  %3672 = vmatprep.mubr.bf16.mxu0 %v4117_v5  ;;  %v715_v5 = vld [vmem:[%s6827_s4 + $0x104] sm:$0xf] }
 0x1e2   :  { %v6083_v15 = vadd.f32 %v3185_v13, %v3012_v8  ;;  %v3014_v17 = vpop.f32.mrf.mxu0  ;;  %3845 = vmatprep.mubr.bf16.mxu1 %v6829_v2  ;;  %v726_v8 = vld [vmem:[%s6827_s4 + $0x154] sm:$0xff] }
 0x1e3   :  { %v3187_v18 = vpop.f32.mrf.mxu1  ;;  %v1005_v20 = vmul.bf16 %v5672_v16, %v726_v8  ;;  %v733_v8 = vld [vmem:[%s6827_s4 + $0x188] sm:$0xf] }
 0x1e4   :  { %v6090_v24 = vadd.f32 %v3187_v18, %v3014_v17  ;;  %v3016_v25 = vpop.f32.mrf.mxu0  ;;  %v988_v17 = vmul.bf16 %v6067_v60, %v709_v58  ;;  %v994_v18 = vmul.bf16 %v6067_v60, %v715_v5 }
 0x1e5   :  { %v3189_v41 = vpop.f32.mrf.mxu1  ;;  %v4149_v58 = vcombine.low %v999_v19, %v1005_v20 }
 0x1e6   :  { %v6092_v27 = vadd.f32 %v3189_v41, %v3016_v25  ;;  %v3018_v28 = vpop.f32.mrf.mxu0 }
 0x1e7   :  { %v3191_v29 = vpop.f32.mrf.mxu1 }
 0x1e8   :  { %v6097_v34 = vadd.f32 %v3191_v29, %v3018_v28  ;;  %v3022_v36 = vpop.f32.mrf.mxu0  ;;  %3673 = vmatmul.mubr.bf16.vlgmr.msra.gmra.mxu0 %v4116_v51  ;;  %v4138_v28 = vcombine.low %v987_v45, %v993_v23  ;;  %v1000_v45 = vmul.bf16 %v6067_v60, %v721_v33  ;;  %v1006_v23 = vmul.bf16 %v6067_v60, %v727_v39 }
 0x1e9   :  { %v3195_v40 = vpop.f32.mrf.mxu1  ;;  %4430 = vmatmul.mubr.msk.bf16.vlgmr.msra.gmra.mxu1 %vm2905_vm3, %v4118_v30  ;;  %3682 = vmatprep.mubr.bf16.mxu0 %v4128_v31  ;;  %v4140_v30 = vcombine.low %v988_v17, %v994_v18  ;;  %v4150_v31 = vcombine.high %v999_v19, %v1005_v20  ;;  %v744_v17 = vld [vmem:[%s6827_s4 + $0x1d8] sm:$0xff]  ;;  %v750_v18 = vld [vmem:[%s6827_s4 + $0x204] sm:$0xff] }
 0x1ea   :  { %v6109_v63 = vadd.f32 %v3195_v40, %v3022_v36  ;;  %v3024_v1 = vpop.f32.mrf.mxu0  ;;  %3855 = vmatprep.mubr.bf16.mxu1 %v6829_v2  ;;  %v738_v40 = vld [vmem:[%s6827_s4 + $0x1ac] sm:$0xff]  ;;  %v4151_v5 = vcombine.low %v1000_v45, %v1006_v23  ;;  %v745_v45 = vld [vmem:[%s6827_s4 + $0x1e0] sm:$0xf] }
 0x1eb   :  { %v3197_v62 = vpop.f32.mrf.mxu1 }
 0x1ec   :  { %v6116_v46 = vadd.f32 %v3197_v62, %v3024_v1  ;;  %v3026_v48 = vpop.f32.mrf.mxu0 }
 0x1ed   :  { %v3199_v49 = vpop.f32.mrf.mxu1 }
 0x1ee   :  { %v6118_v50 = vadd.f32 %v3199_v49, %v3026_v48  ;;  %v3028_v42 = vpop.f32.mrf.mxu0  ;;  %v1011_v48 = vmul.bf16 %v5672_v16, %v732_v38  ;;  %v1017_v49 = vmul.bf16 %v5672_v16, %v738_v40 }
 0x1ef   :  { %v3201_v54 = vpop.f32.mrf.mxu1 }
 0x1f0   :  { %v6123_v61 = vadd.f32 %v3201_v54, %v3028_v42  ;;  %v3032_v3 = vpop.f32.mrf.mxu0  ;;  %3683 = vmatmul.mubr.bf16.gmra.mxu0 %v4127_v52  ;;  %v4161_v0 = vcombine.high %v1011_v48, %v1017_v49  ;;  %v4160_v40 = vcombine.low %v1011_v48, %v1017_v49  ;;  %v762_v48 = vld [vmem:[%s6827_s4 + $0x25c] sm:$0xff] }
 0x1f1   :  { %v3205_v9 = vpop.f32.mrf.mxu1  ;;  %4431 = vmatmul.mubr.msk.bf16.gmra.mxu1 %vm2905_vm3, %v4129_v55  ;;  %3692 = vmatprep.mubr.bf16.mxu0 %v4139_v57 }
 0x1f2   :  { %v6135_v10 = vadd.f32 %v3205_v9, %v3032_v3  ;;  %v3034_v12 = vpop.f32.mrf.mxu0  ;;  %3865 = vmatprep.mubr.bf16.mxu1 %v6829_v2 }
 0x1f3   :  { %v3207_v13 = vpop.f32.mrf.mxu1 }
 0x1f4   :  { %v6142_v21 = vadd.f32 %v3207_v13, %v3034_v12  ;;  %v3036_v22 = vpop.f32.mrf.mxu0  ;;  %v739_v13 = vld [vmem:[%s6827_s4 + $0x1b4] sm:$0xf] }
 0x1f5   :  { %v3209_v25 = vpop.f32.mrf.mxu1 }
 0x1f6   :  { %v6144_v41 = vadd.f32 %v3209_v25, %v3036_v22  ;;  %v3038_v51 = vpop.f32.mrf.mxu0 }
 0x1f7   :  { %v3211_v29 = vpop.f32.mrf.mxu1 }
 0x1f8   :  { %v6149_v36 = vadd.f32 %v3211_v29, %v3038_v51  ;;  %v3042_v37 = vpop.f32.mrf.mxu0  ;;  %3693 = vmatmul.mubr.bf16.gmra.mxu0 %v4138_v28  ;;  %v1012_v51 = vmul.bf16 %v6067_v60, %v733_v8  ;;  %v1018_v28 = vmul.bf16 %v6067_v60, %v739_v13  ;;  %v1023_v29 = vmul.bf16 %v5672_v16, %v744_v17 }
 0x1f9   :  { %v3215_v1 = vpop.f32.mrf.mxu1  ;;  %4432 = vmatmul.mubr.msk.bf16.gmra.mxu1 %vm2905_vm3, %v4140_v30  ;;  %3702 = vmatprep.mubr.bf16.mxu0 %v4150_v31  ;;  %v1029_v30 = vmul.bf16 %v5672_v16, %v750_v18  ;;  %v1041_v13 = vmul.bf16 %v5672_v16, %v762_v48 }
 0x1fa   :  { %v6161_v62 = vadd.f32 %v3215_v1, %v3042_v37  ;;  %v3044_v44 = vpop.f32.mrf.mxu0  ;;  %3875 = vmatprep.mubr.bf16.mxu1 %v6829_v2 }
 0x1fb   :  { %v3217_v14 = vpop.f32.mrf.mxu1 }
 0x1fc   :  { %v6168_v42 = vadd.f32 %v3217_v14, %v3044_v44  ;;  %v3046_v52 = vpop.f32.mrf.mxu0  ;;  %v4162_v44 = vcombine.low %v1012_v51, %v1018_v28  ;;  %v4172_v14 = vcombine.high %v1023_v29, %v1029_v30  ;;  %v4171_v51 = vcombine.low %v1023_v29, %v1029_v30  ;;  %v774_v29 = vld [vmem:[%s6827_s4 + $0x2b4] sm:$0xff] }
 0x1fd   :  { %v3219_v54 = vpop.f32.mrf.mxu1 }
 0x1fe   :  { %v6170_v55 = vadd.f32 %v3219_v54, %v3046_v52  ;;  %v3048_v57 = vpop.f32.mrf.mxu0  ;;  %v751_v54 = vld [vmem:[%s6827_s4 + $0x20c] sm:$0xf] }
 0x1ff   :  { %v3221_v3 = vpop.f32.mrf.mxu1  ;;  %v1030_v8 = vmul.bf16 %v6067_v60, %v751_v54 }
 0x200   :  { %v6175_v9 = vadd.f32 %v3221_v3, %v3048_v57  ;;  %v3052_v12 = vpop.f32.mrf.mxu0  ;;  %3703 = vmatmul.mubr.bf16.gmra.mxu0 %v4149_v58  ;;  %v756_v57 = vld [vmem:[%s6827_s4 + $0x230] sm:$0xff] }
 0x201   :  { %v3225_v19 = vpop.f32.mrf.mxu1  ;;  %4433 = vmatmul.mubr.msk.bf16.gmra.mxu1 %vm2905_vm3, %v4151_v5  ;;  %3712 = vmatprep.mubr.bf16.mxu0 %v4161_v0  ;;  %v1024_v0 = vmul.bf16 %v6067_v60, %v745_v45 }
 0x202   :  { %v6187_v20 = vadd.f32 %v3225_v19, %v3052_v12  ;;  %v3054_v22 = vpop.f32.mrf.mxu0  ;;  %3885 = vmatprep.mubr.bf16.mxu1 %v6829_v2  ;;  %v1035_v12 = vmul.bf16 %v5672_v16, %v756_v57 }
 0x203   :  { %v3227_v25 = vpop.f32.mrf.mxu1 }
 0x204   :  { %v6194_v31 = vadd.f32 %v3227_v25, %v3054_v22  ;;  %v3056_v33 = vpop.f32.mrf.mxu0 }
 0x205   :  { %v3229_v37 = vpop.f32.mrf.mxu1 }
 0x206   :  { %v6196_v39 = vadd.f32 %v3229_v37, %v3056_v33  ;;  %v3058_v38 = vpop.f32.mrf.mxu0  ;;  %v4173_v33 = vcombine.low %v1024_v0, %v1030_v8  ;;  %v4183_v37 = vcombine.high %v1035_v12, %v1041_v13 }
 0x207   :  { %v3231_v1 = vpop.f32.mrf.mxu1 }
 0x208   :  { %v6201_v23 = vadd.f32 %v3231_v1, %v3058_v38  ;;  %v3062_v52 = vpop.f32.mrf.mxu0  ;;  %3713 = vmatmul.mubr.bf16.gmra.mxu0 %v4160_v40  ;;  %v757_v38 = vld [vmem:[%s6827_s4 + $0x238] sm:$0xf] }
 0x209   :  { %v3235_v49 = vpop.f32.mrf.mxu1  ;;  %4434 = vmatmul.mubr.msk.bf16.gmra.mxu1 %vm2905_vm3, %v4162_v44  ;;  %3722 = vmatprep.mubr.bf16.mxu0 %v4172_v14  ;;  %v763_v44 = vld [vmem:[%s6827_s4 + $0x264] sm:$0xf]  ;;  %v768_v14 = vld [vmem:[%s6827_s4 + $0x288] sm:$0xff]  ;;  %v1036_v57 = vmul.bf16 %v6067_v60, %v757_v38 }
 0x20a   :  { %v6213_v58 = vadd.f32 %v3235_v49, %v3062_v52  ;;  %v3064_v3 = vpop.f32.mrf.mxu0  ;;  %3895 = vmatprep.mubr.bf16.mxu1 %v6829_v2  ;;  %v1042_v48 = vmul.bf16 %v6067_v60, %v763_v44  ;;  %v1047_v49 = vmul.bf16 %v5672_v16, %v768_v14  ;;  %v775_v44 = vld [vmem:[%s6827_s4 + $0x2bc] sm:$0xf]  ;;  %v780_v14 = vld [vmem:[%s6827_s4 + $0x2e0] sm:$0xff] }
 0x20b   :  { %v3237_v5 = vpop.f32.mrf.mxu1 }
 0x20c   :  { %v6220_v17 = vadd.f32 %v3237_v5, %v3064_v3  ;;  %v3066_v18 = vpop.f32.mrf.mxu0  ;;  %v1053_v3 = vmul.bf16 %v5672_v16, %v774_v29 }
 0x20d   :  { %v3239_v19 = vpop.f32.mrf.mxu1 }
 0x20e   :  { %v6222_v22 = vadd.f32 %v3239_v19, %v3066_v18  ;;  %v3068_v25 = vpop.f32.mrf.mxu0 }
 0x20f   :  { %v3241_v28 = vpop.f32.mrf.mxu1 }
 0x210   :  { %v6227_v40 = vadd.f32 %v3241_v28, %v3068_v25  ;;  %v3072_v1 = vpop.f32.mrf.mxu0  ;;  %3723 = vmatmul.mubr.bf16.gmra.mxu0 %v4171_v51  ;;  %v4182_v25 = vcombine.low %v1035_v12, %v1041_v13  ;;  %v4184_v28 = vcombine.low %v1036_v57, %v1042_v48  ;;  %v786_v12 = vld [vmem:[%s6827_s4 + $0x30c] sm:$0xff]  ;;  %v1054_v57 = vmul.bf16 %v6067_v60, %v775_v44 }
 0x211   :  { %v3245_v30 = vpop.f32.mrf.mxu1  ;;  %4435 = vmatmul.mubr.msk.bf16.gmra.mxu1 %vm2905_vm3, %v4173_v33  ;;  %3732 = vmatprep.mubr.bf16.mxu0 %v4183_v37  ;;  %v4194_v33 = vcombine.high %v1047_v49, %v1053_v3  ;;  %v769_v37 = vld [vmem:[%s6827_s4 + $0x290] sm:$0xf]  ;;  %v1059_v48 = vmul.bf16 %v5672_v16, %v780_v14 }
 0x212   :  { %v6239_v45 = vadd.f32 %v3245_v30, %v3072_v1  ;;  %v3074_v52 = vpop.f32.mrf.mxu0  ;;  %3905 = vmatprep.mubr.bf16.mxu1 %v6829_v2 }
 0x213   :  { %v3247_v54 = vpop.f32.mrf.mxu1 }
 0x214   :  { %v6246_v5 = vadd.f32 %v3247_v54, %v3074_v52  ;;  %v3076_v0 = vpop.f32.mrf.mxu0  ;;  %v1048_v54 = vmul.bf16 %v6067_v60, %v769_v37  ;;  %v781_v37 = vld [vmem:[%s6827_s4 + $0x2e8] sm:$0xf] }
 0x215   :  { %v3249_v8 = vpop.f32.mrf.mxu1 }
 0x216   :  { %v6248_v18 = vadd.f32 %v3249_v8, %v3076_v0  ;;  %v3078_v19 = vpop.f32.mrf.mxu0  ;;  %v1065_v0 = vmul.bf16 %v5672_v16, %v786_v12  ;;  %v787_v12 = vld [vmem:[%s6827_s4 + $0x314] sm:$0xf] }
 0x217   :  { %v3251_v51 = vpop.f32.mrf.mxu1 }
 0x218   :  { %v6253_v38 = vadd.f32 %v3251_v51, %v3078_v19  ;;  %v3082_v1 = vpop.f32.mrf.mxu0  ;;  %3733 = vmatmul.mubr.bf16.gmra.mxu0 %v4182_v25 }
 0x219   :  { %v3255_v13 = vpop.f32.mrf.mxu1  ;;  %4436 = vmatmul.mubr.msk.bf16.gmra.mxu1 %vm2905_vm3, %v4184_v28  ;;  %3742 = vmatprep.mubr.bf16.mxu0 %v4194_v33  ;;  %v4193_v33 = vcombine.low %v1047_v49, %v1053_v3  ;;  %v798_v49 = vld [vmem:[%s6827_s4 + $0x364] sm:$0xff] }
 0x21a   :  { %v6265_v29 = vadd.f32 %v3255_v13, %v3082_v1  ;;  %v3084_v30 = vpop.f32.mrf.mxu0  ;;  %3915 = vmatprep.mubr.bf16.mxu1 %v6829_v2  ;;  %v4195_v13 = vcombine.low %v1048_v54, %v1054_v57  ;;  %v4205_v2 = vcombine.high %v1059_v48, %v1065_v0  ;;  %v6836_v57 = vmov 0  }
 0x21b   :  { %v3257_v52 = vpop.f32.mrf.mxu1 }
 0x21c   :  { %6831 = vst [vmem:[#allocation2_spill] sm:$0xff] %v6265_v29  ;;  %v6272_v8 = vadd.f32 %v3257_v52, %v3084_v30  ;;  %v3086_v19 = vpop.f32.mrf.mxu0  ;;  %v792_v30 = vld [vmem:[%s6827_s4 + $0x338] sm:$0xff] }
 0x21d   :  { %v3259_v25 = vpop.f32.mrf.mxu1 }
 0x21e   :  { %6832 = vst [vmem:[#allocation3_spill] sm:$0xff] %v6272_v8  ;;  %v6274_v51 = vadd.f32 %v3259_v25, %v3086_v19  ;;  %v3088_v28 = vpop.f32.mrf.mxu0  ;;  %v1060_v25 = vmul.bf16 %v6067_v60, %v781_v37  ;;  %v793_v37 = vld [vmem:[%s6827_s4 + $0x340] sm:$0xf] }
 0x21f   :  { %v3261_v1 = vpop.f32.mrf.mxu1 }
 0x220   :  { %6833 = vst [vmem:[#allocation4_spill] sm:$0xff] %v6274_v51  ;;  %v6279_v44 = vadd.f32 %v3261_v1, %v3088_v28  ;;  %v3092_v14 = vpop.f32.mrf.mxu0  ;;  %3743 = vmatmul.mubr.bf16.gmra.mxu0 %v4193_v33  ;;  %v1066_v28 = vmul.bf16 %v6067_v60, %v787_v12  ;;  %v1071_v33 = vmul.bf16 %v5672_v16, %v792_v30 }
 0x221   :  { %v3265_v3 = vpop.f32.mrf.mxu1  ;;  %4437 = vmatmul.mubr.msk.bf16.gmra.mxu1 %vm2905_vm3, %v4195_v13  ;;  %3752 = vmatprep.mubr.bf16.mxu0 %v4205_v2  ;;  %v1077_v1 = vmul.bf16 %v5672_v16, %v798_v49  ;;  %v799_v49 = vld [vmem:[%s6827_s4 + $0x36c] sm:$0xf] }
 0x222   :  { %6834 = vst [vmem:[#allocation5_spill] sm:$0xff] %v6279_v44  ;;  %v6291_v52 = vadd.f32 %v3265_v3, %v3092_v14  ;;  %v3094_v54 = vpop.f32.mrf.mxu0  ;;  %3925 = vmatprep.mubr.bf16.mxu1 %v6836_v57  ;;  %v4204_v14 = vcombine.low %v1059_v48, %v1065_v0  ;;  %v810_v48 = vld [vmem:[%s6827_s4 + $0x3bc] sm:$0xff] }
 0x223   :  { %v3267_v19 = vpop.f32.mrf.mxu1  ;;  %v4216_v29 = vcombine.high %v1071_v33, %v1077_v1 }
 0x224   :  { %6835 = vst [vmem:[#allocation6_spill] sm:$0xff] %v6291_v52  ;;  %v6298_v44 = vadd.f32 %v3267_v19, %v3094_v54  ;;  %v3096_v51 = vpop.f32.mrf.mxu0  ;;  %v4206_v52 = vcombine.low %v1060_v25, %v1066_v28  ;;  %v1072_v25 = vmul.bf16 %v6067_v60, %v793_v37  ;;  %v1078_v28 = vmul.bf16 %v6067_v60, %v799_v49  ;;  %v805_v37 = vld [vmem:[%s6827_s4 + $0x398] sm:$0xf] }
 0x225   :  { %v3269_v8 = vpop.f32.mrf.mxu1 }
 0x226   :  { %6837 = vst [vmem:[#allocation7_spill] sm:$0xff] %v6298_v44  ;;  %v6300_v13 = vadd.f32 %v3269_v8, %v3096_v51  ;;  %v3098_v2 = vpop.f32.mrf.mxu0  ;;  %v804_v8 = vld [vmem:[%s6827_s4 + $0x390] sm:$0xff] }
 0x227   :  { %v3271_v3 = vpop.f32.mrf.mxu1 }
 0x228   :  { %6838 = vst [vmem:[#allocation8_spill] sm:$0xff] %v6300_v13  ;;  %v6305_v12 = vadd.f32 %v3271_v3, %v3098_v2  ;;  %v3102_v30 = vpop.f32.mrf.mxu0  ;;  %3753 = vmatmul.mubr.bf16.gmra.mxu0 %v4204_v14  ;;  %v1083_v2 = vmul.bf16 %v5672_v16, %v804_v8  ;;  %v1089_v14 = vmul.bf16 %v5672_v16, %v810_v48  ;;  %v811_v48 = vld [vmem:[%s6827_s4 + $0x3c4] sm:$0xf] }
 0x229   :  { %v3275_v0 = vpop.f32.mrf.mxu1  ;;  %4438 = vmatmul.mubr.msk.bf16.gmra.mxu1 %vm2905_vm3, %v4206_v52  ;;  %3762 = vmatprep.mubr.bf16.mxu0 %v4216_v29 }
 0x22a   :  { %6839 = vst [vmem:[#allocation9_spill] sm:$0xff] %v6305_v12  ;;  %v6317_v51 = vadd.f32 %v3275_v0, %v3102_v30  ;;  %v3104_v54 = vpop.f32.mrf.mxu0  ;;  %3935 = vmatprep.mubr.bf16.mxu1 %v6836_v57  ;;  %v4215_v30 = vcombine.low %v1071_v33, %v1077_v1  ;;  %v4227_v44 = vcombine.high %v1083_v2, %v1089_v14  ;;  %v822_v33 = vld [vmem:[%s6827_s4 + $0x414] sm:$0xff] }
 0x22b   :  { %v3277_v19 = vpop.f32.mrf.mxu1 }
 0x22c   :  { %6840 = vst [vmem:[#allocation10_spill] sm:$0xff] %v6317_v51  ;;  %v6324_v3 = vadd.f32 %v3277_v19, %v3104_v54  ;;  %v3106_v12 = vpop.f32.mrf.mxu0  ;;  %v4217_v51 = vcombine.low %v1072_v25, %v1078_v28  ;;  %v1084_v25 = vmul.bf16 %v6067_v60, %v805_v37  ;;  %v1090_v28 = vmul.bf16 %v6067_v60, %v811_v48  ;;  %v817_v37 = vld [vmem:[%s6827_s4 + $0x3f0] sm:$0xf]  ;;  %v823_v48 = vld [vmem:[%s6827_s4 + $0x41c] sm:$0xf] }
 0x22d   :  { %v3279_v13 = vpop.f32.mrf.mxu1 }
 0x22e   :  { %6841 = vst [vmem:[#allocation11_spill] sm:$0xff] %v6324_v3  ;;  %v6326_v52 = vadd.f32 %v3279_v13, %v3106_v12  ;;  %v3108_v29 = vpop.f32.mrf.mxu0  ;;  %v816_v13 = vld [vmem:[%s6827_s4 + $0x3e8] sm:$0xff] }
 0x22f   :  { %v3281_v0 = vpop.f32.mrf.mxu1 }
 0x230   :  { %6842 = vst [vmem:[#allocation12_spill] sm:$0xff] %v6326_v52  ;;  %v6331_v49 = vadd.f32 %v3281_v0, %v3108_v29  ;;  %v3112_v8 = vpop.f32.mrf.mxu0  ;;  %3763 = vmatmul.mubr.bf16.gmra.mxu0 %v4215_v30  ;;  %v1095_v29 = vmul.bf16 %v5672_v16, %v816_v13  ;;  %v1101_v30 = vmul.bf16 %v5672_v16, %v822_v33 }
 0x231   :  { %v3285_v1 = vpop.f32.mrf.mxu1  ;;  %4439 = vmatmul.mubr.msk.bf16.gmra.mxu1 %vm2905_vm3, %v4217_v51  ;;  %3772 = vmatprep.mubr.bf16.mxu0 %v4227_v44 }
 0x232   :  { %6843 = vst [vmem:[#allocation13_spill] sm:$0xff] %v6331_v49  ;;  %v6343_v12 = vadd.f32 %v3285_v1, %v3112_v8  ;;  %v3114_v54 = vpop.f32.mrf.mxu0  ;;  %3945 = vmatprep.mubr.bf16.mxu1 %v6836_v57  ;;  %v4226_v8 = vcombine.low %v1083_v2, %v1089_v14  ;;  %v4238_v3 = vcombine.high %v1095_v29, %v1101_v30  ;;  %v834_v2 = vld [vmem:[%s6827_s4 + $0x46c] sm:$0xff] }
 0x233   :  { %v3287_v19 = vpop.f32.mrf.mxu1 }
 0x234   :  { %6844 = vst [vmem:[#allocation14_spill] sm:$0xff] %v6343_v12  ;;  %v6350_v0 = vadd.f32 %v3287_v19, %v3114_v54  ;;  %v3116_v49 = vpop.f32.mrf.mxu0  ;;  %v4228_v12 = vcombine.low %v1084_v25, %v1090_v28  ;;  %v1096_v19 = vmul.bf16 %v6067_v60, %v817_v37  ;;  %v1102_v25 = vmul.bf16 %v6067_v60, %v823_v48 }
 0x235   :  { %v3289_v52 = vpop.f32.mrf.mxu1 }
 0x236   :  { %6845 = vst [vmem:[#allocation15_spill] sm:$0xff] %v6350_v0  ;;  %v6352_v51 = vadd.f32 %v3289_v52, %v3116_v49  ;;  %v3118_v44 = vpop.f32.mrf.mxu0  ;;  %v828_v52 = vld [vmem:[%s6827_s4 + $0x440] sm:$0xff]  ;;  %v4237_v0 = vcombine.low %v1095_v29, %v1101_v30 }
 0x237   :  { %v3291_v1 = vpop.f32.mrf.mxu1 }
 0x238   :  { %6846 = vst [vmem:[#allocation16_spill] sm:$0xff] %v6352_v51  ;;  %v6360_v13 = vadd.f32 %v3291_v1, %v3118_v44  ;;  %v3328_v33 = vpop.f32.mrf.mxu0  ;;  %3773 = vmatmul.mubr.bf16.gmra.mxu0 %v4226_v8  ;;  %v1107_v1 = vmul.bf16 %v5672_v16, %v828_v52  ;;  %v829_v52 = vld [vmem:[%s6827_s4 + $0x448] sm:$0xf] }
 0x239   :  { %v3329_v14 = vadd.f32 %v3328_v33, %v6016_v59  ;;  %v3501_v49 = vpop.f32.mrf.mxu1  ;;  %4440 = vmatmul.mubr.msk.bf16.gmra.mxu1 %vm2905_vm3, %v4228_v12  ;;  %3782 = vmatprep.mubr.bf16.mxu0 %v4238_v3  ;;  %v1113_v59 = vmul.bf16 %v5672_v16, %v834_v2  ;;  %v835_v2 = vld [vmem:[%s6827_s4 + $0x474] sm:$0xf] }
 0x23a   :  { %6847 = vst [vmem:[#allocation17_spill] sm:$0xff] %v6360_v13  ;;  %v3330_v54 = vpop.f32.mrf.mxu0  ;;  %3955 = vmatprep.mubr.bf16.mxu1 %v6836_v57 }
 0x23b   :  { %v6373_v28 = vadd.f32 %v3501_v49, %v3329_v14  ;;  %v3331_v44 = vadd.f32 %v3330_v54, %v6020_v6  ;;  %v3503_v8 = vpop.f32.mrf.mxu1  ;;  %v4239_v49 = vcombine.low %v1096_v19, %v1102_v25  ;;  %v4249_v6 = vcombine.high %v1107_v1, %v1113_v59 }
 0x23c   :  { %v3332_v33 = vpop.f32.mrf.mxu0  ;;  %v1114_v25 = vmul.bf16 %v6067_v60, %v835_v2 }
 0x23d   :  { %v6378_v13 = vadd.f32 %v3503_v8, %v3331_v44  ;;  %v3333_v3 = vadd.f32 %v3332_v33, %v6024_v11  ;;  %v3505_v12 = vpop.f32.mrf.mxu1  ;;  %v840_v11 = vld [vmem:[%s6827_s4 + $0x498] sm:$0xff] }
 0x23e   :  { %v3334_v51 = vpop.f32.mrf.mxu0 }
 0x23f   :  { %v6381_v37 = vadd.f32 %v3505_v12, %v3333_v3  ;;  %v3335_v48 = vadd.f32 %v3334_v51, %v6026_v4  ;;  %v3507_v14 = vpop.f32.mrf.mxu1  ;;  %v846_v4 = vld [vmem:[%s6827_s4 + $0x4c4] sm:$0xff]  ;;  %v1119_v3 = vmul.bf16 %v5672_v16, %v840_v11 }
 0x240   :  { %v3338_v54 = vpop.f32.mrf.mxu0  ;;  %3783 = vmatmul.mubr.bf16.gmra.mxu0 %v4237_v0  ;;  %v1108_v0 = vmul.bf16 %v6067_v60, %v829_v52 }
 0x241   :  { %v6396_v29 = vadd.f32 %v3507_v14, %v3335_v48  ;;  %v3339_v30 = vadd.f32 %v3338_v54, %v6040_v26  ;;  %v3511_v51 = vpop.f32.mrf.mxu1  ;;  %4441 = vmatmul.mubr.msk.bf16.gmra.mxu1 %vm2905_vm3, %v4239_v49  ;;  %3792 = vmatprep.mubr.bf16.mxu0 %v4249_v6  ;;  %v1125_v26 = vmul.bf16 %v5672_v16, %v846_v4  ;;  %v841_v16 = vld [vmem:[%s6827_s4 + $0x4a0] sm:$0xf] }
 0x242   :  { %v3340_v19 = vpop.f32.mrf.mxu0  ;;  %3965 = vmatprep.mubr.bf16.mxu1 %v6836_v57  ;;  %v4248_v54 = vcombine.low %v1107_v1, %v1113_v59 }
 0x243   :  { %v6403_v44 = vadd.f32 %v3511_v51, %v3339_v30  ;;  %v3341_v8 = vadd.f32 %v3340_v19, %v6044_v32  ;;  %v3513_v33 = vpop.f32.mrf.mxu1  ;;  %v4250_v51 = vcombine.low %v1108_v0, %v1114_v25  ;;  %v4260_v32 = vcombine.high %v1119_v3, %v1125_v26 }
 0x244   :  { %v3342_v12 = vpop.f32.mrf.mxu0 }
 0x245   :  { %v6408_v48 = vadd.f32 %v3513_v33, %v3341_v8  ;;  %v3343_v14 = vadd.f32 %v3342_v12, %v6048_v35  ;;  %v3515_v49 = vpop.f32.mrf.mxu1  ;;  %v847_v35 = vld [vmem:[%s6827_s4 + $0x4cc] sm:$0xf]  ;;  %v1120_v8 = vmul.bf16 %v6067_v60, %v841_v16 }
 0x246   :  { %v3344_v6 = vpop.f32.mrf.mxu0  ;;  %v1126_v33 = vmul.bf16 %v6067_v60, %v847_v35 }
 0x247   :  { %v6411_v52 = vadd.f32 %v3515_v49, %v3343_v14  ;;  %v3345_v2 = vadd.f32 %v3344_v6, %v6050_v43  ;;  %v3517_v30 = vpop.f32.mrf.mxu1 }
 0x248   :  { %v3348_v19 = vpop.f32.mrf.mxu0  ;;  %3793 = vmatmul.mubr.bf16.gmra.mxu0 %v4248_v54  ;;  %v4259_v54 = vcombine.low %v1119_v3, %v1125_v26 }
 0x249   :  { %v6420_v11 = vadd.f32 %v3517_v30, %v3345_v2  ;;  %v3349_v1 = vadd.f32 %v3348_v19, %v6058_v47  ;;  %v3521_v59 = vpop.f32.mrf.mxu1  ;;  %4442 = vmatmul.mubr.msk.bf16.gmra.mxu1 %vm2905_vm3, %v4250_v51  ;;  %3802 = vmatprep.mubr.bf16.mxu0 %v4260_v32  ;;  %v4261_v51 = vcombine.low %v1120_v8, %v1126_v33 }
 0x24a   :  { %v3350_v43 = vpop.f32.mrf.mxu0  ;;  %3975 = vmatprep.mubr.bf16.mxu1 %v6836_v57 }
 0x24b   :  { %v6425_v4 = vadd.f32 %v3521_v59, %v3349_v1  ;;  %v3351_v0 = vadd.f32 %v3350_v43, %v6063_v53  ;;  %v3523_v25 = vpop.f32.mrf.mxu1 }
 0x24c   :  { %v3352_v12 = vpop.f32.mrf.mxu0 }
 0x24d   :  { %v6430_v14 = vadd.f32 %v3523_v25, %v3351_v0  ;;  %v3353_v47 = vadd.f32 %v3352_v12, %v6065_v56  ;;  %v3525_v49 = vpop.f32.mrf.mxu1 }
 0x24e   :  { %v3354_v6 = vpop.f32.mrf.mxu0 }
 0x24f   :  { %v6433_v2 = vadd.f32 %v3525_v49, %v3353_v47  ;;  %v3355_v57 = vadd.f32 %v3354_v6, %v6072_v7  ;;  %v3527_v30 = vpop.f32.mrf.mxu1 }
 0x250   :  { %v3358_v53 = vpop.f32.mrf.mxu0  ;;  %3803 = vmatmul.mubr.bf16.gmra.mxu0 %v4259_v54 }
 0x251   :  { %v6436_v32 = vadd.f32 %v3527_v30, %v3355_v57  ;;  %v3359_v60 = vadd.f32 %v3358_v53, %v6083_v15  ;;  %v3531_v19 = vpop.f32.mrf.mxu1  ;;  %4443 = vmatmul.mubr.msk.bf16.gmra.mxu1 %vm2905_vm3, %v4261_v51 }
 0x252   :  { %v3360_v16 = vpop.f32.mrf.mxu0 }
 0x253   :  { %v6440_v56 = vadd.f32 %v3531_v19, %v3359_v60  ;;  %v3361_v3 = vadd.f32 %v3360_v16, %v6090_v24  ;;  %v3533_v26 = vpop.f32.mrf.mxu1 }
 0x254   :  { %v3362_v35 = vpop.f32.mrf.mxu0 }
 0x255   :  { %v6443_v1 = vadd.f32 %v3533_v26, %v3361_v3  ;;  %v3363_v7 = vadd.f32 %v3362_v35, %v6092_v27  ;;  %v3535_v59 = vpop.f32.mrf.mxu1 }
 0x256   :  { %v3364_v43 = vpop.f32.mrf.mxu0 }
 0x257   :  { %v6446_v0 = vadd.f32 %v3535_v59, %v3363_v7  ;;  %v3365_v15 = vadd.f32 %v3364_v43, %v6097_v34  ;;  %v3537_v25 = vpop.f32.mrf.mxu1 }
 0x258   :  { %v3368_v8 = vpop.f32.mrf.mxu0 }
 0x259   :  { %v6449_v33 = vadd.f32 %v3537_v25, %v3365_v15  ;;  %v3369_v12 = vadd.f32 %v3368_v8, %v6109_v63  ;;  %v3541_v47 = vpop.f32.mrf.mxu1 }
 0x25a   :  { %v3370_v24 = vpop.f32.mrf.mxu0 }
 0x25b   :  { %v6452_v49 = vadd.f32 %v3541_v47, %v3369_v12  ;;  %v3371_v6 = vadd.f32 %v3370_v24, %v6116_v46  ;;  %v3543_v54 = vpop.f32.mrf.mxu1 }
 0x25c   :  { %v3372_v27 = vpop.f32.mrf.mxu0 }
 0x25d   :  { %v6455_v57 = vadd.f32 %v3543_v54, %v3371_v6  ;;  %v3373_v30 = vadd.f32 %v3372_v27, %v6118_v50  ;;  %v3545_v51 = vpop.f32.mrf.mxu1 }
 0x25e   :  { %v3374_v34 = vpop.f32.mrf.mxu0 }
 0x25f   :  { %v6458_v53 = vadd.f32 %v3545_v51, %v3373_v30  ;;  %v3375_v60 = vadd.f32 %v3374_v34, %v6123_v61  ;;  %v3547_v19 = vpop.f32.mrf.mxu1 }
 0x260   :  { %v3378_v63 = vpop.f32.mrf.mxu0 }
 0x261   :  { %v6461_v16 = vadd.f32 %v3547_v19, %v3375_v60  ;;  %v3379_v3 = vadd.f32 %v3378_v63, %v6135_v10  ;;  %v3551_v26 = vpop.f32.mrf.mxu1 }
 0x262   :  { %v3380_v46 = vpop.f32.mrf.mxu0 }
 0x263   :  { %v6464_v35 = vadd.f32 %v3551_v26, %v3379_v3  ;;  %v3381_v7 = vadd.f32 %v3380_v46, %v6142_v21  ;;  %v3553_v59 = vpop.f32.mrf.mxu1 }
 0x264   :  { %v3382_v50 = vpop.f32.mrf.mxu0 }
 0x265   :  { %v6467_v43 = vadd.f32 %v3553_v59, %v3381_v7  ;;  %v3383_v15 = vadd.f32 %v3382_v50, %v6144_v41  ;;  %v3555_v25 = vpop.f32.mrf.mxu1 }
 0x266   :  { %v3384_v61 = vpop.f32.mrf.mxu0 }
 0x267   :  { %v6470_v8 = vadd.f32 %v3555_v25, %v3383_v15  ;;  %v3385_v12 = vadd.f32 %v3384_v61, %v6149_v36  ;;  %v3557_v47 = vpop.f32.mrf.mxu1 }
 0x268   :  { %v3388_v10 = vpop.f32.mrf.mxu0 }
 0x269   :  { %v6473_v24 = vadd.f32 %v3557_v47, %v3385_v12  ;;  %v3389_v6 = vadd.f32 %v3388_v10, %v6161_v62  ;;  %v3561_v54 = vpop.f32.mrf.mxu1 }
 0x26a   :  { %v3390_v21 = vpop.f32.mrf.mxu0 }
 0x26b   :  { %v6476_v27 = vadd.f32 %v3561_v54, %v3389_v6  ;;  %v3391_v30 = vadd.f32 %v3390_v21, %v6168_v42  ;;  %v3563_v51 = vpop.f32.mrf.mxu1 }
 0x26c   :  { %v3392_v41 = vpop.f32.mrf.mxu0 }
 0x26d   :  { %v6479_v34 = vadd.f32 %v3563_v51, %v3391_v30  ;;  %v3393_v60 = vadd.f32 %v3392_v41, %v6170_v55  ;;  %v3565_v19 = vpop.f32.mrf.mxu1 }
 0x26e   :  { %v3394_v36 = vpop.f32.mrf.mxu0 }
 0x26f   :  { %v6482_v63 = vadd.f32 %v3565_v19, %v3393_v60  ;;  %v3395_v3 = vadd.f32 %v3394_v36, %v6175_v9  ;;  %v3567_v26 = vpop.f32.mrf.mxu1 }
 0x270   :  { %v3398_v62 = vpop.f32.mrf.mxu0 }
 0x271   :  { %v6485_v46 = vadd.f32 %v3567_v26, %v3395_v3  ;;  %v3399_v7 = vadd.f32 %v3398_v62, %v6187_v20  ;;  %v3571_v59 = vpop.f32.mrf.mxu1 }
 0x272   :  { %v3400_v42 = vpop.f32.mrf.mxu0 }
 0x273   :  { %v6488_v50 = vadd.f32 %v3571_v59, %v3399_v7  ;;  %v3401_v15 = vadd.f32 %v3400_v42, %v6194_v31  ;;  %v3573_v25 = vpop.f32.mrf.mxu1 }
 0x274   :  { %v3402_v55 = vpop.f32.mrf.mxu0 }
 0x275   :  { %v6491_v61 = vadd.f32 %v3573_v25, %v3401_v15  ;;  %v3403_v12 = vadd.f32 %v3402_v55, %v6196_v39  ;;  %v3575_v47 = vpop.f32.mrf.mxu1 }
 0x276   :  { %v3404_v9 = vpop.f32.mrf.mxu0 }
 0x277   :  { %v6494_v10 = vadd.f32 %v3575_v47, %v3403_v12  ;;  %v3405_v6 = vadd.f32 %v3404_v9, %v6201_v23  ;;  %v3577_v54 = vpop.f32.mrf.mxu1 }
 0x278   :  { %v3408_v20 = vpop.f32.mrf.mxu0 }
 0x279   :  { %v6497_v21 = vadd.f32 %v3577_v54, %v3405_v6  ;;  %v3409_v30 = vadd.f32 %v3408_v20, %v6213_v58  ;;  %v3581_v51 = vpop.f32.mrf.mxu1 }
 0x27a   :  { %v3410_v31 = vpop.f32.mrf.mxu0 }
 0x27b   :  { %v6500_v41 = vadd.f32 %v3581_v51, %v3409_v30  ;;  %v3411_v60 = vadd.f32 %v3410_v31, %v6220_v17  ;;  %v3583_v19 = vpop.f32.mrf.mxu1 }
 0x27c   :  { %v3412_v39 = vpop.f32.mrf.mxu0 }
 0x27d   :  { %v6503_v36 = vadd.f32 %v3583_v19, %v3411_v60  ;;  %v3413_v3 = vadd.f32 %v3412_v39, %v6222_v22  ;;  %v3585_v26 = vpop.f32.mrf.mxu1  ;;  %v6848_v60 = vld [vmem:[#allocation2_spill] sm:$0xff] }
 0x27e   :  { %v3414_v23 = vpop.f32.mrf.mxu0 }
 0x27f   :  { %v6506_v62 = vadd.f32 %v3585_v26, %v3413_v3  ;;  %v3415_v7 = vadd.f32 %v3414_v23, %v6227_v40  ;;  %v3587_v59 = vpop.f32.mrf.mxu1  ;;  %v6849_v26 = vld [vmem:[#allocation3_spill] sm:$0xff] }
 0x280   :  { %v3418_v58 = vpop.f32.mrf.mxu0 }
 0x281   :  { %v6509_v42 = vadd.f32 %v3587_v59, %v3415_v7  ;;  %v3419_v15 = vadd.f32 %v3418_v58, %v6239_v45  ;;  %v3591_v25 = vpop.f32.mrf.mxu1  ;;  %v6850_v58 = vld [vmem:[#allocation4_spill] sm:$0xff] }
 0x282   :  { %v3420_v17 = vpop.f32.mrf.mxu0 }
 0x283   :  { %v6512_v55 = vadd.f32 %v3591_v25, %v3419_v15  ;;  %v3421_v12 = vadd.f32 %v3420_v17, %v6246_v5  ;;  %v3593_v47 = vpop.f32.mrf.mxu1 }
 0x284   :  { %v3422_v22 = vpop.f32.mrf.mxu0 }
 0x285   :  { %v6515_v9 = vadd.f32 %v3593_v47, %v3421_v12  ;;  %v3423_v6 = vadd.f32 %v3422_v22, %v6248_v18  ;;  %v3595_v54 = vpop.f32.mrf.mxu1  ;;  %v6851_v12 = vld [vmem:[#allocation5_spill] sm:$0xff] }
 0x286   :  { %v3424_v40 = vpop.f32.mrf.mxu0 }
 0x287   :  { %v6518_v20 = vadd.f32 %v3595_v54, %v3423_v6  ;;  %v3425_v30 = vadd.f32 %v3424_v40, %v6253_v38  ;;  %v3597_v51 = vpop.f32.mrf.mxu1  ;;  %v6852_v40 = vld [vmem:[#allocation6_spill] sm:$0xff] }
 0x288   :  { %v3428_v45 = vpop.f32.mrf.mxu0 }
 0x289   :  { %v6521_v31 = vadd.f32 %v3597_v51, %v3425_v30  ;;  %v3429_v19 = vadd.f32 %v3428_v45, %v6848_v60  ;;  %v3601_v39 = vpop.f32.mrf.mxu1 }
 0x28a   :  { %v3430_v5 = vpop.f32.mrf.mxu0 }
 0x28b   :  { %v6524_v3 = vadd.f32 %v3601_v39, %v3429_v19  ;;  %v3431_v23 = vadd.f32 %v3430_v5, %v6849_v26  ;;  %v3603_v7 = vpop.f32.mrf.mxu1  ;;  %v6853_v19 = vld [vmem:[#allocation7_spill] sm:$0xff] }
 0x28c   :  { %v3432_v18 = vpop.f32.mrf.mxu0 }
 0x28d   :  { %v6527_v59 = vadd.f32 %v3603_v7, %v3431_v23  ;;  %v3433_v15 = vadd.f32 %v3432_v18, %v6850_v58  ;;  %v3605_v25 = vpop.f32.mrf.mxu1  ;;  %v6855_v7 = vld [vmem:[#allocation8_spill] sm:$0xff] }
 0x28e   :  { %v3434_v38 = vpop.f32.mrf.mxu0 }
 0x28f   :  { %v6530_v17 = vadd.f32 %v3605_v25, %v3433_v15  ;;  %v3435_v47 = vadd.f32 %v3434_v38, %v6851_v12  ;;  %v3607_v22 = vpop.f32.mrf.mxu1  ;;  %v6857_v38 = vld [vmem:[#allocation9_spill] sm:$0xff] }
 0x290   :  { %v3438_v6 = vpop.f32.mrf.mxu0 }
 0x291   :  { %v6533_v54 = vadd.f32 %v3607_v22, %v3435_v47  ;;  %v3439_v30 = vadd.f32 %v3438_v6, %v6852_v40  ;;  %v3611_v51 = vpop.f32.mrf.mxu1  ;;  %v6859_v40 = vld [vmem:[#allocation10_spill] sm:$0xff] }
 0x292   :  { %v3440_v45 = vpop.f32.mrf.mxu0 }
 0x293   :  { %v6536_v60 = vadd.f32 %v3611_v51, %v3439_v30  ;;  %v3441_v39 = vadd.f32 %v3440_v45, %v6853_v19  ;;  %v3613_v5 = vpop.f32.mrf.mxu1 }
 0x294   :  { %v3442_v26 = vpop.f32.mrf.mxu0 }
 0x295   :  { %v6539_v23 = vadd.f32 %v3613_v5, %v3441_v39  ;;  %v3443_v18 = vadd.f32 %v3442_v26, %v6855_v7  ;;  %v3615_v58 = vpop.f32.mrf.mxu1  ;;  %v6861_v39 = vld [vmem:[#allocation11_spill] sm:$0xff] }
 0x296   :  { %v3444_v15 = vpop.f32.mrf.mxu0 }
 0x297   :  { %6854 = vst [vmem:[#allocation2_spill] sm:$0xff] %v6539_v23  ;;  %v6542_v25 = vadd.f32 %v3615_v58, %v3443_v18  ;;  %v3445_v12 = vadd.f32 %v3444_v15, %v6857_v38  ;;  %v3617_v47 = vpop.f32.mrf.mxu1  ;;  %v6863_v18 = vld [vmem:[#allocation12_spill] sm:$0xff] }
 0x298   :  { %v3448_v22 = vpop.f32.mrf.mxu0 }
 0x299   :  { %6856 = vst [vmem:[#allocation3_spill] sm:$0xff] %v6542_v25  ;;  %v6545_v6 = vadd.f32 %v3617_v47, %v3445_v12  ;;  %v3449_v30 = vadd.f32 %v3448_v22, %v6859_v40  ;;  %v3621_v51 = vpop.f32.mrf.mxu1  ;;  %v6865_v12 = vld [vmem:[#allocation13_spill] sm:$0xff] }
 0x29a   :  { %v3450_v45 = vpop.f32.mrf.mxu0 }
 0x29b   :  { %6858 = vst [vmem:[#allocation4_spill] sm:$0xff] %v6545_v6  ;;  %v6548_v19 = vadd.f32 %v3621_v51, %v3449_v30  ;;  %v3451_v5 = vadd.f32 %v3450_v45, %v6861_v39  ;;  %v3623_v23 = vpop.f32.mrf.mxu1  ;;  %v6867_v30 = vld [vmem:[#allocation14_spill] sm:$0xff] }
 0x29c   :  { %v3452_v26 = vpop.f32.mrf.mxu0 }
 0x29d   :  { %6860 = vst [vmem:[#allocation5_spill] sm:$0xff] %v6548_v19  ;;  %v6551_v7 = vadd.f32 %v3623_v23, %v3451_v5  ;;  %v3453_v58 = vadd.f32 %v3452_v26, %v6863_v18  ;;  %v3625_v25 = vpop.f32.mrf.mxu1  ;;  %v6868_v23 = vld [vmem:[#allocation15_spill] sm:$0xff] }
 0x29e   :  { %v3454_v15 = vpop.f32.mrf.mxu0 }
 0x29f   :  { %6862 = vst [vmem:[#allocation6_spill] sm:$0xff] %v6551_v7  ;;  %v6554_v38 = vadd.f32 %v3625_v25, %v3453_v58  ;;  %v3455_v47 = vadd.f32 %v3454_v15, %v6865_v12  ;;  %v3627_v6 = vpop.f32.mrf.mxu1  ;;  %v6869_v25 = vld [vmem:[#allocation16_spill] sm:$0xff] }
 0x2a0   :  { %v3458_v22 = vpop.f32.mrf.mxu0 }
 0x2a1   :  { %6864 = vst [vmem:[#allocation7_spill] sm:$0xff] %v6554_v38  ;;  %v6557_v40 = vadd.f32 %v3627_v6, %v3455_v47  ;;  %v3459_v51 = vadd.f32 %v3458_v22, %v6867_v30  ;;  %v3631_v19 = vpop.f32.mrf.mxu1  ;;  %v6870_v6 = vld [vmem:[#allocation17_spill] sm:$0xff] }
 0x2a2   :  { %v3460_v45 = vpop.f32.mrf.mxu0 }
 0x2a3   :  { %6866 = vst [vmem:[#allocation8_spill] sm:$0xff] %v6557_v40  ;;  %v6560_v39 = vadd.f32 %v3631_v19, %v3459_v51  ;;  %v3461_v5 = vadd.f32 %v3460_v45, %v6868_v23  ;;  %v3633_v7 = vpop.f32.mrf.mxu1 }
 0x2a4   :  { %v3462_v26 = vpop.f32.mrf.mxu0 }
 0x2a5   :  { %v6563_v18 = vadd.f32 %v3633_v7, %v3461_v5  ;;  %v3463_v58 = vadd.f32 %v3462_v26, %v6869_v25  ;;  %v3635_v38 = vpop.f32.mrf.mxu1 }
 0x2a6   :  { %v3464_v15 = vpop.f32.mrf.mxu0 }
 0x2a7   :  { %v6566_v12 = vadd.f32 %v3635_v38, %v3463_v58  ;;  %v3465_v47 = vadd.f32 %v3464_v15, %v6870_v6  ;;  %v3637_v40 = vpop.f32.mrf.mxu1 }
 0x2a8   :  { %v3674_v22 = vpop.f32.mrf.mxu0 }
 0x2a9   :  { %v6569_v30 = vadd.f32 %v3637_v40, %v3465_v47  ;;  %v3675_v19 = vadd.f32 %v3674_v22, %v6373_v28  ;;  %v3847_v51 = vpop.f32.mrf.mxu1 }
 0x2aa   :  { %v3676_v45 = vpop.f32.mrf.mxu0 }
 0x2ab   :  { %v3848_v23 = vadd.f32 %v3847_v51, %v3675_v19  ;;  %v3677_v7 = vadd.f32 %v3676_v45, %v6378_v13  ;;  %v3849_v5 = vpop.f32.mrf.mxu1 }
 0x2ac   :  { %v3678_v26 = vpop.f32.mrf.mxu0 }
 0x2ad   :  { %3986 = vst [vmem:[%s6828_s5] sm:$0xff] %v3848_v23  ;;  %v3850_v38 = vadd.f32 %v3849_v5, %v3677_v7  ;;  %v3679_v25 = vadd.f32 %v3678_v26, %v6381_v37  ;;  %v3851_v58 = vpop.f32.mrf.mxu1 }
 0x2ae   :  { %v3680_v40 = vpop.f32.mrf.mxu0 }
 0x2af   :  { %3988 = vst.msk [vmem:[%s6828_s5 + $0x8] sm:$0xff] %vm3987_vm4, %v3850_v38  ;;  %v3852_v28 = vadd.f32 %v3851_v58, %v3679_v25  ;;  %v3681_v13 = vadd.f32 %v3680_v40, %v6396_v29  ;;  %v3853_v15 = vpop.f32.mrf.mxu1 }
 0x2b0   :  { %v3684_v6 = vpop.f32.mrf.mxu0 }
 0x2b1   :  { %3989 = vst [vmem:[%s6828_s5 + $0x10] sm:$0xff] %v3852_v28  ;;  %v3854_v47 = vadd.f32 %v3853_v15, %v3681_v13  ;;  %v3685_v22 = vadd.f32 %v3684_v6, %v6403_v44  ;;  %v3857_v37 = vpop.f32.mrf.mxu1 }
 0x2b2   :  { %v3686_v19 = vpop.f32.mrf.mxu0 }
 0x2b3   :  { %3990 = vst.msk [vmem:[%s6828_s5 + $0x18] sm:$0xff] %vm3987_vm4, %v3854_v47  ;;  %v3858_v51 = vadd.f32 %v3857_v37, %v3685_v22  ;;  %v3687_v45 = vadd.f32 %v3686_v19, %v6408_v48  ;;  %v3859_v29 = vpop.f32.mrf.mxu1 }
 0x2b4   :  { %v3688_v23 = vpop.f32.mrf.mxu0 }
 0x2b5   :  { %3991 = vst [vmem:[%s6828_s5 + $0x20] sm:$0xff] %v3858_v51  ;;  %v3860_v7 = vadd.f32 %v3859_v29, %v3687_v45  ;;  %v3689_v5 = vadd.f32 %v3688_v23, %v6411_v52  ;;  %v3861_v44 = vpop.f32.mrf.mxu1 }
 0x2b6   :  { %v3690_v26 = vpop.f32.mrf.mxu0 }
 0x2b7   :  { %3992 = vst.msk [vmem:[%s6828_s5 + $0x28] sm:$0xff] %vm3987_vm4, %v3860_v7  ;;  %v3862_v38 = vadd.f32 %v3861_v44, %v3689_v5  ;;  %v3691_v25 = vadd.f32 %v3690_v26, %v6420_v11  ;;  %v3863_v48 = vpop.f32.mrf.mxu1 }
 0x2b8   :  { %v3694_v58 = vpop.f32.mrf.mxu0 }
 0x2b9   :  { %3993 = vst [vmem:[%s6828_s5 + $0x30] sm:$0xff] %v3862_v38  ;;  %v3864_v40 = vadd.f32 %v3863_v48, %v3691_v25  ;;  %v3695_v28 = vadd.f32 %v3694_v58, %v6425_v4  ;;  %v3867_v52 = vpop.f32.mrf.mxu1 }
 0x2ba   :  { %v3696_v13 = vpop.f32.mrf.mxu0 }
 0x2bb   :  { %3994 = vst.msk [vmem:[%s6828_s5 + $0x38] sm:$0xff] %vm3987_vm4, %v3864_v40  ;;  %v3868_v15 = vadd.f32 %v3867_v52, %v3695_v28  ;;  %v3697_v6 = vadd.f32 %v3696_v13, %v6430_v14  ;;  %v3869_v11 = vpop.f32.mrf.mxu1 }
 0x2bc   :  { %v3698_v47 = vpop.f32.mrf.mxu0 }
 0x2bd   :  { %3995 = vst [vmem:[%s6828_s5 + $0x40] sm:$0xff] %v3868_v15  ;;  %v3870_v22 = vadd.f32 %v3869_v11, %v3697_v6  ;;  %v3699_v37 = vadd.f32 %v3698_v47, %v6433_v2  ;;  %v3871_v4 = vpop.f32.mrf.mxu1 }
 0x2be   :  { %v3700_v19 = vpop.f32.mrf.mxu0 }
 0x2bf   :  { %3996 = vst.msk [vmem:[%s6828_s5 + $0x48] sm:$0xff] %vm3987_vm4, %v3870_v22  ;;  %v3872_v51 = vadd.f32 %v3871_v4, %v3699_v37  ;;  %v3701_v45 = vadd.f32 %v3700_v19, %v6436_v32  ;;  %v3873_v14 = vpop.f32.mrf.mxu1 }
 0x2c0   :  { %v3704_v29 = vpop.f32.mrf.mxu0 }
 0x2c1   :  { %3997 = vst [vmem:[%s6828_s5 + $0x50] sm:$0xff] %v3872_v51  ;;  %v3874_v23 = vadd.f32 %v3873_v14, %v3701_v45  ;;  %v3705_v7 = vadd.f32 %v3704_v29, %v6440_v56  ;;  %v3877_v2 = vpop.f32.mrf.mxu1 }
 0x2c2   :  { %v3706_v5 = vpop.f32.mrf.mxu0 }
 0x2c3   :  { %3998 = vst.msk [vmem:[%s6828_s5 + $0x58] sm:$0xff] %vm3987_vm4, %v3874_v23  ;;  %v3878_v44 = vadd.f32 %v3877_v2, %v3705_v7  ;;  %v3707_v26 = vadd.f32 %v3706_v5, %v6443_v1  ;;  %v3879_v32 = vpop.f32.mrf.mxu1 }
 0x2c4   :  { %v3708_v38 = vpop.f32.mrf.mxu0 }
 0x2c5   :  { %3999 = vst [vmem:[%s6828_s5 + $0x60] sm:$0xff] %v3878_v44  ;;  %v3880_v25 = vadd.f32 %v3879_v32, %v3707_v26  ;;  %v3709_v48 = vadd.f32 %v3708_v38, %v6446_v0  ;;  %v3881_v56 = vpop.f32.mrf.mxu1 }
 0x2c6   :  { %v3710_v58 = vpop.f32.mrf.mxu0 }
 0x2c7   :  { %4000 = vst.msk [vmem:[%s6828_s5 + $0x68] sm:$0xff] %vm3987_vm4, %v3880_v25  ;;  %v3882_v40 = vadd.f32 %v3881_v56, %v3709_v48  ;;  %v3711_v28 = vadd.f32 %v3710_v58, %v6449_v33  ;;  %v3883_v1 = vpop.f32.mrf.mxu1 }
 0x2c8   :  { %v3714_v52 = vpop.f32.mrf.mxu0 }
 0x2c9   :  { %4001 = vst [vmem:[%s6828_s5 + $0x70] sm:$0xff] %v3882_v40  ;;  %v3884_v13 = vadd.f32 %v3883_v1, %v3711_v28  ;;  %v3715_v15 = vadd.f32 %v3714_v52, %v6452_v49  ;;  %v3887_v0 = vpop.f32.mrf.mxu1 }
 0x2ca   :  { %v3716_v6 = vpop.f32.mrf.mxu0 }
 0x2cb   :  { %4002 = vst.msk [vmem:[%s6828_s5 + $0x78] sm:$0xff] %vm3987_vm4, %v3884_v13  ;;  %v3888_v11 = vadd.f32 %v3887_v0, %v3715_v15  ;;  %v3717_v47 = vadd.f32 %v3716_v6, %v6455_v57  ;;  %v3889_v33 = vpop.f32.mrf.mxu1 }
 0x2cc   :  { %v3718_v22 = vpop.f32.mrf.mxu0 }
 0x2cd   :  { %4003 = vst [vmem:[%s6828_s5 + $0x80] sm:$0xff] %v3888_v11  ;;  %v3890_v37 = vadd.f32 %v3889_v33, %v3717_v47  ;;  %v3719_v4 = vadd.f32 %v3718_v22, %v6458_v53  ;;  %v3891_v49 = vpop.f32.mrf.mxu1 }
 0x2ce   :  { %v3720_v19 = vpop.f32.mrf.mxu0 }
 0x2cf   :  { %4004 = vst.msk [vmem:[%s6828_s5 + $0x88] sm:$0xff] %vm3987_vm4, %v3890_v37  ;;  %v3892_v51 = vadd.f32 %v3891_v49, %v3719_v4  ;;  %v3721_v45 = vadd.f32 %v3720_v19, %v6461_v16  ;;  %v3893_v57 = vpop.f32.mrf.mxu1 }
 0x2d0   :  { %v3724_v14 = vpop.f32.mrf.mxu0 }
 0x2d1   :  { %4005 = vst [vmem:[%s6828_s5 + $0x90] sm:$0xff] %v3892_v51  ;;  %v3894_v29 = vadd.f32 %v3893_v57, %v3721_v45  ;;  %v3725_v23 = vadd.f32 %v3724_v14, %v6464_v35  ;;  %v3897_v53 = vpop.f32.mrf.mxu1 }
 0x2d2   :  { %v3726_v7 = vpop.f32.mrf.mxu0 }
 0x2d3   :  { %4006 = vst.msk [vmem:[%s6828_s5 + $0x98] sm:$0xff] %vm3987_vm4, %v3894_v29  ;;  %v3898_v2 = vadd.f32 %v3897_v53, %v3725_v23  ;;  %v3727_v5 = vadd.f32 %v3726_v7, %v6467_v43  ;;  %v3899_v16 = vpop.f32.mrf.mxu1 }
 0x2d4   :  { %v3728_v44 = vpop.f32.mrf.mxu0 }
 0x2d5   :  { %4007 = vst [vmem:[%s6828_s5 + $0xa0] sm:$0xff] %v3898_v2  ;;  %v3900_v26 = vadd.f32 %v3899_v16, %v3727_v5  ;;  %v3729_v32 = vadd.f32 %v3728_v44, %v6470_v8  ;;  %v3901_v35 = vpop.f32.mrf.mxu1 }
 0x2d6   :  { %v3730_v38 = vpop.f32.mrf.mxu0 }
 0x2d7   :  { %4008 = vst.msk [vmem:[%s6828_s5 + $0xa8] sm:$0xff] %vm3987_vm4, %v3900_v26  ;;  %v3902_v25 = vadd.f32 %v3901_v35, %v3729_v32  ;;  %v3731_v48 = vadd.f32 %v3730_v38, %v6473_v24  ;;  %v3903_v43 = vpop.f32.mrf.mxu1 }
 0x2d8   :  { %v3734_v56 = vpop.f32.mrf.mxu0 }
 0x2d9   :  { %4009 = vst [vmem:[%s6828_s5 + $0xb0] sm:$0xff] %v3902_v25  ;;  %v3904_v58 = vadd.f32 %v3903_v43, %v3731_v48  ;;  %v3735_v40 = vadd.f32 %v3734_v56, %v6476_v27  ;;  %v3907_v8 = vpop.f32.mrf.mxu1 }
 0x2da   :  { %v3736_v28 = vpop.f32.mrf.mxu0 }
 0x2db   :  { %4010 = vst.msk [vmem:[%s6828_s5 + $0xb8] sm:$0xff] %vm3987_vm4, %v3904_v58  ;;  %v3908_v1 = vadd.f32 %v3907_v8, %v3735_v40  ;;  %v3737_v52 = vadd.f32 %v3736_v28, %v6479_v34  ;;  %v3909_v24 = vpop.f32.mrf.mxu1 }
 0x2dc   :  { %v3738_v13 = vpop.f32.mrf.mxu0 }
 0x2dd   :  { %4011 = vst [vmem:[%s6828_s5 + $0xc0] sm:$0xff] %v3908_v1  ;;  %v3910_v15 = vadd.f32 %v3909_v24, %v3737_v52  ;;  %v3739_v0 = vadd.f32 %v3738_v13, %v6482_v63  ;;  %v3911_v27 = vpop.f32.mrf.mxu1 }
 0x2de   :  { %v3740_v6 = vpop.f32.mrf.mxu0 }
 0x2df   :  { %4012 = vst.msk [vmem:[%s6828_s5 + $0xc8] sm:$0xff] %vm3987_vm4, %v3910_v15  ;;  %v3912_v11 = vadd.f32 %v3911_v27, %v3739_v0  ;;  %v3741_v47 = vadd.f32 %v3740_v6, %v6485_v46  ;;  %v3913_v34 = vpop.f32.mrf.mxu1 }
 0x2e0   :  { %v3744_v33 = vpop.f32.mrf.mxu0 }
 0x2e1   :  { %4013 = vst [vmem:[%s6828_s5 + $0xd0] sm:$0xff] %v3912_v11  ;;  %v3914_v22 = vadd.f32 %v3913_v34, %v3741_v47  ;;  %v3745_v37 = vadd.f32 %v3744_v33, %v6488_v50  ;;  %v3917_v63 = vpop.f32.mrf.mxu1 }
 0x2e2   :  { %v3746_v4 = vpop.f32.mrf.mxu0 }
 0x2e3   :  { %4014 = vst.msk [vmem:[%s6828_s5 + $0xd8] sm:$0xff] %vm3987_vm4, %v3914_v22  ;;  %v3918_v49 = vadd.f32 %v3917_v63, %v3745_v37  ;;  %v3747_v19 = vadd.f32 %v3746_v4, %v6491_v61  ;;  %v3919_v46 = vpop.f32.mrf.mxu1 }
 0x2e4   :  { %v3748_v51 = vpop.f32.mrf.mxu0 }
 0x2e5   :  { %4015 = vst [vmem:[%s6828_s5 + $0xe0] sm:$0xff] %v3918_v49  ;;  %v3920_v45 = vadd.f32 %v3919_v46, %v3747_v19  ;;  %v3749_v57 = vadd.f32 %v3748_v51, %v6494_v10  ;;  %v3921_v50 = vpop.f32.mrf.mxu1 }
 0x2e6   :  { %v3750_v14 = vpop.f32.mrf.mxu0 }
 0x2e7   :  { %4016 = vst.msk [vmem:[%s6828_s5 + $0xe8] sm:$0xff] %vm3987_vm4, %v3920_v45  ;;  %v3922_v29 = vadd.f32 %v3921_v50, %v3749_v57  ;;  %v3751_v23 = vadd.f32 %v3750_v14, %v6497_v21  ;;  %v3923_v61 = vpop.f32.mrf.mxu1  ;;  %v6871_v14 = vld [vmem:[#allocation2_spill] sm:$0xff] }
 0x2e8   :  { %v3754_v53 = vpop.f32.mrf.mxu0 }
 0x2e9   :  { %4017 = vst [vmem:[%s6828_s5 + $0xf0] sm:$0xff] %v3922_v29  ;;  %v3924_v7 = vadd.f32 %v3923_v61, %v3751_v23  ;;  %v3755_v2 = vadd.f32 %v3754_v53, %v6500_v41  ;;  %v3927_v10 = vpop.f32.mrf.mxu1  ;;  %v6872_v53 = vld [vmem:[#allocation3_spill] sm:$0xff] }
 0x2ea   :  { %v3756_v5 = vpop.f32.mrf.mxu0 }
 0x2eb   :  { %4018 = vst.msk [vmem:[%s6828_s5 + $0xf8] sm:$0xff] %vm3987_vm4, %v3924_v7  ;;  %v3928_v16 = vadd.f32 %v3927_v10, %v3755_v2  ;;  %v3757_v44 = vadd.f32 %v3756_v5, %v6503_v36  ;;  %v3929_v21 = vpop.f32.mrf.mxu1  ;;  %v6873_v5 = vld [vmem:[#allocation4_spill] sm:$0xff] }
 0x2ec   :  { %v3758_v26 = vpop.f32.mrf.mxu0 }
 0x2ed   :  { %4019 = vst [vmem:[%s6828_s5 + $0x100] sm:$0xff] %v3928_v16  ;;  %v3930_v32 = vadd.f32 %v3929_v21, %v3757_v44  ;;  %v3759_v35 = vadd.f32 %v3758_v26, %v6506_v62  ;;  %v3931_v41 = vpop.f32.mrf.mxu1 }
 0x2ee   :  { %v3760_v38 = vpop.f32.mrf.mxu0 }
 0x2ef   :  { %4020 = vst.msk [vmem:[%s6828_s5 + $0x108] sm:$0xff] %vm3987_vm4, %v3930_v32  ;;  %v3932_v25 = vadd.f32 %v3931_v41, %v3759_v35  ;;  %v3761_v48 = vadd.f32 %v3760_v38, %v6509_v42  ;;  %v3933_v36 = vpop.f32.mrf.mxu1  ;;  %v6874_v32 = vld [vmem:[#allocation5_spill] sm:$0xff] }
 0x2f0   :  { %v3764_v43 = vpop.f32.mrf.mxu0 }
 0x2f1   :  { %4021 = vst [vmem:[%s6828_s5 + $0x110] sm:$0xff] %v3932_v25  ;;  %v3934_v56 = vadd.f32 %v3933_v36, %v3761_v48  ;;  %v3765_v58 = vadd.f32 %v3764_v43, %v6512_v55  ;;  %v3937_v62 = vpop.f32.mrf.mxu1  ;;  %v6875_v48 = vld [vmem:[#allocation6_spill] sm:$0xff] }
 0x2f2   :  { %v3766_v40 = vpop.f32.mrf.mxu0 }
 0x2f3   :  { %4022 = vst.msk [vmem:[%s6828_s5 + $0x118] sm:$0xff] %vm3987_vm4, %v3934_v56  ;;  %v3938_v8 = vadd.f32 %v3937_v62, %v3765_v58  ;;  %v3767_v28 = vadd.f32 %v3766_v40, %v6515_v9  ;;  %v3939_v42 = vpop.f32.mrf.mxu1  ;;  %v6876_v62 = vld [vmem:[#allocation7_spill] sm:$0xff] }
 0x2f4   :  { %v3768_v1 = vpop.f32.mrf.mxu0 }
 0x2f5   :  { %4023 = vst [vmem:[%s6828_s5 + $0x120] sm:$0xff] %v3938_v8  ;;  %v3940_v52 = vadd.f32 %v3939_v42, %v3767_v28  ;;  %v3769_v24 = vadd.f32 %v3768_v1, %v6518_v20  ;;  %v3941_v55 = vpop.f32.mrf.mxu1  ;;  %v6877_v1 = vld [vmem:[#allocation8_spill] sm:$0xff] }
 0x2f6   :  { %v3770_v13 = vpop.f32.mrf.mxu0 }
 0x2f7   :  { %4024 = vst.msk [vmem:[%s6828_s5 + $0x128] sm:$0xff] %vm3987_vm4, %v3940_v52  ;;  %v3942_v15 = vadd.f32 %v3941_v55, %v3769_v24  ;;  %v3771_v0 = vadd.f32 %v3770_v13, %v6521_v31  ;;  %v3943_v9 = vpop.f32.mrf.mxu1 }
 0x2f8   :  { %v3774_v27 = vpop.f32.mrf.mxu0 }
 0x2f9   :  { %4025 = vst [vmem:[%s6828_s5 + $0x130] sm:$0xff] %v3942_v15  ;;  %v3944_v6 = vadd.f32 %v3943_v9, %v3771_v0  ;;  %v3775_v11 = vadd.f32 %v3774_v27, %v6524_v3  ;;  %v3947_v20 = vpop.f32.mrf.mxu1 }
 0x2fa   :  { %v3776_v47 = vpop.f32.mrf.mxu0 }
 0x2fb   :  { %4026 = vst.msk [vmem:[%s6828_s5 + $0x138] sm:$0xff] %vm3987_vm4, %v3944_v6  ;;  %v3948_v34 = vadd.f32 %v3947_v20, %v3775_v11  ;;  %v3777_v33 = vadd.f32 %v3776_v47, %v6527_v59  ;;  %v3949_v31 = vpop.f32.mrf.mxu1 }
 0x2fc   :  { %v3778_v22 = vpop.f32.mrf.mxu0 }
 0x2fd   :  { %4027 = vst [vmem:[%s6828_s5 + $0x140] sm:$0xff] %v3948_v34  ;;  %v3950_v37 = vadd.f32 %v3949_v31, %v3777_v33  ;;  %v3779_v63 = vadd.f32 %v3778_v22, %v6530_v17  ;;  %v3951_v3 = vpop.f32.mrf.mxu1 }
 0x2fe   :  { %v3780_v4 = vpop.f32.mrf.mxu0 }
 0x2ff   :  { %4028 = vst.msk [vmem:[%s6828_s5 + $0x148] sm:$0xff] %vm3987_vm4, %v3950_v37  ;;  %v3952_v49 = vadd.f32 %v3951_v3, %v3779_v63  ;;  %v3781_v19 = vadd.f32 %v3780_v4, %v6533_v54  ;;  %v3953_v59 = vpop.f32.mrf.mxu1 }
 0x300   :  { %v3784_v46 = vpop.f32.mrf.mxu0 }
 0x301   :  { %4029 = vst [vmem:[%s6828_s5 + $0x150] sm:$0xff] %v3952_v49  ;;  %v3954_v51 = vadd.f32 %v3953_v59, %v3781_v19  ;;  %v3785_v45 = vadd.f32 %v3784_v46, %v6536_v60  ;;  %v3957_v17 = vpop.f32.mrf.mxu1 }
 0x302   :  { %v3786_v57 = vpop.f32.mrf.mxu0 }
 0x303   :  { %4030 = vst.msk [vmem:[%s6828_s5 + $0x158] sm:$0xff] %vm3987_vm4, %v3954_v51  ;;  %v3958_v50 = vadd.f32 %v3957_v17, %v3785_v45  ;;  %v3787_v29 = vadd.f32 %v3786_v57, %v6871_v14  ;;  %v3959_v54 = vpop.f32.mrf.mxu1 }
 0x304   :  { %v3788_v23 = vpop.f32.mrf.mxu0 }
 0x305   :  { %4031 = vst [vmem:[%s6828_s5 + $0x160] sm:$0xff] %v3958_v50  ;;  %v3960_v61 = vadd.f32 %v3959_v54, %v3787_v29  ;;  %v3789_v7 = vadd.f32 %v3788_v23, %v6872_v53  ;;  %v3961_v60 = vpop.f32.mrf.mxu1 }
 0x306   :  { %v3790_v2 = vpop.f32.mrf.mxu0 }
 0x307   :  { %4032 = vst.msk [vmem:[%s6828_s5 + $0x168] sm:$0xff] %vm3987_vm4, %v3960_v61  ;;  %v3962_v10 = vadd.f32 %v3961_v60, %v3789_v7  ;;  %v3791_v16 = vadd.f32 %v3790_v2, %v6873_v5  ;;  %v3963_v44 = vpop.f32.mrf.mxu1 }
 0x308   :  { %v3794_v21 = vpop.f32.mrf.mxu0 }
 0x309   :  { %4033 = vst [vmem:[%s6828_s5 + $0x170] sm:$0xff] %v3962_v10  ;;  %v3964_v26 = vadd.f32 %v3963_v44, %v3791_v16  ;;  %v3795_v35 = vadd.f32 %v3794_v21, %v6874_v32  ;;  %v3967_v41 = vpop.f32.mrf.mxu1 }
 0x30a   :  { %v3796_v38 = vpop.f32.mrf.mxu0 }
 0x30b   :  { %4034 = vst.msk [vmem:[%s6828_s5 + $0x178] sm:$0xff] %vm3987_vm4, %v3964_v26  ;;  %v3968_v25 = vadd.f32 %v3967_v41, %v3795_v35  ;;  %v3797_v36 = vadd.f32 %v3796_v38, %v6875_v48  ;;  %v3969_v43 = vpop.f32.mrf.mxu1 }
 0x30c   :  { %v3798_v56 = vpop.f32.mrf.mxu0 }
 0x30d   :  { %4035 = vst [vmem:[%s6828_s5 + $0x180] sm:$0xff] %v3968_v25  ;;  %v3970_v58 = vadd.f32 %v3969_v43, %v3797_v36  ;;  %v3799_v40 = vadd.f32 %v3798_v56, %v6876_v62  ;;  %v3971_v8 = vpop.f32.mrf.mxu1 }
 0x30e   :  { %v3800_v28 = vpop.f32.mrf.mxu0 }
 0x30f   :  { %4036 = vst.msk [vmem:[%s6828_s5 + $0x188] sm:$0xff] %vm3987_vm4, %v3970_v58  ;;  %v3972_v42 = vadd.f32 %v3971_v8, %v3799_v40  ;;  %v3801_v52 = vadd.f32 %v3800_v28, %v6877_v1  ;;  %v3973_v24 = vpop.f32.mrf.mxu1 }
 0x310   :  { %v3804_v55 = vpop.f32.mrf.mxu0 }
 0x311   :  { %4037 = vst [vmem:[%s6828_s5 + $0x190] sm:$0xff] %v3972_v42  ;;  %v3974_v13 = vadd.f32 %v3973_v24, %v3801_v52  ;;  %v3805_v15 = vadd.f32 %v3804_v55, %v6560_v39  ;;  %v3977_v0 = vpop.f32.mrf.mxu1 }
 0x312   :  { %v3806_v9 = vpop.f32.mrf.mxu0 }
 0x313   :  { %4038 = vst.msk [vmem:[%s6828_s5 + $0x198] sm:$0xff] %vm3987_vm4, %v3974_v13  ;;  %v3978_v27 = vadd.f32 %v3977_v0, %v3805_v15  ;;  %v3807_v6 = vadd.f32 %v3806_v9, %v6563_v18  ;;  %v3979_v11 = vpop.f32.mrf.mxu1 }
 0x314   :  { %v3808_v20 = vpop.f32.mrf.mxu0 }
 0x315   :  { %4039 = vst [vmem:[%s6828_s5 + $0x1a0] sm:$0xff] %v3978_v27  ;;  %v3980_v47 = vadd.f32 %v3979_v11, %v3807_v6  ;;  %v3809_v34 = vadd.f32 %v3808_v20, %v6566_v12  ;;  %v3981_v39 = vpop.f32.mrf.mxu1 }
 0x316   :  { %v3810_v33 = vpop.f32.mrf.mxu0 }
 0x317   :  { %4040 = vst.msk [vmem:[%s6828_s5 + $0x1a8] sm:$0xff] %vm3987_vm4, %v3980_v47  ;;  %v3982_v31 = vadd.f32 %v3981_v39, %v3809_v34  ;;  %v3811_v22 = vadd.f32 %v3810_v33, %v6569_v30  ;;  %v3983_v18 = vpop.f32.mrf.mxu1 }
 0x319   :  { %4041 = vst [vmem:[%s6828_s5 + $0x1b0] sm:$0xff] %v3982_v31  ;;  %v3984_v37 = vadd.f32 %v3983_v18, %v3811_v22 }
 0x31b   :  { %4042 = vst.msk [vmem:[%s6828_s5 + $0x1b8] sm:$0xff] %vm3987_vm4, %v3984_v37 }

</bundles_post_ra>
